<compile_context>
chip_gen: v6e
topology: v6e:2x2x1
jax: 0.10.0
libtpu: 0.0.40
codegen_flags: <defaults>
</compile_context>

<pallas_src>
import functools

import jax
import jax.numpy as jnp
from jax.experimental import pallas as pl
from jax.experimental.pallas import tpu as pltpu


def _fused_cnn_kernel(x_ref, mask_ref,
                      w1_ref, b1_ref, w2_ref, b2_ref, w3_ref, b3_ref,
                      o_ref, *, Wp):
    """One batch-block per grid step.

    x_ref   : (Cin_pad, L)  padded-flat input, L = Nb*S_pad, borders zero
    mask_ref: (1, L)        1.0 on interior pixels, 0.0 on halo / lane padding
    w1,w2   : (9, Cout, Cin) per-tap matmul weights     b*: (Cout, 1)
    w3      : (9, 32, 1)    per-tap per-channel weights for the Cout=1 layer
    o_ref   : (1, L)        padded-flat sigmoid output (wrapper crops halo)
    """
    L = x_ref.shape[-1]
    # Tap offsets in padded-flat coordinates (dy-major, dx-minor — must match
    # the per-tap weight layout built in _prep_layer).
    offsets = [(dy - 1) * Wp + (dx - 1) for dy in range(3) for dx in range(3)]
    mask = mask_ref[...]                                  # (1, L)

    def tap(a, off):
        # b[:, q] = a[:, (q + off) mod L].  Cyclic wrap-around only reaches
        # halo / lane-pad output positions: re-zeroed by `mask` (layers 1-2)
        # or cropped by the wrapper (layer 3).  XLU rotate -> free-ish slot.
        if off == 0:
            return a
        return pltpu.roll(a, (-off) % L, axis=1)

    def conv3x3_mxu(a, w_ref, b_ref):
        # a: (Cin, L) f32 padded-flat activation, border + lane pad are zero.
        # 9 accumulating per-tap matmuls instead of one big im2col matmul:
        # only one rolled copy of `a` is live at a time.
        a_mm = a.astype(w_ref.dtype)        # optional bf16 operands (v6e/v7x)
        acc = None
        for t, off in enumerate(offsets):
            y = jax.lax.dot_general(w_ref[t], tap(a_mm, off),
                                    (((1,), (0,)), ((), ())),
                                    preferred_element_type=jnp.float32)
            acc = y if acc is None else acc + y
        out = jnp.maximum(acc + b_ref[...], 0.0)          # bias + ReLU (f32)
        return out * mask            # re-zero border -> next layer's zero pad

    def conv3x3_vpu_cout1(a, w_ref, b_ref):
        # Cout=1: skip the M=1 MXU push/pop round trip — 9 broadcast
        # multiply-accumulates on the VPU plus one sublane reduction (XLU).
        acc = None
        for t, off in enumerate(offsets):
            y = w_ref[t] * tap(a, off)                    # (32,1) * (32,L)
            acc = y if acc is None else acc + y
        out = jnp.sum(acc, axis=0, keepdims=True) + b_ref[...]   # (1, L)
        return jax.nn.sigmoid(out)                        # EUP

    a0 = x_ref[...]                                       # (Cin_pad, L)
    a1 = conv3x3_mxu(a0, w1_ref, b1_ref)                  # (16, L)
    a2 = conv3x3_mxu(a1, w2_ref, b2_ref)                  # (32, L)
    o_ref[...] = conv3x3_vpu_cout1(a2, w3_ref, b3_ref)    # (1, L)


def _prep_layer(w_hwio, b, matmul_dtype):
    """HWIO (3,3,Cin,Cout) -> per-tap weights (9, Cout, Cin_pad), bias (Cout,1).

    Cin is zero-padded to a multiple of 8 so the activation slab it contracts
    against is sublane-tile aligned (padded weights are zero -> no effect)."""
    kh, kw, cin, cout = w_hwio.shape
    cin_pad = ((cin + 7) // 8) * 8
    if cin_pad > cin:
        w_hwio = jnp.pad(w_hwio, ((0, 0), (0, 0), (0, cin_pad - cin), (0, 0)))
    w_taps = jnp.transpose(w_hwio.reshape(kh * kw, cin_pad, cout), (0, 2, 1))
    return w_taps.astype(matmul_dtype), b.reshape(cout, 1).astype(jnp.float32)


def simpler_cnn_forward(x_nchw, params, *, images_per_block=None,
                        matmul_dtype=jnp.float32):
    N, C, H, W = x_nchw.shape
    Hp, Wp = H + 2, W + 2
    S = Hp * Wp                               # 324 for 16x16 input
    S_pad = ((S + 127) // 128) * 128          # 384: lane-dense spatial axis
    C_pad = ((C + 7) // 8) * 8                # 8: sublane-aligned channels

    if images_per_block is None:
        # Keep >= 2 grid steps (both v7x TensorCores busy) and cap the
        # per-step working set (~3x activation slabs for double-buffered I/O
        # and temporaries) far below v5e's 16 MiB default scoped VMEM.
        per_image = (C_pad + 16 + 32 + 1) * S_pad * 4 * 3
        nb_cap = max(1, (8 << 20) // per_image)
        images_per_block = max(1, min(nb_cap, max(1, N // 2)))
    Nb = images_per_block
    n_blocks = -(-N // Nb)
    N_pad = n_blocks * Nb
    L = Nb * S_pad

    # Pad once in the wrapper: batch -> N_pad, channels -> C_pad, 1-px spatial
    # halo, flat spatial -> S_pad; then stack Nb images along the lane axis.
    x_p = jnp.pad(x_nchw.astype(jnp.float32),
                  ((0, N_pad - N), (0, C_pad - C), (1, 1), (1, 1)))
    x_flat = jnp.pad(x_p.reshape(N_pad, C_pad, S),
                     ((0, 0), (0, 0), (0, S_pad - S)))
    x_blk = (x_flat.reshape(n_blocks, Nb, C_pad, S_pad)
             .transpose(0, 2, 1, 3).reshape(n_blocks, C_pad, L))

    # Interior mask (1 on real pixels, 0 on halo + lane padding), tiled Nb
    # times so it covers the whole batch-stacked lane axis.
    mask1 = jnp.zeros((Hp, Wp), jnp.float32).at[1:H + 1, 1:W + 1].set(1.0)
    mask1 = jnp.pad(mask1.reshape(1, S), ((0, 0), (0, S_pad - S)))
    mask = jnp.tile(mask1, (1, Nb))

    (w1, b1), (w2, b2) = [_prep_layer(w, b, matmul_dtype)
                          for (w, b) in params[:2]]
    w3t, b3 = _prep_layer(params[2][0], params[2][1], jnp.float32)
    w3v = jnp.transpose(w3t, (0, 2, 1))       # (9, 32, 1) VPU column weights

    kern = functools.partial(_fused_cnn_kernel, Wp=Wp)

    def _const_spec(arr):
        zeros = (0,) * arr.ndim
        return pl.BlockSpec(arr.shape, lambda n: zeros)

    out_blk = pl.pallas_call(
        kern,
        out_shape=jax.ShapeDtypeStruct((n_blocks, 1, L), jnp.float32),
        grid=(n_blocks,),
        in_specs=[
            pl.BlockSpec((pl.Squeezed(), C_pad, L), lambda n: (n, 0, 0)),
            _const_spec(mask),
            _const_spec(w1), _const_spec(b1),
            _const_spec(w2), _const_spec(b2),
            _const_spec(w3v), _const_spec(b3),
        ],
        out_specs=pl.BlockSpec((pl.Squeezed(), 1, L), lambda n: (n, 0, 0)),
        compiler_params=pltpu.CompilerParams(
            dimension_semantics=("parallel",)),
    )(x_blk, mask, w1, b1, w2, b2, w3v, b3)

    # Unstack the lane-axis batch, drop lane / batch padding, crop the halo
    # (free layout plumbing in XLA).
    out = out_blk.reshape(N_pad, S_pad)[:N, :S]
    return out.reshape(N, 1, Hp, Wp)[:, :, 1:H + 1, 1:W + 1]


def init_params(key):
    """Deterministic synthetic parameters (same shapes as the PyTorch module),
    stored HWIO (PyTorch is OIHW: w_hwio[dy,dx,ci,co] = w_torch[co,ci,dy,dx])."""
    chans = [(3, 16), (16, 32), (32, 1)]
    params = []
    for i, (cin, cout) in enumerate(chans):
        kw, kb = jax.random.split(jax.random.fold_in(key, i))
        scale = 1.0 / jnp.sqrt(9.0 * cin)
        w = jax.random.uniform(kw, (3, 3, cin, cout), jnp.float32,
                               minval=-scale, maxval=scale)
        b = jax.random.uniform(kb, (cout,), jnp.float32,
                               minval=-scale, maxval=scale)
        params.append((w, b))
    return params


def _reference_forward(x_nchw, params):
    """Pure-JAX reference (lax.conv) for the correctness check."""
    x = jnp.transpose(x_nchw, (0, 2, 3, 1))
    acts = [jax.nn.relu, jax.nn.relu, jax.nn.sigmoid]
    for (w, b), act in zip(params, acts):
        dn = jax.lax.conv_dimension_numbers(x.shape, w.shape,
                                            ("NHWC", "HWIO", "NHWC"))
        x = jax.lax.conv_general_dilated(x, w, (1, 1), "SAME",
                                         dimension_numbers=dn)
        x = act(x + b[None, None, None, :])
    return jnp.transpose(x, (0, 3, 1, 2))


if __name__ == "__main__":
    key = jax.random.PRNGKey(0)
    kx, kp = jax.random.split(key)
    # PyTorch-style NCHW input: batch=2, channels=3 (RGB), 16x16 spatial.
    x = jax.random.normal(kx, (2, 3, 16, 16), jnp.float32)
    params = init_params(kp)

    out = jax.block_until_ready(jax.jit(simpler_cnn_forward)(x, params))
    assert out.shape == (2, 1, 16, 16), out.shape

    ref = jax.block_until_ready(_reference_forward(x, params))
    assert jnp.allclose(out, ref, atol=1e-4, rtol=1e-4), \
        float(jnp.max(jnp.abs(out - ref)))

    print("KERNEL_OK")
</pallas_src>

<mosaic_0001>
module attributes {stable_mosaic.version = 11 : i64} {
  func.func @_fused_cnn_kernel(%arg0: i32, %arg1: memref<1x8x384xf32, #tpu.memory_space<vmem>>, %arg2: memref<1x384xf32, #tpu.memory_space<vmem>>, %arg3: memref<9x16x8xf32, #tpu.memory_space<vmem>>, %arg4: memref<16x1xf32, #tpu.memory_space<vmem>>, %arg5: memref<9x32x16xf32, #tpu.memory_space<vmem>>, %arg6: memref<32x1xf32, #tpu.memory_space<vmem>>, %arg7: memref<9x32x1xf32, #tpu.memory_space<vmem>>, %arg8: memref<1x1xf32, #tpu.memory_space<vmem>>, %arg9: memref<1x1x384xf32, #tpu.memory_space<vmem>>) attributes {dimension_semantics = [#tpu.dimension_semantics<parallel>], iteration_bounds = array<i64: 2>, scalar_prefetch = 0 : i64, scratch_operands = 0 : i64, tpu.core_type = #tpu.core_type<tc>, window_params = [{transform_indices = @transform_0, window_bounds = array<i64: 1, 8, 384>}, {pipeline_mode = #tpu.pipeline_mode<synchronous>, transform_indices = @transform_1, window_bounds = array<i64: 1, 384>}, {pipeline_mode = #tpu.pipeline_mode<synchronous>, transform_indices = @transform_2, window_bounds = array<i64: 9, 16, 8>}, {pipeline_mode = #tpu.pipeline_mode<synchronous>, transform_indices = @transform_3, window_bounds = array<i64: 16, 1>}, {pipeline_mode = #tpu.pipeline_mode<synchronous>, transform_indices = @transform_4, window_bounds = array<i64: 9, 32, 16>}, {pipeline_mode = #tpu.pipeline_mode<synchronous>, transform_indices = @transform_5, window_bounds = array<i64: 32, 1>}, {pipeline_mode = #tpu.pipeline_mode<synchronous>, transform_indices = @transform_6, window_bounds = array<i64: 9, 32, 1>}, {pipeline_mode = #tpu.pipeline_mode<synchronous>, transform_indices = @transform_7, window_bounds = array<i64: 1, 1>}, {transform_indices = @transform_8, window_bounds = array<i64: 1, 1, 384>}]} {
    %c0 = arith.constant 0 : index
    %c0_0 = arith.constant 0 : index
    %0 = vector.load %arg2[%c0, %c0_0] : memref<1x384xf32, #tpu.memory_space<vmem>>, vector<1x384xf32>
    %c0_1 = arith.constant 0 : index
    %c0_2 = arith.constant 0 : index
    %c0_3 = arith.constant 0 : index
    %1 = vector.load %arg1[%c0_1, %c0_2, %c0_3] : memref<1x8x384xf32, #tpu.memory_space<vmem>>, vector<1x8x384xf32>
    %2 = vector.shape_cast %1 : vector<1x8x384xf32> to vector<8x384xf32>
    %c0_4 = arith.constant 0 : index
    %c0_5 = arith.constant 0 : index
    %c0_6 = arith.constant 0 : index
    %3 = vector.load %arg3[%c0_4, %c0_5, %c0_6] : memref<9x16x8xf32, #tpu.memory_space<vmem>>, vector<1x16x8xf32>
    %4 = vector.shape_cast %3 : vector<1x16x8xf32> to vector<16x8xf32>
    %c19_i32 = arith.constant 19 : i32
    %5 = tpu.dynamic_rotate %2 by %c19_i32 dim 1 : vector<8x384xf32>, i32 -> vector<8x384xf32>
    %cst = arith.constant dense<0.000000e+00> : vector<16x384xf32>
    %6 = tpu.matmul %4, %5, %cst {dimension_numbers = #tpu.dot_dimension_numbers<[1], [0], [0], [1], [0, 0, 1, 1], [], []>} : vector<16x8xf32>, vector<8x384xf32>, vector<16x384xf32> -> vector<16x384xf32>
    %c1 = arith.constant 1 : index
    %c0_7 = arith.constant 0 : index
    %c0_8 = arith.constant 0 : index
    %7 = vector.load %arg3[%c1, %c0_7, %c0_8] : memref<9x16x8xf32, #tpu.memory_space<vmem>>, vector<1x16x8xf32>
    %8 = vector.shape_cast %7 : vector<1x16x8xf32> to vector<16x8xf32>
    %c18_i32 = arith.constant 18 : i32
    %9 = tpu.dynamic_rotate %2 by %c18_i32 dim 1 : vector<8x384xf32>, i32 -> vector<8x384xf32>
    %cst_9 = arith.constant dense<0.000000e+00> : vector<16x384xf32>
    %10 = tpu.matmul %8, %9, %cst_9 {dimension_numbers = #tpu.dot_dimension_numbers<[1], [0], [0], [1], [0, 0, 1, 1], [], []>} : vector<16x8xf32>, vector<8x384xf32>, vector<16x384xf32> -> vector<16x384xf32>
    %11 = arith.addf %6, %10 : vector<16x384xf32>
    %c2 = arith.constant 2 : index
    %c0_10 = arith.constant 0 : index
    %c0_11 = arith.constant 0 : index
    %12 = vector.load %arg3[%c2, %c0_10, %c0_11] : memref<9x16x8xf32, #tpu.memory_space<vmem>>, vector<1x16x8xf32>
    %13 = vector.shape_cast %12 : vector<1x16x8xf32> to vector<16x8xf32>
    %c17_i32 = arith.constant 17 : i32
    %14 = tpu.dynamic_rotate %2 by %c17_i32 dim 1 : vector<8x384xf32>, i32 -> vector<8x384xf32>
    %cst_12 = arith.constant dense<0.000000e+00> : vector<16x384xf32>
    %15 = tpu.matmul %13, %14, %cst_12 {dimension_numbers = #tpu.dot_dimension_numbers<[1], [0], [0], [1], [0, 0, 1, 1], [], []>} : vector<16x8xf32>, vector<8x384xf32>, vector<16x384xf32> -> vector<16x384xf32>
    %16 = arith.addf %11, %15 : vector<16x384xf32>
    %c3 = arith.constant 3 : index
    %c0_13 = arith.constant 0 : index
    %c0_14 = arith.constant 0 : index
    %17 = vector.load %arg3[%c3, %c0_13, %c0_14] : memref<9x16x8xf32, #tpu.memory_space<vmem>>, vector<1x16x8xf32>
    %18 = vector.shape_cast %17 : vector<1x16x8xf32> to vector<16x8xf32>
    %c1_i32 = arith.constant 1 : i32
    %19 = tpu.dynamic_rotate %2 by %c1_i32 dim 1 : vector<8x384xf32>, i32 -> vector<8x384xf32>
    %cst_15 = arith.constant dense<0.000000e+00> : vector<16x384xf32>
    %20 = tpu.matmul %18, %19, %cst_15 {dimension_numbers = #tpu.dot_dimension_numbers<[1], [0], [0], [1], [0, 0, 1, 1], [], []>} : vector<16x8xf32>, vector<8x384xf32>, vector<16x384xf32> -> vector<16x384xf32>
    %21 = arith.addf %16, %20 : vector<16x384xf32>
    %c4 = arith.constant 4 : index
    %c0_16 = arith.constant 0 : index
    %c0_17 = arith.constant 0 : index
    %22 = vector.load %arg3[%c4, %c0_16, %c0_17] : memref<9x16x8xf32, #tpu.memory_space<vmem>>, vector<1x16x8xf32>
    %23 = vector.shape_cast %22 : vector<1x16x8xf32> to vector<16x8xf32>
    %cst_18 = arith.constant dense<0.000000e+00> : vector<16x384xf32>
    %24 = tpu.matmul %23, %2, %cst_18 {dimension_numbers = #tpu.dot_dimension_numbers<[1], [0], [0], [1], [0, 0, 1, 1], [], []>} : vector<16x8xf32>, vector<8x384xf32>, vector<16x384xf32> -> vector<16x384xf32>
    %25 = arith.addf %21, %24 : vector<16x384xf32>
    %c5 = arith.constant 5 : index
    %c0_19 = arith.constant 0 : index
    %c0_20 = arith.constant 0 : index
    %26 = vector.load %arg3[%c5, %c0_19, %c0_20] : memref<9x16x8xf32, #tpu.memory_space<vmem>>, vector<1x16x8xf32>
    %27 = vector.shape_cast %26 : vector<1x16x8xf32> to vector<16x8xf32>
    %c383_i32 = arith.constant 383 : i32
    %28 = tpu.dynamic_rotate %2 by %c383_i32 dim 1 : vector<8x384xf32>, i32 -> vector<8x384xf32>
    %cst_21 = arith.constant dense<0.000000e+00> : vector<16x384xf32>
    %29 = tpu.matmul %27, %28, %cst_21 {dimension_numbers = #tpu.dot_dimension_numbers<[1], [0], [0], [1], [0, 0, 1, 1], [], []>} : vector<16x8xf32>, vector<8x384xf32>, vector<16x384xf32> -> vector<16x384xf32>
    %30 = arith.addf %25, %29 : vector<16x384xf32>
    %c6 = arith.constant 6 : index
    %c0_22 = arith.constant 0 : index
    %c0_23 = arith.constant 0 : index
    %31 = vector.load %arg3[%c6, %c0_22, %c0_23] : memref<9x16x8xf32, #tpu.memory_space<vmem>>, vector<1x16x8xf32>
    %32 = vector.shape_cast %31 : vector<1x16x8xf32> to vector<16x8xf32>
    %c367_i32 = arith.constant 367 : i32
    %33 = tpu.dynamic_rotate %2 by %c367_i32 dim 1 : vector<8x384xf32>, i32 -> vector<8x384xf32>
    %cst_24 = arith.constant dense<0.000000e+00> : vector<16x384xf32>
    %34 = tpu.matmul %32, %33, %cst_24 {dimension_numbers = #tpu.dot_dimension_numbers<[1], [0], [0], [1], [0, 0, 1, 1], [], []>} : vector<16x8xf32>, vector<8x384xf32>, vector<16x384xf32> -> vector<16x384xf32>
    %35 = arith.addf %30, %34 : vector<16x384xf32>
    %c7 = arith.constant 7 : index
    %c0_25 = arith.constant 0 : index
    %c0_26 = arith.constant 0 : index
    %36 = vector.load %arg3[%c7, %c0_25, %c0_26] : memref<9x16x8xf32, #tpu.memory_space<vmem>>, vector<1x16x8xf32>
    %37 = vector.shape_cast %36 : vector<1x16x8xf32> to vector<16x8xf32>
    %c366_i32 = arith.constant 366 : i32
    %38 = tpu.dynamic_rotate %2 by %c366_i32 dim 1 : vector<8x384xf32>, i32 -> vector<8x384xf32>
    %cst_27 = arith.constant dense<0.000000e+00> : vector<16x384xf32>
    %39 = tpu.matmul %37, %38, %cst_27 {dimension_numbers = #tpu.dot_dimension_numbers<[1], [0], [0], [1], [0, 0, 1, 1], [], []>} : vector<16x8xf32>, vector<8x384xf32>, vector<16x384xf32> -> vector<16x384xf32>
    %40 = arith.addf %35, %39 : vector<16x384xf32>
    %c8 = arith.constant 8 : index
    %c0_28 = arith.constant 0 : index
    %c0_29 = arith.constant 0 : index
    %41 = vector.load %arg3[%c8, %c0_28, %c0_29] : memref<9x16x8xf32, #tpu.memory_space<vmem>>, vector<1x16x8xf32>
    %42 = vector.shape_cast %41 : vector<1x16x8xf32> to vector<16x8xf32>
    %c365_i32 = arith.constant 365 : i32
    %43 = tpu.dynamic_rotate %2 by %c365_i32 dim 1 : vector<8x384xf32>, i32 -> vector<8x384xf32>
    %cst_30 = arith.constant dense<0.000000e+00> : vector<16x384xf32>
    %44 = tpu.matmul %42, %43, %cst_30 {dimension_numbers = #tpu.dot_dimension_numbers<[1], [0], [0], [1], [0, 0, 1, 1], [], []>} : vector<16x8xf32>, vector<8x384xf32>, vector<16x384xf32> -> vector<16x384xf32>
    %45 = arith.addf %40, %44 : vector<16x384xf32>
    %c0_31 = arith.constant 0 : index
    %c0_32 = arith.constant 0 : index
    %46 = vector.load %arg4[%c0_31, %c0_32] : memref<16x1xf32, #tpu.memory_space<vmem>>, vector<16x1xf32>
    %47 = vector.broadcast %46 : vector<16x1xf32> to vector<16x384xf32>
    %48 = arith.addf %45, %47 : vector<16x384xf32>
    %cst_33 = arith.constant 0.000000e+00 : f32
    %49 = vector.broadcast %cst_33 : f32 to vector<16x384xf32>
    %50 = arith.maximumf %48, %49 : vector<16x384xf32>
    %51 = vector.broadcast %0 : vector<1x384xf32> to vector<16x384xf32>
    %52 = arith.mulf %50, %51 : vector<16x384xf32>
    %c0_34 = arith.constant 0 : index
    %c0_35 = arith.constant 0 : index
    %c0_36 = arith.constant 0 : index
    %53 = vector.load %arg5[%c0_34, %c0_35, %c0_36] : memref<9x32x16xf32, #tpu.memory_space<vmem>>, vector<1x32x16xf32>
    %54 = vector.shape_cast %53 : vector<1x32x16xf32> to vector<32x16xf32>
    %c19_i32_37 = arith.constant 19 : i32
    %55 = tpu.dynamic_rotate %52 by %c19_i32_37 dim 1 : vector<16x384xf32>, i32 -> vector<16x384xf32>
    %cst_38 = arith.constant dense<0.000000e+00> : vector<32x384xf32>
    %56 = tpu.matmul %54, %55, %cst_38 {dimension_numbers = #tpu.dot_dimension_numbers<[1], [0], [0], [1], [0, 0, 1, 1], [], []>} : vector<32x16xf32>, vector<16x384xf32>, vector<32x384xf32> -> vector<32x384xf32>
    %c1_39 = arith.constant 1 : index
    %c0_40 = arith.constant 0 : index
    %c0_41 = arith.constant 0 : index
    %57 = vector.load %arg5[%c1_39, %c0_40, %c0_41] : memref<9x32x16xf32, #tpu.memory_space<vmem>>, vector<1x32x16xf32>
    %58 = vector.shape_cast %57 : vector<1x32x16xf32> to vector<32x16xf32>
    %c18_i32_42 = arith.constant 18 : i32
    %59 = tpu.dynamic_rotate %52 by %c18_i32_42 dim 1 : vector<16x384xf32>, i32 -> vector<16x384xf32>
    %cst_43 = arith.constant dense<0.000000e+00> : vector<32x384xf32>
    %60 = tpu.matmul %58, %59, %cst_43 {dimension_numbers = #tpu.dot_dimension_numbers<[1], [0], [0], [1], [0, 0, 1, 1], [], []>} : vector<32x16xf32>, vector<16x384xf32>, vector<32x384xf32> -> vector<32x384xf32>
    %61 = arith.addf %56, %60 : vector<32x384xf32>
    %c2_44 = arith.constant 2 : index
    %c0_45 = arith.constant 0 : index
    %c0_46 = arith.constant 0 : index
    %62 = vector.load %arg5[%c2_44, %c0_45, %c0_46] : memref<9x32x16xf32, #tpu.memory_space<vmem>>, vector<1x32x16xf32>
    %63 = vector.shape_cast %62 : vector<1x32x16xf32> to vector<32x16xf32>
    %c17_i32_47 = arith.constant 17 : i32
    %64 = tpu.dynamic_rotate %52 by %c17_i32_47 dim 1 : vector<16x384xf32>, i32 -> vector<16x384xf32>
    %cst_48 = arith.constant dense<0.000000e+00> : vector<32x384xf32>
    %65 = tpu.matmul %63, %64, %cst_48 {dimension_numbers = #tpu.dot_dimension_numbers<[1], [0], [0], [1], [0, 0, 1, 1], [], []>} : vector<32x16xf32>, vector<16x384xf32>, vector<32x384xf32> -> vector<32x384xf32>
    %66 = arith.addf %61, %65 : vector<32x384xf32>
    %c3_49 = arith.constant 3 : index
    %c0_50 = arith.constant 0 : index
    %c0_51 = arith.constant 0 : index
    %67 = vector.load %arg5[%c3_49, %c0_50, %c0_51] : memref<9x32x16xf32, #tpu.memory_space<vmem>>, vector<1x32x16xf32>
    %68 = vector.shape_cast %67 : vector<1x32x16xf32> to vector<32x16xf32>
    %c1_i32_52 = arith.constant 1 : i32
    %69 = tpu.dynamic_rotate %52 by %c1_i32_52 dim 1 : vector<16x384xf32>, i32 -> vector<16x384xf32>
    %cst_53 = arith.constant dense<0.000000e+00> : vector<32x384xf32>
    %70 = tpu.matmul %68, %69, %cst_53 {dimension_numbers = #tpu.dot_dimension_numbers<[1], [0], [0], [1], [0, 0, 1, 1], [], []>} : vector<32x16xf32>, vector<16x384xf32>, vector<32x384xf32> -> vector<32x384xf32>
    %71 = arith.addf %66, %70 : vector<32x384xf32>
    %c4_54 = arith.constant 4 : index
    %c0_55 = arith.constant 0 : index
    %c0_56 = arith.constant 0 : index
    %72 = vector.load %arg5[%c4_54, %c0_55, %c0_56] : memref<9x32x16xf32, #tpu.memory_space<vmem>>, vector<1x32x16xf32>
    %73 = vector.shape_cast %72 : vector<1x32x16xf32> to vector<32x16xf32>
    %cst_57 = arith.constant dense<0.000000e+00> : vector<32x384xf32>
    %74 = tpu.matmul %73, %52, %cst_57 {dimension_numbers = #tpu.dot_dimension_numbers<[1], [0], [0], [1], [0, 0, 1, 1], [], []>} : vector<32x16xf32>, vector<16x384xf32>, vector<32x384xf32> -> vector<32x384xf32>
    %75 = arith.addf %71, %74 : vector<32x384xf32>
    %c5_58 = arith.constant 5 : index
    %c0_59 = arith.constant 0 : index
    %c0_60 = arith.constant 0 : index
    %76 = vector.load %arg5[%c5_58, %c0_59, %c0_60] : memref<9x32x16xf32, #tpu.memory_space<vmem>>, vector<1x32x16xf32>
    %77 = vector.shape_cast %76 : vector<1x32x16xf32> to vector<32x16xf32>
    %c383_i32_61 = arith.constant 383 : i32
    %78 = tpu.dynamic_rotate %52 by %c383_i32_61 dim 1 : vector<16x384xf32>, i32 -> vector<16x384xf32>
    %cst_62 = arith.constant dense<0.000000e+00> : vector<32x384xf32>
    %79 = tpu.matmul %77, %78, %cst_62 {dimension_numbers = #tpu.dot_dimension_numbers<[1], [0], [0], [1], [0, 0, 1, 1], [], []>} : vector<32x16xf32>, vector<16x384xf32>, vector<32x384xf32> -> vector<32x384xf32>
    %80 = arith.addf %75, %79 : vector<32x384xf32>
    %c6_63 = arith.constant 6 : index
    %c0_64 = arith.constant 0 : index
    %c0_65 = arith.constant 0 : index
    %81 = vector.load %arg5[%c6_63, %c0_64, %c0_65] : memref<9x32x16xf32, #tpu.memory_space<vmem>>, vector<1x32x16xf32>
    %82 = vector.shape_cast %81 : vector<1x32x16xf32> to vector<32x16xf32>
    %c367_i32_66 = arith.constant 367 : i32
    %83 = tpu.dynamic_rotate %52 by %c367_i32_66 dim 1 : vector<16x384xf32>, i32 -> vector<16x384xf32>
    %cst_67 = arith.constant dense<0.000000e+00> : vector<32x384xf32>
    %84 = tpu.matmul %82, %83, %cst_67 {dimension_numbers = #tpu.dot_dimension_numbers<[1], [0], [0], [1], [0, 0, 1, 1], [], []>} : vector<32x16xf32>, vector<16x384xf32>, vector<32x384xf32> -> vector<32x384xf32>
    %85 = arith.addf %80, %84 : vector<32x384xf32>
    %c7_68 = arith.constant 7 : index
    %c0_69 = arith.constant 0 : index
    %c0_70 = arith.constant 0 : index
    %86 = vector.load %arg5[%c7_68, %c0_69, %c0_70] : memref<9x32x16xf32, #tpu.memory_space<vmem>>, vector<1x32x16xf32>
    %87 = vector.shape_cast %86 : vector<1x32x16xf32> to vector<32x16xf32>
    %c366_i32_71 = arith.constant 366 : i32
    %88 = tpu.dynamic_rotate %52 by %c366_i32_71 dim 1 : vector<16x384xf32>, i32 -> vector<16x384xf32>
    %cst_72 = arith.constant dense<0.000000e+00> : vector<32x384xf32>
    %89 = tpu.matmul %87, %88, %cst_72 {dimension_numbers = #tpu.dot_dimension_numbers<[1], [0], [0], [1], [0, 0, 1, 1], [], []>} : vector<32x16xf32>, vector<16x384xf32>, vector<32x384xf32> -> vector<32x384xf32>
    %90 = arith.addf %85, %89 : vector<32x384xf32>
    %c8_73 = arith.constant 8 : index
    %c0_74 = arith.constant 0 : index
    %c0_75 = arith.constant 0 : index
    %91 = vector.load %arg5[%c8_73, %c0_74, %c0_75] : memref<9x32x16xf32, #tpu.memory_space<vmem>>, vector<1x32x16xf32>
    %92 = vector.shape_cast %91 : vector<1x32x16xf32> to vector<32x16xf32>
    %c365_i32_76 = arith.constant 365 : i32
    %93 = tpu.dynamic_rotate %52 by %c365_i32_76 dim 1 : vector<16x384xf32>, i32 -> vector<16x384xf32>
    %cst_77 = arith.constant dense<0.000000e+00> : vector<32x384xf32>
    %94 = tpu.matmul %92, %93, %cst_77 {dimension_numbers = #tpu.dot_dimension_numbers<[1], [0], [0], [1], [0, 0, 1, 1], [], []>} : vector<32x16xf32>, vector<16x384xf32>, vector<32x384xf32> -> vector<32x384xf32>
    %95 = arith.addf %90, %94 : vector<32x384xf32>
    %c0_78 = arith.constant 0 : index
    %c0_79 = arith.constant 0 : index
    %96 = vector.load %arg6[%c0_78, %c0_79] : memref<32x1xf32, #tpu.memory_space<vmem>>, vector<32x1xf32>
    %97 = vector.broadcast %96 : vector<32x1xf32> to vector<32x384xf32>
    %98 = arith.addf %95, %97 : vector<32x384xf32>
    %cst_80 = arith.constant 0.000000e+00 : f32
    %99 = vector.broadcast %cst_80 : f32 to vector<32x384xf32>
    %100 = arith.maximumf %98, %99 : vector<32x384xf32>
    %101 = vector.broadcast %0 : vector<1x384xf32> to vector<32x384xf32>
    %102 = arith.mulf %100, %101 : vector<32x384xf32>
    %c0_81 = arith.constant 0 : index
    %c0_82 = arith.constant 0 : index
    %c0_83 = arith.constant 0 : index
    %103 = vector.load %arg7[%c0_81, %c0_82, %c0_83] : memref<9x32x1xf32, #tpu.memory_space<vmem>>, vector<1x32x1xf32>
    %104 = vector.shape_cast %103 : vector<1x32x1xf32> to vector<32x1xf32>
    %c19_i32_84 = arith.constant 19 : i32
    %105 = tpu.dynamic_rotate %102 by %c19_i32_84 dim 1 : vector<32x384xf32>, i32 -> vector<32x384xf32>
    %106 = vector.broadcast %104 : vector<32x1xf32> to vector<32x384xf32>
    %107 = arith.mulf %106, %105 : vector<32x384xf32>
    %c1_85 = arith.constant 1 : index
    %c0_86 = arith.constant 0 : index
    %c0_87 = arith.constant 0 : index
    %108 = vector.load %arg7[%c1_85, %c0_86, %c0_87] : memref<9x32x1xf32, #tpu.memory_space<vmem>>, vector<1x32x1xf32>
    %109 = vector.shape_cast %108 : vector<1x32x1xf32> to vector<32x1xf32>
    %c18_i32_88 = arith.constant 18 : i32
    %110 = tpu.dynamic_rotate %102 by %c18_i32_88 dim 1 : vector<32x384xf32>, i32 -> vector<32x384xf32>
    %111 = vector.broadcast %109 : vector<32x1xf32> to vector<32x384xf32>
    %112 = arith.mulf %111, %110 : vector<32x384xf32>
    %113 = arith.addf %107, %112 : vector<32x384xf32>
    %c2_89 = arith.constant 2 : index
    %c0_90 = arith.constant 0 : index
    %c0_91 = arith.constant 0 : index
    %114 = vector.load %arg7[%c2_89, %c0_90, %c0_91] : memref<9x32x1xf32, #tpu.memory_space<vmem>>, vector<1x32x1xf32>
    %115 = vector.shape_cast %114 : vector<1x32x1xf32> to vector<32x1xf32>
    %c17_i32_92 = arith.constant 17 : i32
    %116 = tpu.dynamic_rotate %102 by %c17_i32_92 dim 1 : vector<32x384xf32>, i32 -> vector<32x384xf32>
    %117 = vector.broadcast %115 : vector<32x1xf32> to vector<32x384xf32>
    %118 = arith.mulf %117, %116 : vector<32x384xf32>
    %119 = arith.addf %113, %118 : vector<32x384xf32>
    %c3_93 = arith.constant 3 : index
    %c0_94 = arith.constant 0 : index
    %c0_95 = arith.constant 0 : index
    %120 = vector.load %arg7[%c3_93, %c0_94, %c0_95] : memref<9x32x1xf32, #tpu.memory_space<vmem>>, vector<1x32x1xf32>
    %121 = vector.shape_cast %120 : vector<1x32x1xf32> to vector<32x1xf32>
    %c1_i32_96 = arith.constant 1 : i32
    %122 = tpu.dynamic_rotate %102 by %c1_i32_96 dim 1 : vector<32x384xf32>, i32 -> vector<32x384xf32>
    %123 = vector.broadcast %121 : vector<32x1xf32> to vector<32x384xf32>
    %124 = arith.mulf %123, %122 : vector<32x384xf32>
    %125 = arith.addf %119, %124 : vector<32x384xf32>
    %c4_97 = arith.constant 4 : index
    %c0_98 = arith.constant 0 : index
    %c0_99 = arith.constant 0 : index
    %126 = vector.load %arg7[%c4_97, %c0_98, %c0_99] : memref<9x32x1xf32, #tpu.memory_space<vmem>>, vector<1x32x1xf32>
    %127 = vector.shape_cast %126 : vector<1x32x1xf32> to vector<32x1xf32>
    %128 = vector.broadcast %127 : vector<32x1xf32> to vector<32x384xf32>
    %129 = arith.mulf %128, %102 : vector<32x384xf32>
    %130 = arith.addf %125, %129 : vector<32x384xf32>
    %c5_100 = arith.constant 5 : index
    %c0_101 = arith.constant 0 : index
    %c0_102 = arith.constant 0 : index
    %131 = vector.load %arg7[%c5_100, %c0_101, %c0_102] : memref<9x32x1xf32, #tpu.memory_space<vmem>>, vector<1x32x1xf32>
    %132 = vector.shape_cast %131 : vector<1x32x1xf32> to vector<32x1xf32>
    %c383_i32_103 = arith.constant 383 : i32
    %133 = tpu.dynamic_rotate %102 by %c383_i32_103 dim 1 : vector<32x384xf32>, i32 -> vector<32x384xf32>
    %134 = vector.broadcast %132 : vector<32x1xf32> to vector<32x384xf32>
    %135 = arith.mulf %134, %133 : vector<32x384xf32>
    %136 = arith.addf %130, %135 : vector<32x384xf32>
    %c6_104 = arith.constant 6 : index
    %c0_105 = arith.constant 0 : index
    %c0_106 = arith.constant 0 : index
    %137 = vector.load %arg7[%c6_104, %c0_105, %c0_106] : memref<9x32x1xf32, #tpu.memory_space<vmem>>, vector<1x32x1xf32>
    %138 = vector.shape_cast %137 : vector<1x32x1xf32> to vector<32x1xf32>
    %c367_i32_107 = arith.constant 367 : i32
    %139 = tpu.dynamic_rotate %102 by %c367_i32_107 dim 1 : vector<32x384xf32>, i32 -> vector<32x384xf32>
    %140 = vector.broadcast %138 : vector<32x1xf32> to vector<32x384xf32>
    %141 = arith.mulf %140, %139 : vector<32x384xf32>
    %142 = arith.addf %136, %141 : vector<32x384xf32>
    %c7_108 = arith.constant 7 : index
    %c0_109 = arith.constant 0 : index
    %c0_110 = arith.constant 0 : index
    %143 = vector.load %arg7[%c7_108, %c0_109, %c0_110] : memref<9x32x1xf32, #tpu.memory_space<vmem>>, vector<1x32x1xf32>
    %144 = vector.shape_cast %143 : vector<1x32x1xf32> to vector<32x1xf32>
    %c366_i32_111 = arith.constant 366 : i32
    %145 = tpu.dynamic_rotate %102 by %c366_i32_111 dim 1 : vector<32x384xf32>, i32 -> vector<32x384xf32>
    %146 = vector.broadcast %144 : vector<32x1xf32> to vector<32x384xf32>
    %147 = arith.mulf %146, %145 : vector<32x384xf32>
    %148 = arith.addf %142, %147 : vector<32x384xf32>
    %c8_112 = arith.constant 8 : index
    %c0_113 = arith.constant 0 : index
    %c0_114 = arith.constant 0 : index
    %149 = vector.load %arg7[%c8_112, %c0_113, %c0_114] : memref<9x32x1xf32, #tpu.memory_space<vmem>>, vector<1x32x1xf32>
    %150 = vector.shape_cast %149 : vector<1x32x1xf32> to vector<32x1xf32>
    %c365_i32_115 = arith.constant 365 : i32
    %151 = tpu.dynamic_rotate %102 by %c365_i32_115 dim 1 : vector<32x384xf32>, i32 -> vector<32x384xf32>
    %152 = vector.broadcast %150 : vector<32x1xf32> to vector<32x384xf32>
    %153 = arith.mulf %152, %151 : vector<32x384xf32>
    %154 = arith.addf %148, %153 : vector<32x384xf32>
    %cst_116 = arith.constant dense<0.000000e+00> : vector<384xf32>
    %155 = vector.multi_reduction <add>, %154, %cst_116 [0] : vector<32x384xf32> to vector<384xf32>
    %156 = vector.shape_cast %155 : vector<384xf32> to vector<1x384xf32>
    %c0_117 = arith.constant 0 : index
    %c0_118 = arith.constant 0 : index
    %157 = vector.load %arg8[%c0_117, %c0_118] : memref<1x1xf32, #tpu.memory_space<vmem>>, vector<1x1xf32>
    %158 = vector.broadcast %157 : vector<1x1xf32> to vector<1x384xf32>
    %159 = arith.addf %156, %158 : vector<1x384xf32>
    %160 = arith.negf %159 : vector<1x384xf32>
    %161 = math.exp %160 : vector<1x384xf32>
    %cst_119 = arith.constant 1.000000e+00 : f32
    %162 = vector.broadcast %cst_119 : f32 to vector<1x384xf32>
    %163 = arith.addf %162, %161 : vector<1x384xf32>
    %164 = arith.divf %162, %163 : vector<1x384xf32>
    %c0_120 = arith.constant 0 : index
    %c0_121 = arith.constant 0 : index
    %c0_122 = arith.constant 0 : index
    %165 = vector.load %arg9[%c0_120, %c0_121, %c0_122] : memref<1x1x384xf32, #tpu.memory_space<vmem>>, vector<1x1x384xf32>
    %166 = vector.shape_cast %165 : vector<1x1x384xf32> to vector<1x384xf32>
    %167 = vector.shape_cast %164 : vector<1x384xf32> to vector<1x1x384xf32>
    tpu.vector_store %arg9[%c0_120, %c0_121, %c0_122], %167 {strides = array<i32>} : memref<1x1x384xf32, #tpu.memory_space<vmem>>, vector<1x1x384xf32>,
    return
  }
  func.func @transform_0(%arg0: i32) -> (i32, i32, i32) {
    %c0_i32 = arith.constant 0 : i32
    %c0_i32_0 = arith.constant 0 : i32
    %c0_i32_1 = arith.constant 0 : i32
    return %arg0, %c0_i32, %c0_i32_0 : i32, i32, i32
  }
  func.func @transform_1(%arg0: i32) -> (i32, i32) {
    %c0_i32 = arith.constant 0 : i32
    %c0_i32_0 = arith.constant 0 : i32
    %c0_i32_1 = arith.constant 0 : i32
    return %c0_i32, %c0_i32_0 : i32, i32
  }
  func.func @transform_2(%arg0: i32) -> (i32, i32, i32) {
    %c0_i32 = arith.constant 0 : i32
    %c0_i32_0 = arith.constant 0 : i32
    %c0_i32_1 = arith.constant 0 : i32
    %c0_i32_2 = arith.constant 0 : i32
    return %c0_i32, %c0_i32_0, %c0_i32_1 : i32, i32, i32
  }
  func.func @transform_3(%arg0: i32) -> (i32, i32) {
    %c0_i32 = arith.constant 0 : i32
    %c0_i32_0 = arith.constant 0 : i32
    %c0_i32_1 = arith.constant 0 : i32
    return %c0_i32, %c0_i32_0 : i32, i32
  }
  func.func @transform_4(%arg0: i32) -> (i32, i32, i32) {
    %c0_i32 = arith.constant 0 : i32
    %c0_i32_0 = arith.constant 0 : i32
    %c0_i32_1 = arith.constant 0 : i32
    %c0_i32_2 = arith.constant 0 : i32
    return %c0_i32, %c0_i32_0, %c0_i32_1 : i32, i32, i32
  }
  func.func @transform_5(%arg0: i32) -> (i32, i32) {
    %c0_i32 = arith.constant 0 : i32
    %c0_i32_0 = arith.constant 0 : i32
    %c0_i32_1 = arith.constant 0 : i32
    return %c0_i32, %c0_i32_0 : i32, i32
  }
  func.func @transform_6(%arg0: i32) -> (i32, i32, i32) {
    %c0_i32 = arith.constant 0 : i32
    %c0_i32_0 = arith.constant 0 : i32
    %c0_i32_1 = arith.constant 0 : i32
    %c0_i32_2 = arith.constant 0 : i32
    return %c0_i32, %c0_i32_0, %c0_i32_1 : i32, i32, i32
  }
  func.func @transform_7(%arg0: i32) -> (i32, i32) {
    %c0_i32 = arith.constant 0 : i32
    %c0_i32_0 = arith.constant 0 : i32
    %c0_i32_1 = arith.constant 0 : i32
    return %c0_i32, %c0_i32_0 : i32, i32
  }
  func.func @transform_8(%arg0: i32) -> (i32, i32, i32) {
    %c0_i32 = arith.constant 0 : i32
    %c0_i32_0 = arith.constant 0 : i32
    %c0_i32_1 = arith.constant 0 : i32
    return %arg0, %c0_i32, %c0_i32_0 : i32, i32, i32
  }
}

</mosaic_0001>

<bundles_post_ra>
// kernel: simpler_cnn_forward.1
= control target key start
LH: loop header
LB: loop body
LE: loop exit
PB: predicated region body
PF: predicated region fallthrough
CT: control target
= control target key end

     0   :  { %s5312_s29 = smov 0   ;;  %s7099_s0 = inlined_call_operand.vmem [shape: f32[2,8,384], index: 0, kind: input, shape index: {}]   ;;  %s7100_s1 = inlined_call_operand.vmem [shape: f32[1,384], index: 1, kind: input, shape index: {}]   ;;  %s7101_s2 = inlined_call_operand.vmem [shape: f32[9,16,8], index: 2, kind: input, shape index: {}]   ;;  %s7102_s3 = inlined_call_operand.vmem [shape: f32[16,1], index: 3, kind: input, shape index: {}]   ;;  %s7103_s4 = inlined_call_operand.vmem [shape: f32[9,32,16], index: 4, kind: input, shape index: {}]   ;;  %s7104_s5 = inlined_call_operand.vmem [shape: f32[32,1], index: 5, kind: input, shape index: {}]   ;;  %s7105_s6 = inlined_call_operand.vmem [shape: f32[9,32,1], index: 6, kind: input, shape index: {}]   ;;  %s7106_s7 = inlined_call_operand.<no memory space> [shape: f32[1,1], index: 7, kind: input, shape index: {}]   ;;  %s7107_s8 = inlined_call_operand.vmem [shape: f32[2,1,384], index: 8, kind: output, shape index: {}]  }
   0x1   :  { %v13_v0 = vstv %s7106_s7 }
   0x2   :  { %14 = vst [vmem:[#allocation2] sm:$0x1] %v13_v0 }
   0x3 LB: > { %s4795_s30 = sadd.s32 4294967295, %s5251_s29   ;;  %p4799_p0 = scmp.ge.s32.totalorder %s5251_s29, 1  ;;  %s5251_s29 = sphi %s5312_s29, %s20_s29  }
   0x4   : > { %p264_p1 = scmp.lt.s32.totalorder %s5251_s29, 3 }
   0x6   : > { %p265_p2 = pnand %p4799_p0, %p264_p1 }
   0x8   : > { %268 = sbr.rel (%p265_p2) target bundleno = 1198 (0x4ae), region = 52 }
   0xd   : > { %p297_p3 = scmp.lt.s32.totalorder %s4795_s30, 1  ;;  %v5323_v1 = vld [vmem:[%s7101_s2 + $0x10] sm:$0xff]  ;;  %vm337_vm0 = vcmask 64512   ;;  %v5253_v2 = vmov 0.0   ;;  %s5254_s14 = smov 18   ;;  %v1883_v6 = vld [vmem:[%s7102_s3] sm:$0xff]  ;;  %v7108_v9 = vlaneseq }
   0xe   : > { %408 = vmatprep.mubr.f32.mxu0 %v5253_v2  ;;  %5077 = vmatprep.mubr.msk.f32.mxu1 %vm337_vm0, %v5323_v1  ;;  %s5255_s15 = smov 19   ;;  %s5256_s16 = smov 17   ;;  %v1884_v7 = vld [vmem:[%s7102_s3 + $0x8] sm:$0xff]  ;;  %v5262_v8 = vmov 0   ;;  %v4802_v17 = vld [vmem:[%s7101_s2 + $0x18] sm:$0xff]  ;;  %v310_v24 = vld [vmem:[%s7101_s2] sm:$0xff] }
   0xf   : > { %s7177_s30 = smov (!%p297_p3, %s4795_s30), 1  ;;  %s5257_s17 = smov 1   ;;  %5232 = vset.pattern.permute.xlu1 %v5262_v8  ;;  %5231 = vset.pattern.permute.xlu0 %v5262_v8  ;;  %v5395_v10 = vand.u32 127, %v7108_v9  ;;  %v311_v28 = vld [vmem:[%s7101_s2 + $0x8] sm:$0xff]  ;;  %v4811_v29 = vld [vmem:[%s7101_s2 + $0x20] sm:$0xff]  ;;  %v4817_v40 = vld [vmem:[%s7101_s2 + $0x30] sm:$0xff] }
  0x10   : > { %s5210_s7 = smul.u32 24, %s7177_s30  ;;  %s5258_s18 = smov 127   ;;  %v4812_v34 = vld [vmem:[%s7101_s2 + $0x28] sm:$0xff]  ;;  %v4818_v43 = vld [vmem:[%s7101_s2 + $0x38] sm:$0xff]  ;;  %v4823_v44 = vld [vmem:[%s7101_s2 + $0x40] sm:$0xff]  ;;  %vm1974_vm9 = vcmask 130048  }
  0x11   : > { %s5259_s19 = smov 111   ;;  %s5260_s20 = smov 110   ;;  %vm333_vm1 = vcmp.lt.s32.totalorder %v5395_v10, 18  ;;  %vm320_vm2 = vcmp.lt.s32.totalorder %v5395_v10, 19  ;;  %vm663_vm3 = vcmp.lt.s32.totalorder %v5395_v10, 17  ;;  %vm840_vm4 = vcmp.lt.s32.totalorder %v5395_v10, 1 }
  0x12   : > { %s301_s13 = scalar_lea.vmem %s7099_s0, %s5210_s7  ;;  %s5261_s21 = smov 109   ;;  %vm1184_vm5 = vcmp.lt.s32.totalorder %v5395_v10, 127  ;;  %v4824_v49 = vld [vmem:[%s7101_s2 + $0x48] sm:$0xff]  ;;  %vm1361_vm6 = vcmp.lt.s32.totalorder %v5395_v10, 111  ;;  %v4829_v53 = vld [vmem:[%s7101_s2 + $0x50] sm:$0xff]  ;;  %v4830_v58 = vld [vmem:[%s7101_s2 + $0x58] sm:$0xff] }
  0x13   : > { %v5334_v3 = vld [vmem:[%s301_s13 + $0x10] sm:$0xff]  ;;  %v5336_v4 = vld [vmem:[%s301_s13] sm:$0xff]  ;;  %v5342_v5 = vld [vmem:[%s301_s13 + $0x8] sm:$0xff]  ;;  %vm1538_vm7 = vcmp.lt.s32.totalorder %v5395_v10, 110  ;;  %vm1715_vm8 = vcmp.lt.s32.totalorder %v5395_v10, 109 }
  0x14   : > { %331 = vrot.lane.b32.xlu1 %v5334_v3, %s5254_s14  ;;  %327 = vrot.lane.b32.xlu0 %v5336_v4, %s5254_s14  ;;  %v4835_v60 = vld [vmem:[%s7101_s2 + $0x60] sm:$0xff] }
  0x18   : > { %314 = vrot.lane.b32.xlu1 %v5342_v5, %s5255_s15  ;;  %329 = vrot.lane.b32.xlu0 %v5342_v5, %s5254_s14 }
  0x1c   : > { %312 = vrot.lane.b32.xlu1 %v5336_v4, %s5255_s15  ;;  %316 = vrot.lane.b32.xlu0 %v5334_v3, %s5255_s15 }
  0x20   : > { %659 = vrot.lane.b32.xlu1 %v5342_v5, %s5256_s16  ;;  %657 = vrot.lane.b32.xlu0 %v5336_v4, %s5256_s16 }
  0x24   : > { %836 = vrot.lane.b32.xlu1 %v5342_v5, %s5257_s17  ;;  %661 = vrot.lane.b32.xlu0 %v5334_v3, %s5256_s16 }
  0x28   : > { %834 = vrot.lane.b32.xlu1 %v5336_v4, %s5257_s17  ;;  %838 = vrot.lane.b32.xlu0 %v5334_v3, %s5257_s17 }
  0x2c   : > { %1178 = vrot.lane.b32.xlu0 %v5336_v4, %s5258_s18  ;;  %1182 = vrot.lane.b32.xlu1 %v5334_v3, %s5258_s18 }
  0x30   : > { %1180 = vrot.lane.b32.xlu0 %v5342_v5, %s5258_s18  ;;  %1357 = vrot.lane.b32.xlu1 %v5342_v5, %s5259_s19 }
  0x34   : > { %1359 = vrot.lane.b32.xlu0 %v5334_v3, %s5259_s19  ;;  %1355 = vrot.lane.b32.xlu1 %v5336_v4, %s5259_s19 }
  0x38   : > { %1532 = vrot.lane.b32.xlu0 %v5336_v4, %s5260_s20  ;;  %1536 = vrot.lane.b32.xlu1 %v5334_v3, %s5260_s20 }
  0x3c   : > { %1534 = vrot.lane.b32.xlu0 %v5342_v5, %s5260_s20  ;;  %1711 = vrot.lane.b32.xlu1 %v5342_v5, %s5261_s21 }
  0x40   : > { %1709 = vrot.lane.b32.xlu1 %v5336_v4, %s5261_s21  ;;  %1713 = vrot.lane.b32.xlu0 %v5334_v3, %s5261_s21 }
  0x44   : > { %1887 = vperm.xlu1 %5232, %v1883_v6   ;;  %1892 = vperm.xlu0 %5231, %v1884_v7   ;;  %v4841_v6 = vld [vmem:[%s7101_s2 + $0x70] sm:$0xff] }
  0x86   : > { %v332_v11 = vpop.permute.xlu1 %331  ;;  %v328_v12 = vpop.permute.xlu0 %327 }
  0x87   : > { %v336_v18 = vsel %vm333_vm1, %v332_v11, %v328_v12 }
  0x8a   : > { %v315_v13 = vpop.permute.xlu1 %314  ;;  %v330_v14 = vpop.permute.xlu0 %329 }
  0x8b   : > { %v335_v15 = vsel %vm333_vm1, %v328_v12, %v330_v14  ;;  %v334_v16 = vsel %vm333_vm1, %v330_v14, %v332_v11  ;;  %v4842_v11 = vld [vmem:[%s7101_s2 + $0x78] sm:$0xff]  ;;  %v4848_v14 = vld [vmem:[%s7101_s2 + $0x88] sm:$0xff] }
  0x8c   : > { %374 = vmatprep.subr.mxu0 %v335_v15  ;;  %5075 = vmatprep.subr.mxu1 %v334_v16 }
  0x8d   : > { %375 = vmatpush1.msra.mxu0 %v336_v18  ;;  %5076 = vmatpush3.msra.mxu1 %v334_v16 }
  0x8e   : > { %v313_v19 = vpop.permute.xlu1 %312  ;;  %4803 = vmatmul.mubr.msk.f32.vlgmr.msra.gmra.mxu0 %vm337_vm0, %v5323_v1  ;;  %5078 = vmatmul.mubr.msk.f32.vlgmr.msra.gmra.mxu1 %vm337_vm0, %v4802_v17  ;;  %v317_v20 = vpop.permute.xlu0 %316  ;;  %v4836_v1 = vld [vmem:[%s7101_s2 + $0x68] sm:$0xff] }
  0x8f   : > { %v322_v21 = vsel %vm320_vm2, %v313_v19, %v315_v13  ;;  %v321_v22 = vsel %vm320_vm2, %v315_v13, %v317_v20  ;;  %414 = vmatprep.mubr.f32.mxu0 %v5253_v2  ;;  %v323_v23 = vsel %vm320_vm2, %v317_v20, %v313_v19  ;;  %566 = vmatprep.mubr.f32.mxu1 %v5253_v2  ;;  %v4847_v13 = vld [vmem:[%s7101_s2 + $0x80] sm:$0xff] }
  0x90   : > { %532 = vmatprep.subr.mxu1 %v322_v21  ;;  %5080 = vmatprep.subr.mxu0 %v321_v22 }
  0x91   : > { %533 = vmatpush1.msra.mxu1 %v323_v23  ;;  %5081 = vmatpush3.msra.mxu0 %v321_v22 }
  0x92   : > { %v660_v25 = vpop.permute.xlu1 %659  ;;  %4804 = vmatmul.mubr.msk.f32.gmra.mxu0 %vm337_vm0, %v4802_v17  ;;  %4807 = vmatmul.mubr.msk.f32.vlgmr.msra.gmra.mxu1 %vm337_vm0, %v310_v24  ;;  %v658_v26 = vpop.permute.xlu0 %657 }
  0x93   : > { %572 = vmatprep.mubr.f32.mxu1 %v5253_v2  ;;  %5082 = vmatprep.mubr.msk.f32.mxu0 %vm337_vm0, %v310_v24  ;;  %v665_v27 = vsel %vm663_vm3, %v658_v26, %v660_v25 }
  0x94   : > { %703 = vmatprep.subr.mxu0 %v665_v27 }
  0x96   : > { %v837_v30 = vpop.permute.xlu1 %836  ;;  %4808 = vmatmul.mubr.msk.f32.gmra.mxu1 %vm337_vm0, %v311_v28  ;;  %5083 = vmatmul.mubr.msk.f32.vlgmr.msra.gmra.mxu0 %vm337_vm0, %v311_v28  ;;  %v662_v31 = vpop.permute.xlu0 %661 }
  0x97   : > { %v666_v32 = vsel %vm663_vm3, %v662_v31, %v658_v26  ;;  %v664_v33 = vsel %vm663_vm3, %v660_v25, %v662_v31  ;;  %737 = vmatprep.mubr.f32.mxu0 %v5253_v2  ;;  %5087 = vmatprep.mubr.msk.f32.mxu1 %vm337_vm0, %v4811_v29 }
  0x98   : > { %704 = vmatpush1.msra.mxu0 %v666_v32  ;;  %5085 = vmatprep.subr.mxu1 %v664_v33 }
  0x99   : > { %5086 = vmatpush3.msra.mxu1 %v664_v33 }
  0x9a   : > { %v835_v35 = vpop.permute.xlu1 %834  ;;  %4813 = vmatmul.mubr.msk.f32.vlgmr.msra.gmra.mxu0 %vm337_vm0, %v4811_v29  ;;  %5088 = vmatmul.mubr.msk.f32.vlgmr.msra.gmra.mxu1 %vm337_vm0, %v4812_v34  ;;  %v839_v36 = vpop.permute.xlu0 %838 }
  0x9b   : > { %v842_v37 = vsel %vm840_vm4, %v835_v35, %v837_v30  ;;  %v841_v38 = vsel %vm840_vm4, %v837_v30, %v839_v36  ;;  %743 = vmatprep.mubr.f32.mxu0 %v5253_v2  ;;  %v843_v39 = vsel %vm840_vm4, %v839_v36, %v835_v35  ;;  %914 = vmatprep.mubr.f32.mxu1 %v5253_v2 }
  0x9c   : > { %880 = vmatprep.subr.mxu1 %v842_v37  ;;  %5090 = vmatprep.subr.mxu0 %v841_v38 }
  0x9d   : > { %881 = vmatpush1.msra.mxu1 %v843_v39  ;;  %5091 = vmatpush3.msra.mxu0 %v841_v38 }
  0x9e   : > { %4814 = vmatmul.mubr.msk.f32.gmra.mxu0 %vm337_vm0, %v4812_v34  ;;  %4819 = vmatmul.mubr.msk.f32.vlgmr.msra.gmra.mxu1 %vm337_vm0, %v4817_v40  ;;  %v1179_v41 = vpop.permute.xlu0 %1178  ;;  %v1183_v42 = vpop.permute.xlu1 %1182 }
  0x9f   : > { %920 = vmatprep.mubr.f32.mxu1 %v5253_v2  ;;  %5092 = vmatprep.mubr.msk.f32.mxu0 %vm337_vm0, %v4817_v40  ;;  %v1187_v46 = vsel %vm1184_vm5, %v1183_v42, %v1179_v41 }
  0xa0   : > { %1047 = vmatprep.subr.mxu0 %v5342_v5  ;;  %5095 = vmatprep.subr.mxu1 %v5334_v3 }
  0xa1   : > { %5096 = vmatpush3.msra.mxu1 %v5334_v3 }
  0xa2   : > { %4820 = vmatmul.mubr.msk.f32.gmra.mxu1 %vm337_vm0, %v4818_v43  ;;  %5093 = vmatmul.mubr.msk.f32.vlgmr.msra.gmra.mxu0 %vm337_vm0, %v4818_v43  ;;  %v1181_v45 = vpop.permute.xlu0 %1180  ;;  %v1358_v47 = vpop.permute.xlu1 %1357 }
  0xa3   : > { %1048 = vmatpush1.msra.mxu0 %v5336_v4  ;;  %1081 = vmatprep.mubr.f32.mxu0 %v5253_v2  ;;  %v1185_v48 = vsel %vm1184_vm5, %v1181_v45, %v1183_v42  ;;  %v1186_v50 = vsel %vm1184_vm5, %v1179_v41, %v1181_v45 }
  0xa4   : > { %5097 = vmatprep.mubr.msk.f32.mxu1 %vm337_vm0, %v4823_v44  ;;  %1224 = vmatprep.subr.mxu1 %v1185_v48 }
  0xa5   : > { %5100 = vmatprep.subr.mxu0 %v1187_v46 }
  0xa6   : > { %4825 = vmatmul.mubr.msk.f32.vlgmr.msra.gmra.mxu0 %vm337_vm0, %v4823_v44  ;;  %5098 = vmatmul.mubr.msk.f32.vlgmr.msra.gmra.mxu1 %vm337_vm0, %v4824_v49  ;;  %v1360_v51 = vpop.permute.xlu0 %1359  ;;  %v1356_v52 = vpop.permute.xlu1 %1355 }
  0xa7   : > { %1225 = vmatpush1.msra.mxu1 %v1186_v50  ;;  %5101 = vmatpush3.msra.mxu0 %v1187_v46  ;;  %v1362_v54 = vsel %vm1361_vm6, %v1358_v47, %v1360_v51  ;;  %v1364_v55 = vsel %vm1361_vm6, %v1360_v51, %v1356_v52  ;;  %v1363_v59 = vsel %vm1361_vm6, %v1356_v52, %v1358_v47 }
  0xa8   : > { %1087 = vmatprep.mubr.f32.mxu0 %v5253_v2  ;;  %1258 = vmatprep.mubr.f32.mxu1 %v5253_v2 }
  0xa9   : > { %1401 = vmatprep.subr.mxu0 %v1362_v54  ;;  %5105 = vmatprep.subr.mxu1 %v1364_v55 }
  0xaa   : > { %4826 = vmatmul.mubr.msk.f32.gmra.mxu0 %vm337_vm0, %v4824_v49  ;;  %4831 = vmatmul.mubr.msk.f32.vlgmr.msra.gmra.mxu1 %vm337_vm0, %v4829_v53  ;;  %v1533_v56 = vpop.permute.xlu0 %1532  ;;  %v1537_v57 = vpop.permute.xlu1 %1536 }
  0xab   : > { %1264 = vmatprep.mubr.f32.mxu1 %v5253_v2  ;;  %5102 = vmatprep.mubr.msk.f32.mxu0 %vm337_vm0, %v4829_v53  ;;  %v1541_v62 = vsel %vm1538_vm7, %v1537_v57, %v1533_v56 }
  0xac   : > { %5106 = vmatpush3.msra.mxu1 %v1364_v55 }
  0xae   : > { %4832 = vmatmul.mubr.msk.f32.gmra.mxu1 %vm337_vm0, %v4830_v58  ;;  %5103 = vmatmul.mubr.msk.f32.vlgmr.msra.gmra.mxu0 %vm337_vm0, %v4830_v58  ;;  %v1535_v61 = vpop.permute.xlu0 %1534  ;;  %v1712_v63 = vpop.permute.xlu1 %1711 }
  0xaf   : > { %1402 = vmatpush1.msra.mxu0 %v1363_v59  ;;  %1435 = vmatprep.mubr.f32.mxu0 %v5253_v2  ;;  %v1539_v0 = vsel %vm1538_vm7, %v1535_v61, %v1537_v57  ;;  %v1540_v3 = vsel %vm1538_vm7, %v1533_v56, %v1535_v61 }
  0xb0   : > { %5107 = vmatprep.mubr.msk.f32.mxu1 %vm337_vm0, %v4835_v60  ;;  %1578 = vmatprep.subr.mxu1 %v1539_v0 }
  0xb1   : > { %5110 = vmatprep.subr.mxu0 %v1541_v62 }
  0xb2   : > { %4837 = vmatmul.mubr.msk.f32.vlgmr.msra.gmra.mxu0 %vm337_vm0, %v4835_v60  ;;  %5108 = vmatmul.mubr.msk.f32.vlgmr.msra.gmra.mxu1 %vm337_vm0, %v4836_v1  ;;  %v1710_v4 = vpop.permute.xlu1 %1709  ;;  %v1714_v5 = vpop.permute.xlu0 %1713 }
  0xb3   : > { %1579 = vmatpush1.msra.mxu1 %v1540_v3  ;;  %5111 = vmatpush3.msra.mxu0 %v1541_v62  ;;  %v1716_v7 = vsel %vm1715_vm8, %v1712_v63, %v1714_v5  ;;  %v1718_v8 = vsel %vm1715_vm8, %v1714_v5, %v1710_v4  ;;  %v1717_v12 = vsel %vm1715_vm8, %v1710_v4, %v1712_v63 }
  0xb4   : > { %1441 = vmatprep.mubr.f32.mxu0 %v5253_v2  ;;  %1612 = vmatprep.mubr.f32.mxu1 %v5253_v2 }
  0xb5   : > { %1755 = vmatprep.subr.mxu0 %v1716_v7  ;;  %5115 = vmatprep.subr.mxu1 %v1718_v8 }
  0xb6   : > { %4838 = vmatmul.mubr.msk.f32.gmra.mxu0 %vm337_vm0, %v4836_v1  ;;  %4843 = vmatmul.mubr.msk.f32.vlgmr.msra.gmra.mxu1 %vm337_vm0, %v4841_v6 }
  0xb7   : > { %1618 = vmatprep.mubr.f32.mxu1 %v5253_v2  ;;  %5112 = vmatprep.mubr.msk.f32.mxu0 %vm337_vm0, %v4841_v6 }
  0xb8   : > { %5116 = vmatpush3.msra.mxu1 %v1718_v8 }
  0xba   : > { %4844 = vmatmul.mubr.msk.f32.gmra.mxu1 %vm337_vm0, %v4842_v11  ;;  %5113 = vmatmul.mubr.msk.f32.vlgmr.msra.gmra.mxu0 %vm337_vm0, %v4842_v11 }
  0xbb   : > { %1756 = vmatpush1.msra.mxu0 %v1717_v12  ;;  %1789 = vmatprep.mubr.f32.mxu0 %v5253_v2 }
  0xbc   : > { %5117 = vmatprep.mubr.msk.f32.mxu1 %vm337_vm0, %v4847_v13 }
  0xbe   : > { %4849 = vmatmul.mubr.msk.f32.vlgmr.msra.gmra.mxu0 %vm337_vm0, %v4847_v13  ;;  %5118 = vmatmul.mubr.msk.f32.vlgmr.msra.gmra.mxu1 %vm337_vm0, %v4848_v14 }
  0xbf   : > { %1795 = vmatprep.mubr.f32.mxu0 %v5253_v2  ;;  %2051 = vmatprep.mubr.f32.mxu1 %v5253_v2 }
  0xc2   : > { %4850 = vmatmul.mubr.msk.f32.gmra.mxu0 %vm337_vm0, %v4848_v14 }
 0x14e   : > { %v410_v15 = vpop.f32.mrf.mxu0  ;;  %v5079_v16 = vpop.f32.mrf.mxu1 }
 0x150   : > { %v412_v17 = vpop.f32.mrf.mxu0  ;;  %v487_v18 = vpop.f32.mrf.mxu1 }
 0x152   : > { %v416_v19 = vpop.f32.mrf.mxu0  ;;  %v568_v20 = vpop.f32.mrf.mxu1 }
 0x153   : > { %v569_v51 = vadd.f32 %v568_v20, %v410_v15 }
 0x154   : > { %v418_v21 = vpop.f32.mrf.mxu0  ;;  %v570_v22 = vpop.f32.mrf.mxu1 }
 0x155   : > { %v571_v57 = vadd.f32 %v570_v22, %v412_v17 }
 0x156   : > { %v574_v23 = vpop.f32.mrf.mxu1  ;;  %v5084_v24 = vpop.f32.mrf.mxu0 }
 0x157   : > { %v651_v52 = vadd.f32 %v5084_v24, %v5079_v16  ;;  %v575_v62 = vadd.f32 %v574_v23, %v416_v19  ;;  %v5563_v16 = vshrl.u32 %v7108_v9, 7 }
 0x158   : > { %v576_v25 = vpop.f32.mrf.mxu1  ;;  %v645_v26 = vpop.f32.mrf.mxu0 }
 0x159   : > { %v646_v63 = vadd.f32 %v645_v26, %v487_v18  ;;  %v577_v6 = vadd.f32 %v576_v25, %v418_v21  ;;  %7132 = vst [vmem:[#allocation3_spill] sm:$0xff] %v5563_v16 }
 0x15a   : > { %v739_v27 = vpop.f32.mrf.mxu0  ;;  %v5089_v28 = vpop.f32.mrf.mxu1 }
 0x15b   : > { %v825_v55 = vadd.f32 %v739_v27, %v569_v51  ;;  %v830_v56 = vadd.f32 %v5089_v28, %v651_v52 }
 0x15c   : > { %v741_v29 = vpop.f32.mrf.mxu0  ;;  %v816_v30 = vpop.f32.mrf.mxu1 }
 0x15d   : > { %v826_v0 = vadd.f32 %v741_v29, %v571_v57  ;;  %v827_v7 = vadd.f32 %v816_v30, %v646_v63 }
 0x15e   : > { %v745_v31 = vpop.f32.mrf.mxu0  ;;  %v916_v32 = vpop.f32.mrf.mxu1 }
 0x15f   : > { %v1002_v60 = vadd.f32 %v916_v32, %v825_v55  ;;  %v828_v8 = vadd.f32 %v745_v31, %v575_v62 }
 0x160   : > { %v747_v33 = vpop.f32.mrf.mxu0  ;;  %v918_v34 = vpop.f32.mrf.mxu1 }
 0x161   : > { %v1003_v11 = vadd.f32 %v918_v34, %v826_v0  ;;  %v829_v17 = vadd.f32 %v747_v33, %v577_v6  ;;  %v7109_v34 = vsub.s32 0, %v5563_v16  ;;  %v1918_v33 = vsub.s32 2, %v5563_v16 }
 0x162   : > { %v922_v35 = vpop.f32.mrf.mxu1  ;;  %v5094_v36 = vpop.f32.mrf.mxu0 }
 0x163   : > { %v1007_v61 = vadd.f32 %v5094_v36, %v830_v56  ;;  %v1005_v20 = vadd.f32 %v922_v35, %v828_v8  ;;  %v1888_v36 = vpop.permute.xlu1 %1887  ;;  %v1893_v35 = vpop.permute.xlu0 %1892 }
 0x164   : > { %v924_v37 = vpop.f32.mrf.mxu1  ;;  %v993_v38 = vpop.f32.mrf.mxu0 }
 0x165   : > { %v1004_v19 = vadd.f32 %v993_v38, %v827_v7  ;;  %v1006_v27 = vadd.f32 %v924_v37, %v829_v17  ;;  %v306_v37 = vld [vmem:[%s7100_s1] sm:$0x7]  ;;  %v1914_v7 = vsub.s32 1, %v5563_v16 }
 0x166   : > { %v1083_v39 = vpop.f32.mrf.mxu0  ;;  %v5099_v40 = vpop.f32.mrf.mxu1  ;;  %v5572_v55 = vrot.slane %v306_v37, %v7109_v34 }
 0x167   : > { %v1169_v4 = vadd.f32 %v1083_v39, %v1002_v60  ;;  %v1174_v5 = vadd.f32 %v5099_v40, %v1007_v61 }
 0x168   : > { %v1085_v41 = vpop.f32.mrf.mxu0  ;;  %v1160_v42 = vpop.f32.mrf.mxu1 }
 0x169   : > { %v1170_v18 = vadd.f32 %v1085_v41, %v1003_v11  ;;  %v1171_v21 = vadd.f32 %v1160_v42, %v1004_v19 }
 0x16a   : > { %v1089_v43 = vpop.f32.mrf.mxu0  ;;  %v1260_v44 = vpop.f32.mrf.mxu1 }
 0x16b   : > { %v1346_v14 = vadd.f32 %v1260_v44, %v1169_v4  ;;  %v1172_v25 = vadd.f32 %v1089_v43, %v1005_v20  ;;  %v5594_v20 = vrot.slane %v306_v37, %v1914_v7 }
 0x16c   : > { %v1091_v45 = vpop.f32.mrf.mxu0  ;;  %v1262_v46 = vpop.f32.mrf.mxu1 }
 0x16d   : > { %v1347_v28 = vadd.f32 %v1262_v46, %v1170_v18  ;;  %v1173_v38 = vadd.f32 %v1091_v45, %v1006_v27  ;;  %v3876_v27 = vld [vmem:[%s7104_s5] sm:$0xff] }
 0x16e   : > { %v1266_v47 = vpop.f32.mrf.mxu1  ;;  %v5104_v48 = vpop.f32.mrf.mxu0 }
 0x16f   : > { %v1351_v15 = vadd.f32 %v5104_v48, %v1174_v5  ;;  %v1349_v39 = vadd.f32 %v1266_v47, %v1172_v25  ;;  %v3878_v25 = vld [vmem:[%s7104_s5 + $0x10] sm:$0xff] }
 0x170   : > { %v1268_v49 = vpop.f32.mrf.mxu1  ;;  %v1337_v50 = vpop.f32.mrf.mxu0 }
 0x171   : > { %v1348_v40 = vadd.f32 %v1337_v50, %v1171_v21  ;;  %v1350_v46 = vadd.f32 %v1268_v49, %v1173_v38  ;;  %v5574_v50 = vrot.slane %v306_v37, %v1918_v33  ;;  %v3877_v21 = vld [vmem:[%s7104_s5 + $0x8] sm:$0xff]  ;;  %v4959_v38 = vld [vmem:[%s7105_s6 + $0x30] sm:$0xff] }
 0x172   : > { %v1437_v53 = vpop.f32.mrf.mxu0  ;;  %v5109_v54 = vpop.f32.mrf.mxu1  ;;  %v4958_v33 = vld [vmem:[%s7105_s6 + $0x28] sm:$0xff] }
 0x173   : > { %v1523_v24 = vadd.f32 %v1437_v53, %v1346_v14  ;;  %v1528_v26 = vadd.f32 %v5109_v54, %v1351_v15 }
 0x174   : > { %v1439_v58 = vpop.f32.mrf.mxu0  ;;  %v1514_v59 = vpop.f32.mrf.mxu1 }
 0x175   : > { %v1524_v41 = vadd.f32 %v1439_v58, %v1347_v28  ;;  %v1525_v51 = vadd.f32 %v1514_v59, %v1348_v40  ;;  %v3879_v28 = vld [vmem:[%s7104_s5 + $0x18] sm:$0xff] }
 0x176   : > { %v1443_v1 = vpop.f32.mrf.mxu0  ;;  %v1614_v3 = vpop.f32.mrf.mxu1 }
 0x177   : > { %v1700_v31 = vadd.f32 %v1614_v3, %v1523_v24  ;;  %v1526_v52 = vadd.f32 %v1443_v1, %v1349_v39  ;;  %v4960_v39 = vld [vmem:[%s7105_s6 + $0x38] sm:$0xff] }
 0x178   : > { %v1445_v12 = vpop.f32.mrf.mxu0  ;;  %v1616_v13 = vpop.f32.mrf.mxu1 }
 0x179   : > { %v1701_v53 = vadd.f32 %v1616_v13, %v1524_v41  ;;  %v1527_v57 = vadd.f32 %v1445_v12, %v1350_v46  ;;  %v5590_v12 = vld [vmem:[%s7103_s4 + $0x20] sm:$0xff]  ;;  %v4963_v46 = vld [vmem:[%s7105_s6 + $0x50] sm:$0xff] }
 0x17a   : > { %v1620_v22 = vpop.f32.mrf.mxu1  ;;  %v5114_v23 = vpop.f32.mrf.mxu0  ;;  %5124 = vmatprep.mubr.msk.f32.mxu0 %vm1974_vm9, %v5590_v12  ;;  %v4961_v41 = vld [vmem:[%s7105_s6 + $0x40] sm:$0xff] }
 0x17b   : > { %v1705_v32 = vadd.f32 %v5114_v23, %v1528_v26  ;;  %v1703_v58 = vadd.f32 %v1620_v22, %v1526_v52 }
 0x17c   : > { %v1622_v29 = vpop.f32.mrf.mxu1  ;;  %v1691_v30 = vpop.f32.mrf.mxu0 }
 0x17d   : > { %v1702_v60 = vadd.f32 %v1691_v30, %v1525_v51  ;;  %v1704_v59 = vadd.f32 %v1622_v29, %v1527_v57  ;;  %v3936_v29 = vld [vmem:[%s7105_s6] sm:$0xff]  ;;  %v3937_v30 = vld [vmem:[%s7105_s6 + $0x8] sm:$0xff] }
 0x17e   : > { %v1791_v44 = vpop.f32.mrf.mxu0  ;;  %v5119_v48 = vpop.f32.mrf.mxu1  ;;  %v4965_v57 = vld [vmem:[%s7105_s6 + $0x60] sm:$0xff] }
 0x17f   : > { %v1877_v42 = vadd.f32 %v1791_v44, %v1700_v31  ;;  %v1882_v43 = vadd.f32 %v5119_v48, %v1705_v32  ;;  %v3938_v31 = vld [vmem:[%s7105_s6 + $0x10] sm:$0xff]  ;;  %v3939_v32 = vld [vmem:[%s7105_s6 + $0x18] sm:$0xff]  ;;  %v4962_v48 = vld [vmem:[%s7105_s6 + $0x48] sm:$0xff] }
 0x180   : > { %v1793_v54 = vpop.f32.mrf.mxu0  ;;  %v1868_v47 = vpop.f32.mrf.mxu1 }
 0x181   : > { %v1895_v45 = vadd.f32 %v1888_v36, %v1877_v42  ;;  %v1900_v56 = vadd.f32 %v1893_v35, %v1882_v43  ;;  %v1878_v61 = vadd.f32 %v1793_v54, %v1701_v53  ;;  %v1879_v0 = vadd.f32 %v1868_v47, %v1702_v60  ;;  %v4964_v54 = vld [vmem:[%s7105_s6 + $0x58] sm:$0xff]  ;;  %v4854_v60 = vld [vmem:[%s7103_s4 + $0x28] sm:$0xff] }
 0x182   : > { %v1797_v62 = vpop.f32.mrf.mxu0 }
 0x183   : > { %v1901_v63 = vmax.f32 %v1895_v45, 0.0  ;;  %v1906_v49 = vmax.f32 %v1900_v56, 0.0  ;;  %v1880_v1 = vadd.f32 %v1797_v62, %v1703_v58  ;;  %v1896_v6 = vadd.f32 %v1888_v36, %v1878_v61  ;;  %v4966_v61 = vld [vmem:[%s7105_s6 + $0x68] sm:$0xff]  ;;  %v4855_v62 = vld [vmem:[%s7103_s4 + $0x30] sm:$0xff] }
 0x184   : > { %v1799_v3 = vpop.f32.mrf.mxu0  ;;  %v1897_v13 = vadd.f32 %v1888_v36, %v1879_v0  ;;  %v4957_v36 = vld [vmem:[%s7105_s6 + $0x20] sm:$0xff]  ;;  %v4856_v0 = vld [vmem:[%s7103_s4 + $0x38] sm:$0xff] }
 0x185   : > { %v5577_v4 = vmul.f32 %v5572_v55, %v1901_v63  ;;  %v5580_v5 = vmul.f32 %v5574_v50, %v1906_v49  ;;  %v1898_v8 = vadd.f32 %v1893_v35, %v1880_v1  ;;  %v1881_v11 = vadd.f32 %v1799_v3, %v1704_v59  ;;  %v4967_v49 = vld [vmem:[%s7105_s6 + $0x70] sm:$0xff]  ;;  %v4968_v1 = vld [vmem:[%s7105_s6 + $0x78] sm:$0xff] }
 0x186   : > { %v1902_v17 = vmax.f32 %v1896_v6, 0.0  ;;  %v1903_v22 = vmax.f32 %v1897_v13, 0.0 }
 0x187   : > { %1956 = vrot.lane.b32.xlu0 %v5577_v4, %s5254_s14  ;;  %1966 = vrot.lane.b32.xlu1 %v5580_v5, %s5254_s14  ;;  %v1904_v14 = vmax.f32 %v1898_v8, 0.0  ;;  %v1899_v15 = vadd.f32 %v1893_v35, %v1881_v11  ;;  %v4969_v11 = vld [vmem:[%s7105_s6 + $0x80] sm:$0xff] }
 0x188   : > { %v5605_v24 = vmul.f32 %v5594_v20, %v1902_v17  ;;  %v5610_v26 = vmul.f32 %v5574_v50, %v1903_v22 }
 0x189   : > { %v5597_v19 = vmul.f32 %v5572_v55, %v1904_v14  ;;  %v1905_v18 = vmax.f32 %v1899_v15, 0.0  ;;  %v4970_v14 = vld [vmem:[%s7105_s6 + $0x88] sm:$0xff] }
 0x18b   : > { %v5600_v23 = vmul.f32 %v5594_v20, %v1905_v18  ;;  %1958 = vrot.lane.b32.xlu1 %v5597_v19, %s5254_s14 }
 0x18d   : > { %1962 = vrot.lane.b32.xlu0 %v5600_v23, %s5254_s14 }
 0x18f   : > { %1960 = vrot.lane.b32.xlu1 %v5605_v24, %s5254_s14 }
 0x191   : > { %1964 = vrot.lane.b32.xlu0 %v5610_v26, %s5254_s14 }
 0x193   : > { %1935 = vrot.lane.b32.xlu1 %v5597_v19, %s5255_s15 }
 0x195   : > { %1933 = vrot.lane.b32.xlu0 %v5577_v4, %s5255_s15 }
 0x197   : > { %1943 = vrot.lane.b32.xlu1 %v5580_v5, %s5255_s15 }
 0x199   : > { %1939 = vrot.lane.b32.xlu0 %v5600_v23, %s5255_s15 }
 0x19b   : > { %1937 = vrot.lane.b32.xlu1 %v5605_v24, %s5255_s15 }
 0x19d   : > { %1941 = vrot.lane.b32.xlu0 %v5610_v26, %s5255_s15 }
 0x19f   : > { %2354 = vrot.lane.b32.xlu1 %v5597_v19, %s5256_s16 }
 0x1a1   : > { %2352 = vrot.lane.b32.xlu0 %v5577_v4, %s5256_s16 }
 0x1a3   : > { %2362 = vrot.lane.b32.xlu1 %v5580_v5, %s5256_s16 }
 0x1a5   : > { %2358 = vrot.lane.b32.xlu0 %v5600_v23, %s5256_s16 }
 0x1a7   : > { %2356 = vrot.lane.b32.xlu1 %v5605_v24, %s5256_s16 }
 0x1a9   : > { %2360 = vrot.lane.b32.xlu0 %v5610_v26, %s5256_s16 }
 0x1ab   : > { %2575 = vrot.lane.b32.xlu1 %v5597_v19, %s5257_s17 }
 0x1ad   : > { %2573 = vrot.lane.b32.xlu0 %v5577_v4, %s5257_s17 }
 0x1af   : > { %2583 = vrot.lane.b32.xlu1 %v5580_v5, %s5257_s17 }
 0x1b1   : > { %2579 = vrot.lane.b32.xlu0 %v5600_v23, %s5257_s17 }
 0x1b3   : > { %2577 = vrot.lane.b32.xlu1 %v5605_v24, %s5257_s17 }
 0x1b5   : > { %2581 = vrot.lane.b32.xlu0 %v5610_v26, %s5257_s17 }
 0x1b7   : > { %2999 = vrot.lane.b32.xlu1 %v5597_v19, %s5258_s18 }
 0x1b9   : > { %3007 = vrot.lane.b32.xlu0 %v5580_v5, %s5258_s18 }
 0x1bb   : > { %3005 = vrot.lane.b32.xlu1 %v5610_v26, %s5258_s18 }
 0x1bd   : > { %3001 = vrot.lane.b32.xlu0 %v5605_v24, %s5258_s18 }
 0x1bf   : > { %3003 = vrot.lane.b32.xlu1 %v5600_v23, %s5258_s18 }
 0x1c1   : > { %2997 = vrot.lane.b32.xlu0 %v5577_v4, %s5258_s18 }
 0x1c3   : > { %3220 = vrot.lane.b32.xlu1 %v5597_v19, %s5259_s19 }
 0x1c5   : > { %3228 = vrot.lane.b32.xlu0 %v5580_v5, %s5259_s19 }
 0x1c7   : > { %3224 = vrot.lane.b32.xlu1 %v5600_v23, %s5259_s19 }
 0x1c9   : > { %3222 = vrot.lane.b32.xlu0 %v5605_v24, %s5259_s19 }
 0x1cb   : > { %3226 = vrot.lane.b32.xlu1 %v5610_v26, %s5259_s19 }
 0x1cd   : > { %3218 = vrot.lane.b32.xlu0 %v5577_v4, %s5259_s19 }
 0x1cf   : > { %3441 = vrot.lane.b32.xlu1 %v5597_v19, %s5260_s20 }
 0x1d1   : > { %3449 = vrot.lane.b32.xlu0 %v5580_v5, %s5260_s20 }
 0x1d3   : > { %3447 = vrot.lane.b32.xlu1 %v5610_v26, %s5260_s20 }
 0x1d5   : > { %3443 = vrot.lane.b32.xlu0 %v5605_v24, %s5260_s20 }
 0x1d7   : > { %3445 = vrot.lane.b32.xlu1 %v5600_v23, %s5260_s20 }
 0x1d9   : > { %3439 = vrot.lane.b32.xlu0 %v5577_v4, %s5260_s20 }
 0x1db   : > { %3662 = vrot.lane.b32.xlu1 %v5597_v19, %s5261_s21 }
 0x1dd   : > { %3670 = vrot.lane.b32.xlu0 %v5580_v5, %s5261_s21 }
 0x1df   : > { %3666 = vrot.lane.b32.xlu1 %v5600_v23, %s5261_s21 }
 0x1e1   : > { %3664 = vrot.lane.b32.xlu0 %v5605_v24, %s5261_s21 }
 0x1e3   : > { %3668 = vrot.lane.b32.xlu1 %v5610_v26, %s5261_s21 }
 0x1e5   : > { %3660 = vrot.lane.b32.xlu0 %v5577_v4, %s5261_s21 }
 0x1e7   : > { %3882 = vperm.xlu1 %5232, %v3876_v27   ;;  %v1929_v27 = vld [vmem:[%s7103_s4] sm:$0xff] }
 0x1e9   : > { %3887 = vperm.xlu0 %5231, %v3877_v21   ;;  %v4971_v21 = vld [vmem:[%s7105_s6 + $0x90] sm:$0xff] }
 0x1eb   : > { %3892 = vperm.xlu1 %5232, %v3878_v25   ;;  %v4972_v25 = vld [vmem:[%s7105_s6 + $0x98] sm:$0xff] }
 0x1ed   : > { %3897 = vperm.xlu0 %5231, %v3879_v28  }
 0x1ef   : > { %3978 = vperm.xlu1 %5232, %v3936_v29   ;;  %v1930_v29 = vld [vmem:[%s7103_s4 + $0x8] sm:$0xff] }
 0x1f1   : > { %3983 = vperm.xlu0 %5231, %v3937_v30  }
 0x1f3   : > { %3988 = vperm.xlu1 %5232, %v3938_v31   ;;  %v1931_v31 = vld [vmem:[%s7103_s4 + $0x10] sm:$0xff] }
 0x1f5   : > { %3993 = vperm.xlu0 %5231, %v3939_v32   ;;  %v4973_v32 = vld [vmem:[%s7105_s6 + $0xa0] sm:$0xff] }
 0x1f7   : > { %4051 = vperm.xlu1 %5232, %v4957_v36   ;;  %v4974_v36 = vld [vmem:[%s7105_s6 + $0xa8] sm:$0xff] }
 0x1f9   : > { %v1967_v35 = vpop.permute.xlu1 %1966  ;;  %4056 = vperm.xlu0 %5231, %v4958_v33   ;;  %v1957_v40 = vpop.permute.xlu0 %1956 }
 0x1fb   : > { %4061 = vperm.xlu1 %5232, %v4959_v38  }
 0x1fd   : > { %4066 = vperm.xlu0 %5231, %v4960_v39   ;;  %v1959_v44 = vpop.permute.xlu1 %1958  ;;  %v1932_v39 = vld [vmem:[%s7103_s4 + $0x18] sm:$0xff] }
 0x1fe   : > { %v1973_v52 = vsel %vm333_vm1, %v1967_v35, %v1959_v44 }
 0x1ff   : > { %4136 = vperm.xlu1 %5232, %v4961_v41   ;;  %v1963_v37 = vpop.permute.xlu0 %1962  ;;  %v4975_v41 = vld [vmem:[%s7105_s6 + $0xb0] sm:$0xff] }
 0x200   : > { %v1971_v42 = vsel %vm333_vm1, %v1959_v44, %v1963_v37  ;;  %v1969_v43 = vsel %vm333_vm1, %v1963_v37, %v1967_v35 }
 0x201   : > { %4141 = vperm.xlu0 %5231, %v4962_v48   ;;  %v1961_v51 = vpop.permute.xlu1 %1960  ;;  %2015 = vmatprep.subr.mxu1 %v1971_v42  ;;  %v4977_v42 = vld [vmem:[%s7105_s6 + $0xc0] sm:$0xff] }
 0x202   : > { %5120 = vmatprep.subr.mxu0 %v1969_v43  ;;  %2016 = vmatpush1.msra.mxu1 %v1973_v52  ;;  %v1970_v53 = vsel %vm333_vm1, %v1957_v40, %v1961_v51  ;;  %v4873_v52 = vld [vmem:[%s7103_s4 + $0x40] sm:$0xff] }
 0x203   : > { %5121 = vmatpush3.msra.mxu0 %v1969_v43  ;;  %4146 = vperm.xlu1 %5232, %v4963_v46   ;;  %v1965_v45 = vpop.permute.xlu0 %1964 }
 0x204   : > { %2017 = vmatprep.subr.mxu1 %v1970_v53  ;;  %v1972_v47 = vsel %vm333_vm1, %v1965_v45, %v1957_v40  ;;  %v1968_v56 = vsel %vm333_vm1, %v1961_v51, %v1965_v45  ;;  %v4978_v53 = vld [vmem:[%s7105_s6 + $0xc8] sm:$0xff]  ;;  %v4976_v45 = vld [vmem:[%s7105_s6 + $0xb8] sm:$0xff] }
 0x205   : > { %4151 = vperm.xlu0 %5231, %v4964_v54   ;;  %v1936_v58 = vpop.permute.xlu1 %1935  ;;  %2018 = vmatpush1.msra.mxu1 %v1972_v47 }
 0x206   : > { %5122 = vmatprep.subr.mxu0 %v1968_v56  ;;  %4857 = vmatmul.mubr.msk.f32.vlgmr.msra.gmra.mxu1 %vm1974_vm9, %v5590_v12 }
 0x207   : > { %5123 = vmatpush3.msra.mxu0 %v1968_v56  ;;  %4221 = vperm.xlu1 %5232, %v4965_v57   ;;  %v1934_v63 = vpop.permute.xlu0 %1933  ;;  %v4874_v56 = vld [vmem:[%s7103_s4 + $0x48] sm:$0xff]  ;;  %v4979_v57 = vld [vmem:[%s7105_s6 + $0xd0] sm:$0xff] }
 0x208   : > { %2057 = vmatprep.mubr.f32.mxu1 %v5253_v2  ;;  %5125 = vmatmul.mubr.msk.f32.vlgmr.msra.gmra.mxu0 %vm1974_vm9, %v4854_v60 }
 0x209   : > { %4226 = vperm.xlu0 %5231, %v4966_v61   ;;  %v1944_v59 = vpop.permute.xlu1 %1943  ;;  %5127 = vmatprep.mubr.msk.f32.mxu0 %vm1974_vm9, %v4855_v62  ;;  %v4875_v61 = vld [vmem:[%s7103_s4 + $0x50] sm:$0xff] }
 0x20a   : > { %4858 = vmatmul.mubr.msk.f32.gmra.mxu1 %vm1974_vm9, %v4854_v60  ;;  %v1950_v12 = vsel %vm320_vm2, %v1944_v59, %v1936_v58  ;;  %v4981_v60 = vld [vmem:[%s7105_s6 + $0xe0] sm:$0xff] }
 0x20b   : > { %4231 = vperm.xlu1 %5232, %v4967_v49   ;;  %v1940_v3 = vpop.permute.xlu0 %1939  ;;  %2063 = vmatprep.mubr.f32.mxu1 %v5253_v2 }
 0x20c   : > { %v1948_v6 = vsel %vm320_vm2, %v1936_v58, %v1940_v3  ;;  %v1946_v7 = vsel %vm320_vm2, %v1940_v3, %v1944_v59  ;;  %5128 = vmatmul.mubr.msk.f32.gmra.mxu0 %vm1974_vm9, %v4856_v0  ;;  %v4876_v59 = vld [vmem:[%s7103_s4 + $0x58] sm:$0xff] }
 0x20d   : > { %4236 = vperm.xlu0 %5231, %v4968_v1   ;;  %v1938_v8 = vpop.permute.xlu1 %1937  ;;  %2201 = vmatprep.subr.mxu0 %v1948_v6  ;;  %v4982_v1 = vld [vmem:[%s7105_s6 + $0xe8] sm:$0xff] }
 0x20e   : > { %5130 = vmatprep.subr.mxu1 %v1946_v7  ;;  %4859 = vmatmul.mubr.msk.f32.gmra.mxu1 %vm1974_vm9, %v4855_v62  ;;  %v1947_v13 = vsel %vm320_vm2, %v1934_v63, %v1938_v8 }
 0x20f   : > { %2202 = vmatpush1.msra.mxu0 %v1950_v12  ;;  %5131 = vmatpush3.msra.mxu1 %v1946_v7  ;;  %v1942_v15 = vpop.permute.xlu0 %1941  ;;  %v4980_v7 = vld [vmem:[%s7105_s6 + $0xd8] sm:$0xff] }
 0x210   : > { %4270 = vperm.xlu1 %5232, %v4969_v11   ;;  %2203 = vmatprep.subr.mxu0 %v1947_v13  ;;  %v1949_v17 = vsel %vm320_vm2, %v1942_v15, %v1934_v63  ;;  %v1945_v18 = vsel %vm320_vm2, %v1938_v8, %v1942_v15  ;;  %v4983_v15 = vld [vmem:[%s7105_s6 + $0xf0] sm:$0xff] }
 0x211   : > { %4275 = vperm.xlu0 %5231, %v4970_v14   ;;  %v2355_v22 = vpop.permute.xlu1 %2354  ;;  %2069 = vmatprep.mubr.f32.mxu1 %v5253_v2  ;;  %v4885_v14 = vld [vmem:[%s7103_s4 + $0x60] sm:$0xff] }
 0x212   : > { %2204 = vmatpush1.msra.mxu0 %v1949_v17  ;;  %2237 = vmatprep.mubr.f32.mxu0 %v5253_v2 }
 0x213   : > { %5132 = vmatprep.subr.mxu1 %v1945_v18  ;;  %4860 = vmatmul.mubr.msk.f32.gmra.mxu1 %vm1974_vm9, %v4856_v0  ;;  %v2353_v28 = vpop.permute.xlu0 %2352 }
 0x214   : > { %4865 = vmatmul.mubr.msk.f32.vlgmr.msra.gmra.mxu0 %vm1974_vm9, %v1929_v27  ;;  %5133 = vmatpush3.msra.mxu1 %v1945_v18  ;;  %v4985_v18 = vld [vmem:[%s7105_s6 + $0x100] sm:$0xff] }
 0x215   : > { %4280 = vperm.xlu1 %5232, %v4971_v21   ;;  %4285 = vperm.xlu0 %5231, %v4972_v25   ;;  %v2363_v30 = vpop.permute.xlu1 %2362  ;;  %v4986_v25 = vld [vmem:[%s7105_s6 + $0x108] sm:$0xff] }
 0x216   : > { %2243 = vmatprep.mubr.f32.mxu0 %v5253_v2  ;;  %5134 = vmatprep.mubr.msk.f32.mxu1 %vm1974_vm9, %v1929_v27  ;;  %v2369_v44 = vsel %vm663_vm3, %v2363_v30, %v2355_v22  ;;  %v4886_v27 = vld [vmem:[%s7103_s4 + $0x68] sm:$0xff] }
 0x217   : > { %5135 = vmatmul.mubr.msk.f32.vlgmr.msra.gmra.mxu1 %vm1974_vm9, %v1930_v29  ;;  %v2359_v33 = vpop.permute.xlu0 %2358 }
 0x218   : > { %4866 = vmatmul.mubr.msk.f32.gmra.mxu0 %vm1974_vm9, %v1930_v29  ;;  %5137 = vmatprep.mubr.msk.f32.mxu1 %vm1974_vm9, %v1931_v31  ;;  %v2367_v35 = vsel %vm663_vm3, %v2355_v22, %v2359_v33  ;;  %v2365_v38 = vsel %vm663_vm3, %v2359_v33, %v2363_v30 }
 0x219   : > { %4355 = vperm.xlu1 %5232, %v4973_v32   ;;  %4360 = vperm.xlu0 %5231, %v4974_v36   ;;  %v2357_v40 = vpop.permute.xlu1 %2356  ;;  %v4897_v32 = vld [vmem:[%s7103_s4 + $0x80] sm:$0xff]  ;;  %v4988_v36 = vld [vmem:[%s7105_s6 + $0x118] sm:$0xff] }
 0x21a   : > { %2249 = vmatprep.mubr.f32.mxu0 %v5253_v2  ;;  %2410 = vmatprep.subr.mxu1 %v2367_v35  ;;  %v2366_v48 = vsel %vm663_vm3, %v2353_v28, %v2357_v40 }
 0x21b   : > { %5140 = vmatprep.subr.mxu0 %v2365_v38  ;;  %5138 = vmatmul.mubr.msk.f32.gmra.mxu1 %vm1974_vm9, %v1932_v39  ;;  %v2361_v37 = vpop.permute.xlu0 %2360 }
 0x21c   : > { %4867 = vmatmul.mubr.msk.f32.gmra.mxu0 %vm1974_vm9, %v1931_v31  ;;  %2411 = vmatpush1.msra.mxu1 %v2369_v44  ;;  %v2368_v43 = vsel %vm663_vm3, %v2361_v37, %v2353_v28  ;;  %v2364_v51 = vsel %vm663_vm3, %v2357_v40, %v2361_v37 }
 0x21d   : > { %5141 = vmatpush3.msra.mxu0 %v2365_v38  ;;  %4365 = vperm.xlu1 %5232, %v4975_v41   ;;  %v2576_v46 = vpop.permute.xlu1 %2575  ;;  %v4898_v38 = vld [vmem:[%s7103_s4 + $0x88] sm:$0xff] }
 0x21e   : > { %2412 = vmatprep.subr.mxu1 %v2366_v48  ;;  %4440 = vperm.xlu0 %5231, %v4977_v42   ;;  %v4899_v42 = vld [vmem:[%s7103_s4 + $0x90] sm:$0xff] }
 0x21f   : > { %2255 = vmatprep.mubr.f32.mxu0 %v5253_v2  ;;  %2413 = vmatpush1.msra.mxu1 %v2368_v43  ;;  %v2574_v54 = vpop.permute.xlu0 %2573 }
 0x220   : > { %2446 = vmatprep.mubr.f32.mxu1 %v5253_v2  ;;  %5142 = vmatprep.subr.mxu0 %v2364_v51 }
 0x221   : > { %4868 = vmatmul.mubr.msk.f32.gmra.mxu0 %vm1974_vm9, %v1932_v39  ;;  %4877 = vmatmul.mubr.msk.f32.vlgmr.msra.gmra.mxu1 %vm1974_vm9, %v4873_v52  ;;  %v2584_v47 = vpop.permute.xlu1 %2583 }
 0x222   : > { %5143 = vmatpush3.msra.mxu0 %v2364_v51  ;;  %4445 = vperm.xlu1 %5232, %v4978_v53   ;;  %v2590_v6 = vsel %vm840_vm4, %v2584_v47, %v2576_v46 }
 0x223   : > { %4370 = vperm.xlu0 %5231, %v4976_v45   ;;  %2452 = vmatprep.mubr.f32.mxu1 %v5253_v2  ;;  %v2580_v58 = vpop.permute.xlu0 %2579 }
 0x224   : > { %5144 = vmatprep.mubr.msk.f32.mxu0 %vm1974_vm9, %v4873_v52  ;;  %v2588_v63 = vsel %vm840_vm4, %v2576_v46, %v2580_v58  ;;  %v2586_v49 = vsel %vm840_vm4, %v2580_v58, %v2584_v47  ;;  %v4900_v46 = vld [vmem:[%s7103_s4 + $0x98] sm:$0xff]  ;;  %v4911_v58 = vld [vmem:[%s7103_s4 + $0xb0] sm:$0xff] }
 0x225   : > { %4878 = vmatmul.mubr.msk.f32.gmra.mxu1 %vm1974_vm9, %v4874_v56  ;;  %5145 = vmatmul.mubr.msk.f32.vlgmr.msra.gmra.mxu0 %vm1974_vm9, %v4874_v56  ;;  %v2578_v62 = vpop.permute.xlu1 %2577 }
 0x226   : > { %4450 = vperm.xlu1 %5232, %v4979_v57   ;;  %2458 = vmatprep.mubr.f32.mxu1 %v5253_v2  ;;  %v2587_v3 = vsel %vm840_vm4, %v2574_v54, %v2578_v62  ;;  %v4910_v57 = vld [vmem:[%s7103_s4 + $0xa8] sm:$0xff] }
 0x227   : > { %4525 = vperm.xlu0 %5231, %v4981_v60   ;;  %5147 = vmatprep.mubr.msk.f32.mxu0 %vm1974_vm9, %v4875_v61  ;;  %v2582_v0 = vpop.permute.xlu0 %2581 }
 0x228   : > { %2631 = vmatprep.subr.mxu0 %v2588_v63  ;;  %5150 = vmatprep.subr.mxu1 %v2586_v49  ;;  %v2589_v11 = vsel %vm840_vm4, %v2582_v0, %v2574_v54  ;;  %v2585_v12 = vsel %vm840_vm4, %v2578_v62, %v2582_v0  ;;  %v4909_v54 = vld [vmem:[%s7103_s4 + $0xa0] sm:$0xff] }
 0x229   : > { %4879 = vmatmul.mubr.msk.f32.gmra.mxu1 %vm1974_vm9, %v4875_v61  ;;  %5148 = vmatmul.mubr.msk.f32.gmra.mxu0 %vm1974_vm9, %v4876_v59  ;;  %v5912_v8 = vpop.permute.xlu1 %2999 }
 0x22a   : > { %2632 = vmatpush1.msra.mxu0 %v2590_v6  ;;  %5151 = vmatpush3.msra.mxu1 %v2586_v49 }
 0x22b   : > { %4530 = vperm.xlu1 %5232, %v4982_v1   ;;  %2633 = vmatprep.subr.mxu0 %v2587_v3  ;;  %v3008_v13 = vpop.permute.xlu0 %3007  ;;  %v4921_v3 = vld [vmem:[%s7103_s4 + $0xc0] sm:$0xff] }
 0x22c   : > { %4455 = vperm.xlu0 %5231, %v4980_v7   ;;  %2464 = vmatprep.mubr.f32.mxu1 %v5253_v2 }
 0x22d   : > { %2634 = vmatpush1.msra.mxu0 %v2589_v11  ;;  %2667 = vmatprep.mubr.f32.mxu0 %v5253_v2  ;;  %v5926_v17 = vpop.permute.xlu1 %3005 }
 0x22e   : > { %5152 = vmatprep.subr.mxu1 %v2585_v12  ;;  %4880 = vmatmul.mubr.msk.f32.gmra.mxu1 %vm1974_vm9, %v4876_v59  ;;  %v4912_v59 = vld [vmem:[%s7103_s4 + $0xb8] sm:$0xff] }
 0x22f   : > { %4889 = vmatmul.mubr.msk.f32.vlgmr.msra.gmra.mxu0 %vm1974_vm9, %v4885_v14  ;;  %5153 = vmatpush3.msra.mxu1 %v2585_v12  ;;  %v5933_v22 = vpop.permute.xlu0 %3001 }
 0x230   : > { %5160 = vmatprep.subr.mxu0 %v5580_v5  ;;  %4535 = vperm.xlu1 %5232, %v4983_v15   ;;  %v3009_v37 = vsel %vm1184_vm5, %v5933_v22, %v5926_v17 }
 0x231   : > { %2834 = vmatprep.subr.mxu1 %v5600_v23  ;;  %5161 = vmatpush3.msra.mxu0 %v5580_v5  ;;  %v3004_v21 = vpop.permute.xlu1 %3003  ;;  %v4987_v5 = vld [vmem:[%s7105_s6 + $0x110] sm:$0xff] }
 0x232   : > { %5162 = vmatprep.subr.mxu0 %v5610_v26  ;;  %4610 = vperm.xlu0 %5231, %v4985_v18   ;;  %v4887_v23 = vld [vmem:[%s7103_s4 + $0x70] sm:$0xff]  ;;  %v3012_v44 = vsel %vm1184_vm5, %v5912_v8, %v3004_v21 }
 0x233   : > { %2673 = vmatprep.mubr.f32.mxu0 %v5253_v2  ;;  %5154 = vmatprep.mubr.msk.f32.mxu1 %vm1974_vm9, %v4885_v14  ;;  %v2998_v28 = vpop.permute.xlu0 %2997 }
 0x234   : > { %5163 = vmatpush3.msra.mxu0 %v5610_v26  ;;  %5155 = vmatmul.mubr.msk.f32.vlgmr.msra.gmra.mxu1 %vm1974_vm9, %v4886_v27  ;;  %v4888_v26 = vld [vmem:[%s7103_s4 + $0x78] sm:$0xff]  ;;  %v3013_v39 = vsel %vm1184_vm5, %v5926_v17, %v2998_v28  ;;  %v3011_v43 = vsel %vm1184_vm5, %v2998_v28, %v5933_v22  ;;  %v4923_v17 = vld [vmem:[%s7103_s4 + $0xd0] sm:$0xff] }
 0x235   : > { %4890 = vmatmul.mubr.msk.f32.gmra.mxu0 %vm1974_vm9, %v4886_v27  ;;  %2835 = vmatpush1.msra.mxu1 %v5597_v19  ;;  %v5957_v29 = vpop.permute.xlu1 %3220  ;;  %v4984_v19 = vld [vmem:[%s7105_s6 + $0xf8] sm:$0xff] }
 0x236   : > { %4615 = vperm.xlu1 %5232, %v4986_v25   ;;  %2836 = vmatprep.subr.mxu1 %v5605_v24  ;;  %v3014_v24 = vsel %vm1184_vm5, %v3008_v13, %v5912_v8  ;;  %v4922_v8 = vld [vmem:[%s7103_s4 + $0xc8] sm:$0xff]  ;;  %v4924_v22 = vld [vmem:[%s7103_s4 + $0xd8] sm:$0xff] }
 0x237   : > { %2837 = vmatpush1.msra.mxu1 %v5577_v4  ;;  %4620 = vperm.xlu0 %5231, %v4987_v5   ;;  %v3229_v30 = vpop.permute.xlu0 %3228  ;;  %v3010_v4 = vsel %vm1184_vm5, %v3004_v21, %v3008_v13  ;;  %v4933_v21 = vld [vmem:[%s7103_s4 + $0xe0] sm:$0xff] }
 0x238   : > { %2679 = vmatprep.mubr.f32.mxu0 %v5253_v2  ;;  %5157 = vmatprep.mubr.msk.f32.mxu1 %vm1974_vm9, %v4887_v23  ;;  %v3235_v52 = vsel %vm1361_vm6, %v3229_v30, %v5957_v29 }
 0x239   : > { %5170 = vmatprep.subr.mxu1 %v3014_v24  ;;  %4891 = vmatmul.mubr.msk.f32.gmra.mxu0 %vm1974_vm9, %v4887_v23  ;;  %v3225_v31 = vpop.permute.xlu1 %3224  ;;  %v4934_v23 = vld [vmem:[%s7103_s4 + $0xe8] sm:$0xff] }
 0x23a   : > { %5158 = vmatmul.mubr.msk.f32.gmra.mxu1 %vm1974_vm9, %v4888_v26  ;;  %4540 = vperm.xlu1 %5232, %v4984_v19   ;;  %v3231_v41 = vsel %vm1361_vm6, %v3225_v31, %v3229_v30  ;;  %v3233_v60 = vsel %vm1361_vm6, %v5957_v29, %v3225_v31  ;;  %v4935_v29 = vld [vmem:[%s7103_s4 + $0xf0] sm:$0xff]  ;;  %v4936_v30 = vld [vmem:[%s7103_s4 + $0xf8] sm:$0xff]  ;;  %v4946_v31 = vld [vmem:[%s7103_s4 + $0x108] sm:$0xff] }
 0x23b   : > { %3055 = vmatprep.subr.mxu0 %v3010_v4  ;;  %2685 = vmatprep.mubr.f32.mxu0 %v5253_v2  ;;  %v3223_v33 = vpop.permute.xlu0 %3222  ;;  %v4945_v4 = vld [vmem:[%s7103_s4 + $0x100] sm:$0xff] }
 0x23c   : > { %2870 = vmatprep.mubr.f32.mxu1 %v5253_v2 }
 0x23d   : > { %4892 = vmatmul.mubr.msk.f32.gmra.mxu0 %vm1974_vm9, %v4888_v26  ;;  %v3227_v35 = vpop.permute.xlu1 %3226 }
 0x23e   : > { %4901 = vmatmul.mubr.msk.f32.vlgmr.msra.gmra.mxu1 %vm1974_vm9, %v4897_v32  ;;  %4625 = vperm.xlu1 %5232, %v4988_v36   ;;  %v3230_v62 = vsel %vm1361_vm6, %v3223_v33, %v3227_v35  ;;  %v4948_v36 = vld [vmem:[%s7103_s4 + $0x118] sm:$0xff] }
 0x23f   : > { %5171 = vmatpush3.msra.mxu1 %v3014_v24  ;;  %2876 = vmatprep.mubr.f32.mxu1 %v5253_v2  ;;  %v3219_v40 = vpop.permute.xlu0 %3218 }
 0x240   : > { %5172 = vmatprep.subr.mxu1 %v3013_v39  ;;  %5164 = vmatprep.mubr.msk.f32.mxu0 %vm1974_vm9, %v4897_v32  ;;  %v3234_v56 = vsel %vm1361_vm6, %v3227_v35, %v3219_v40  ;;  %v3232_v49 = vsel %vm1361_vm6, %v3219_v40, %v3223_v33  ;;  %v4947_v32 = vld [vmem:[%s7103_s4 + $0x110] sm:$0xff] }
 0x241   : > { %5173 = vmatpush3.msra.mxu1 %v3013_v39  ;;  %5165 = vmatmul.mubr.msk.f32.vlgmr.msra.gmra.mxu0 %vm1974_vm9, %v4898_v38  ;;  %v6000_v48 = vpop.permute.xlu1 %3441 }
 0x242   : > { %4902 = vmatmul.mubr.msk.f32.gmra.mxu1 %vm1974_vm9, %v4898_v38  ;;  %3056 = vmatpush1.msra.mxu0 %v3012_v44 }
 0x243   : > { %3057 = vmatprep.subr.mxu0 %v3009_v37  ;;  %3276 = vmatprep.subr.mxu1 %v3231_v41  ;;  %v3450_v51 = vpop.permute.xlu0 %3449 }
 0x244   : > { %3058 = vmatpush1.msra.mxu0 %v3011_v43  ;;  %2882 = vmatprep.mubr.f32.mxu1 %v5253_v2  ;;  %v3456_v1 = vsel %vm1538_vm7, %v3450_v51, %v6000_v48 }
 0x245   : > { %5167 = vmatprep.mubr.msk.f32.mxu0 %vm1974_vm9, %v4899_v42  ;;  %5180 = vmatprep.subr.mxu0 %v3235_v52  ;;  %v3448_v53 = vpop.permute.xlu1 %3447 }
 0x246   : > { %4903 = vmatmul.mubr.msk.f32.gmra.mxu1 %vm1974_vm9, %v4899_v42  ;;  %5168 = vmatmul.mubr.msk.f32.gmra.mxu0 %vm1974_vm9, %v4900_v46 }
 0x247   : > { %2888 = vmatprep.mubr.f32.mxu1 %v5253_v2  ;;  %3091 = vmatprep.mubr.f32.mxu0 %v5253_v2  ;;  %v3444_v45 = vpop.permute.xlu0 %3443 }
 0x248   : > { %v3451_v14 = vsel %vm1538_vm7, %v3444_v45, %v3448_v53 }
 0x249   : > { %v3446_v47 = vpop.permute.xlu1 %3445 }
 0x24a   : > { %4904 = vmatmul.mubr.msk.f32.gmra.mxu1 %vm1974_vm9, %v4900_v46  ;;  %4913 = vmatmul.mubr.msk.f32.vlgmr.msra.gmra.mxu0 %vm1974_vm9, %v4909_v54  ;;  %v3452_v61 = vsel %vm1538_vm7, %v3446_v47, %v3450_v51  ;;  %v3454_v13 = vsel %vm1538_vm7, %v6000_v48, %v3446_v47 }
 0x24b   : > { %5181 = vmatpush3.msra.mxu0 %v3235_v52  ;;  %3097 = vmatprep.mubr.f32.mxu0 %v5253_v2  ;;  %v3440_v63 = vpop.permute.xlu0 %3439 }
 0x24c   : > { %5182 = vmatprep.subr.mxu0 %v3234_v56  ;;  %5174 = vmatprep.mubr.msk.f32.mxu1 %vm1974_vm9, %v4909_v54  ;;  %v3455_v11 = vsel %vm1538_vm7, %v3448_v53, %v3440_v63  ;;  %v3453_v18 = vsel %vm1538_vm7, %v3440_v63, %v3444_v45 }
 0x24d   : > { %5183 = vmatpush3.msra.mxu0 %v3234_v56  ;;  %v3663_v0 = vpop.permute.xlu1 %3662 }
 0x24e   : > { %4914 = vmatmul.mubr.msk.f32.gmra.mxu0 %vm1974_vm9, %v4910_v57  ;;  %5175 = vmatmul.mubr.msk.f32.vlgmr.msra.gmra.mxu1 %vm1974_vm9, %v4910_v57 }
 0x24f   : > { %3277 = vmatpush1.msra.mxu1 %v3233_v60  ;;  %3103 = vmatprep.mubr.f32.mxu0 %v5253_v2  ;;  %v3671_v6 = vpop.permute.xlu0 %3670 }
 0x250   : > { %3278 = vmatprep.subr.mxu1 %v3230_v62  ;;  %5177 = vmatprep.mubr.msk.f32.mxu1 %vm1974_vm9, %v4911_v58  ;;  %v3677_v27 = vsel %vm1715_vm8, %v3671_v6, %v3663_v0 }
 0x251   : > { %3279 = vmatpush1.msra.mxu1 %v3232_v49  ;;  %3497 = vmatprep.subr.mxu0 %v3452_v61  ;;  %v3667_v7 = vpop.permute.xlu1 %3666 }
 0x252   : > { %5190 = vmatprep.subr.mxu1 %v3456_v1  ;;  %4915 = vmatmul.mubr.msk.f32.gmra.mxu0 %vm1974_vm9, %v4911_v58  ;;  %v3673_v12 = vsel %vm1715_vm8, %v3667_v7, %v3671_v6  ;;  %v3675_v26 = vsel %vm1715_vm8, %v3663_v0, %v3667_v7 }
 0x253   : > { %5178 = vmatmul.mubr.msk.f32.gmra.mxu1 %vm1974_vm9, %v4912_v59  ;;  %3109 = vmatprep.mubr.f32.mxu0 %v5253_v2  ;;  %v3665_v15 = vpop.permute.xlu0 %3664 }
 0x254   : > { %3312 = vmatprep.mubr.f32.mxu1 %v5253_v2 }
 0x255   : > { %v3669_v28 = vpop.permute.xlu1 %3668 }
 0x256   : > { %4916 = vmatmul.mubr.msk.f32.gmra.mxu0 %vm1974_vm9, %v4912_v59  ;;  %v3672_v19 = vsel %vm1715_vm8, %v3665_v15, %v3669_v28 }
 0x257   : > { %4925 = vmatmul.mubr.msk.f32.vlgmr.msra.gmra.mxu1 %vm1974_vm9, %v4921_v3  ;;  %5184 = vmatprep.mubr.msk.f32.mxu0 %vm1974_vm9, %v4921_v3  ;;  %v3661_v25 = vpop.permute.xlu0 %3660 }
 0x258   : > { %5191 = vmatpush3.msra.mxu1 %v3456_v1  ;;  %3318 = vmatprep.mubr.f32.mxu1 %v5253_v2  ;;  %v3676_v5 = vsel %vm1715_vm8, %v3669_v28, %v3661_v25  ;;  %v3674_v24 = vsel %vm1715_vm8, %v3661_v25, %v3665_v15 }
 0x259   : > { %5192 = vmatprep.subr.mxu1 %v3455_v11 }
 0x25a   : > { %5193 = vmatpush3.msra.mxu1 %v3455_v11  ;;  %5185 = vmatmul.mubr.msk.f32.vlgmr.msra.gmra.mxu0 %vm1974_vm9, %v4922_v8 }
 0x25b   : > { %4926 = vmatmul.mubr.msk.f32.gmra.mxu1 %vm1974_vm9, %v4922_v8  ;;  %3498 = vmatpush1.msra.mxu0 %v3454_v13 }
 0x25c   : > { %3499 = vmatprep.subr.mxu0 %v3451_v14  ;;  %3718 = vmatprep.subr.mxu1 %v3673_v12 }
 0x25d   : > { %3500 = vmatpush1.msra.mxu0 %v3453_v18  ;;  %3324 = vmatprep.mubr.f32.mxu1 %v5253_v2 }
 0x25e   : > { %5187 = vmatprep.mubr.msk.f32.mxu0 %vm1974_vm9, %v4923_v17  ;;  %5200 = vmatprep.subr.mxu0 %v3677_v27 }
 0x25f   : > { %4927 = vmatmul.mubr.msk.f32.gmra.mxu1 %vm1974_vm9, %v4923_v17  ;;  %5188 = vmatmul.mubr.msk.f32.gmra.mxu0 %vm1974_vm9, %v4924_v22 }
 0x260   : > { %3330 = vmatprep.mubr.f32.mxu1 %v5253_v2  ;;  %3533 = vmatprep.mubr.f32.mxu0 %v5253_v2 }
 0x263   : > { %4928 = vmatmul.mubr.msk.f32.gmra.mxu1 %vm1974_vm9, %v4924_v22  ;;  %4937 = vmatmul.mubr.msk.f32.vlgmr.msra.gmra.mxu0 %vm1974_vm9, %v4933_v21 }
 0x264   : > { %5201 = vmatpush3.msra.mxu0 %v3677_v27  ;;  %3539 = vmatprep.mubr.f32.mxu0 %v5253_v2 }
 0x265   : > { %5202 = vmatprep.subr.mxu0 %v3676_v5  ;;  %5194 = vmatprep.mubr.msk.f32.mxu1 %vm1974_vm9, %v4933_v21 }
 0x266   : > { %5203 = vmatpush3.msra.mxu0 %v3676_v5 }
 0x267   : > { %4938 = vmatmul.mubr.msk.f32.gmra.mxu0 %vm1974_vm9, %v4934_v23  ;;  %5195 = vmatmul.mubr.msk.f32.vlgmr.msra.gmra.mxu1 %vm1974_vm9, %v4934_v23 }
 0x268   : > { %3719 = vmatpush1.msra.mxu1 %v3675_v26  ;;  %3545 = vmatprep.mubr.f32.mxu0 %v5253_v2 }
 0x269   : > { %3720 = vmatprep.subr.mxu1 %v3672_v19  ;;  %5197 = vmatprep.mubr.msk.f32.mxu1 %vm1974_vm9, %v4935_v29 }
 0x26a   : > { %3721 = vmatpush1.msra.mxu1 %v3674_v24 }
 0x26b   : > { %4939 = vmatmul.mubr.msk.f32.gmra.mxu0 %vm1974_vm9, %v4935_v29  ;;  %5198 = vmatmul.mubr.msk.f32.gmra.mxu1 %vm1974_vm9, %v4936_v30 }
 0x26c   : > { %3551 = vmatprep.mubr.f32.mxu0 %v5253_v2  ;;  %3754 = vmatprep.mubr.f32.mxu1 %v5253_v2 }
 0x26f   : > { %4940 = vmatmul.mubr.msk.f32.gmra.mxu0 %vm1974_vm9, %v4936_v30  ;;  %4949 = vmatmul.mubr.msk.f32.vlgmr.msra.gmra.mxu1 %vm1974_vm9, %v4945_v4 }
 0x270   : > { %3760 = vmatprep.mubr.f32.mxu1 %v5253_v2  ;;  %5204 = vmatprep.mubr.msk.f32.mxu0 %vm1974_vm9, %v4945_v4 }
 0x273   : > { %4950 = vmatmul.mubr.msk.f32.gmra.mxu1 %vm1974_vm9, %v4946_v31  ;;  %5205 = vmatmul.mubr.msk.f32.vlgmr.msra.gmra.mxu0 %vm1974_vm9, %v4946_v31 }
 0x274   : > { %3766 = vmatprep.mubr.f32.mxu1 %v5253_v2  ;;  %5207 = vmatprep.mubr.msk.f32.mxu0 %vm1974_vm9, %v4947_v32 }
 0x277   : > { %4951 = vmatmul.mubr.msk.f32.gmra.mxu1 %vm1974_vm9, %v4947_v32  ;;  %5208 = vmatmul.mubr.msk.f32.gmra.mxu0 %vm1974_vm9, %v4948_v36 }
 0x278   : > { %3772 = vmatprep.mubr.f32.mxu1 %v5253_v2 }
 0x27b   : > { %4952 = vmatmul.mubr.msk.f32.gmra.mxu1 %vm1974_vm9, %v4948_v36 }
 0x2c6   : > { %v2053_v33 = vpop.f32.mrf.mxu1 }
 0x2c8   : > { %v2055_v35 = vpop.f32.mrf.mxu1  ;;  %v5126_v38 = vpop.f32.mrf.mxu0 }
 0x2ca   : > { %v2059_v39 = vpop.f32.mrf.mxu1  ;;  %v2142_v40 = vpop.f32.mrf.mxu0 }
 0x2cc   : > { %v2061_v41 = vpop.f32.mrf.mxu1  ;;  %v5129_v48 = vpop.f32.mrf.mxu0 }
 0x2ce   : > { %v2065_v44 = vpop.f32.mrf.mxu1  ;;  %v2152_v42 = vpop.f32.mrf.mxu0 }
 0x2d0   : > { %v2067_v37 = vpop.f32.mrf.mxu1 }
 0x2d3   : > { %v2071_v43 = vpop.f32.mrf.mxu1 }
 0x2d4   : > { %v2239_v46 = vpop.f32.mrf.mxu0 }
 0x2d5   : > { %v6156_v51 = vadd.f32 %v2239_v46, %v2053_v33  ;;  %v2073_v52 = vpop.f32.mrf.mxu1 }
 0x2d6   : > { %v2241_v53 = vpop.f32.mrf.mxu0 }
 0x2d7   : > { %v2242_v54 = vadd.f32 %v2241_v53, %v2055_v35  ;;  %v5136_v2 = vpop.f32.mrf.mxu1 }
 0x2d8   : > { %v2245_v45 = vpop.f32.mrf.mxu0  ;;  %v6158_v47 = vadd.f32 %v5136_v2, %v5126_v38 }
 0x2d9   : > { %v2246_v56 = vadd.f32 %v2245_v45, %v2059_v39  ;;  %v2328_v57 = vpop.f32.mrf.mxu1 }
 0x2da   : > { %v2247_v58 = vpop.f32.mrf.mxu0  ;;  %v2329_v60 = vadd.f32 %v2328_v57, %v2142_v40 }
 0x2db   : > { %v2248_v61 = vadd.f32 %v2247_v58, %v2061_v41  ;;  %v5139_v62 = vpop.f32.mrf.mxu1 }
 0x2dc   : > { %v2251_v63 = vpop.f32.mrf.mxu0  ;;  %v2344_v49 = vadd.f32 %v5139_v62, %v5129_v48 }
 0x2dd   : > { %v2252_v59 = vadd.f32 %v2251_v63, %v2065_v44  ;;  %v2338_v0 = vpop.f32.mrf.mxu1 }
 0x2de   : > { %v2253_v1 = vpop.f32.mrf.mxu0  ;;  %v2339_v3 = vadd.f32 %v2338_v0, %v2152_v42 }
 0x2df   : > { %v2254_v6 = vadd.f32 %v2253_v1, %v2067_v37 }
 0x2e1   : > { %v2257_v7 = vpop.f32.mrf.mxu0  ;;  %v6160_v8 = vpop.f32.mrf.mxu1 }
 0x2e2   : > { %v2258_v11 = vadd.f32 %v2257_v7, %v2071_v43 }
 0x2e3   : > { %v2259_v12 = vpop.f32.mrf.mxu0  ;;  %v2450_v13 = vpop.f32.mrf.mxu1 }
 0x2e4   : > { %v2260_v14 = vadd.f32 %v2259_v12, %v2073_v52  ;;  %v2557_v15 = vadd.f32 %v2450_v13, %v2242_v54 }
 0x2e5   : > { %v2454_v17 = vpop.f32.mrf.mxu1  ;;  %v6162_v18 = vpop.f32.mrf.mxu0 }
 0x2e6   : > { %v2559_v22 = vadd.f32 %v2454_v17, %v2246_v56 }
 0x2e7   : > { %v2456_v27 = vpop.f32.mrf.mxu1  ;;  %v2537_v21 = vpop.f32.mrf.mxu0 }
 0x2e8   : > { %v2560_v25 = vadd.f32 %v2456_v27, %v2248_v61  ;;  %v2558_v28 = vadd.f32 %v2537_v21, %v2329_v60 }
 0x2e9   : > { %v2460_v5 = vpop.f32.mrf.mxu1  ;;  %v5149_v23 = vpop.f32.mrf.mxu0 }
 0x2ea   : > { %v2562_v29 = vadd.f32 %v2460_v5, %v2252_v59  ;;  %v2567_v26 = vadd.f32 %v5149_v23, %v2344_v49 }
 0x2eb   : > { %v2462_v19 = vpop.f32.mrf.mxu1  ;;  %v2547_v30 = vpop.f32.mrf.mxu0 }
 0x2ec   : > { %v2563_v24 = vadd.f32 %v2462_v19, %v2254_v6  ;;  %v2564_v4 = vadd.f32 %v2547_v30, %v2339_v3 }
 0x2ee   : > { %v2466_v31 = vpop.f32.mrf.mxu1 }
 0x2ef   : > { %v2565_v32 = vadd.f32 %v2466_v31, %v2258_v11  ;;  %v6164_v36 = vpop.f32.mrf.mxu0 }
 0x2f0   : > { %v2468_v33 = vpop.f32.mrf.mxu1 }
 0x2f1   : > { %v2566_v35 = vadd.f32 %v2468_v33, %v2260_v14  ;;  %v2671_v38 = vpop.f32.mrf.mxu0 }
 0x2f2   : > { %v2778_v39 = vadd.f32 %v2671_v38, %v2557_v15 }
 0x2f4   : > { %v6166_v40 = vpop.f32.mrf.mxu1 }
 0x2f5   : > { %v2675_v41 = vpop.f32.mrf.mxu0 }
 0x2f6   : > { %v2780_v44 = vadd.f32 %v2675_v41, %v2559_v22  ;;  %v2758_v48 = vpop.f32.mrf.mxu1 }
 0x2f7   : > { %v2677_v37 = vpop.f32.mrf.mxu0  ;;  %v2779_v42 = vadd.f32 %v2758_v48, %v2558_v28 }
 0x2f8   : > { %v2781_v43 = vadd.f32 %v2677_v37, %v2560_v25 }
 0x2f9   : > { %v2681_v46 = vpop.f32.mrf.mxu0 }
 0x2fa   : > { %v2783_v52 = vadd.f32 %v2681_v46, %v2562_v29  ;;  %v5159_v53 = vpop.f32.mrf.mxu1 }
 0x2fb   : > { %v2788_v54 = vadd.f32 %v5159_v53, %v2567_v26  ;;  %v2683_v2 = vpop.f32.mrf.mxu0 }
 0x2fc   : > { %v2784_v45 = vadd.f32 %v2683_v2, %v2563_v24  ;;  %v2768_v56 = vpop.f32.mrf.mxu1 }
 0x2fd   : > { %v2785_v57 = vadd.f32 %v2768_v56, %v2564_v4  ;;  %v2687_v58 = vpop.f32.mrf.mxu0 }
 0x2fe   : > { %v2786_v60 = vadd.f32 %v2687_v58, %v2565_v32  ;;  %v6168_v61 = vpop.f32.mrf.mxu1 }
 0x2ff   : > { %v2689_v62 = vpop.f32.mrf.mxu0 }
 0x300   : > { %v2787_v63 = vadd.f32 %v2689_v62, %v2566_v35  ;;  %v2874_v49 = vpop.f32.mrf.mxu1 }
 0x301   : > { %v6170_v59 = vadd.f32 %v2874_v49, %v2778_v39  ;;  %v6172_v0 = vpop.f32.mrf.mxu0 }
 0x302   : > { %v2878_v1 = vpop.f32.mrf.mxu1 }
 0x303   : > { %v2983_v3 = vadd.f32 %v2878_v1, %v2780_v44  ;;  %v2961_v6 = vpop.f32.mrf.mxu0 }
 0x304   : > { %v2880_v7 = vpop.f32.mrf.mxu1  ;;  %v6174_v11 = vadd.f32 %v2961_v6, %v2779_v42 }
 0x305   : > { %v2984_v12 = vadd.f32 %v2880_v7, %v2781_v43 }
 0x306   : > { %v2884_v13 = vpop.f32.mrf.mxu1  ;;  %v5169_v14 = vpop.f32.mrf.mxu0 }
 0x307   : > { %v2986_v15 = vadd.f32 %v2884_v13, %v2783_v52  ;;  %v2991_v17 = vadd.f32 %v5169_v14, %v2788_v54  ;;  %v2556_v14 = vadd.f32 %v6160_v8, %v6156_v51 }
 0x308   : > { %v2886_v22 = vpop.f32.mrf.mxu1  ;;  %v2971_v27 = vpop.f32.mrf.mxu0 }
 0x309   : > { %v2987_v21 = vadd.f32 %v2886_v22, %v2784_v45  ;;  %v2988_v25 = vadd.f32 %v2971_v27, %v2785_v57  ;;  %v2777_v27 = vadd.f32 %v6164_v36, %v2556_v14 }
 0x30a   : > { %v2890_v28 = vpop.f32.mrf.mxu1  ;;  %v3093_v5 = vpop.f32.mrf.mxu0 }
 0x30b   : > { %v2989_v23 = vadd.f32 %v2890_v28, %v2786_v60 }
 0x30c   : > { %v2892_v29 = vpop.f32.mrf.mxu1  ;;  %v6176_v26 = vpop.f32.mrf.mxu0 }
 0x30d   : > { %v2990_v19 = vadd.f32 %v2892_v29, %v2787_v63  ;;  %v2980_v29 = vadd.f32 %v6168_v61, %v2777_v27 }
 0x30e   : > { %v3099_v30 = vpop.f32.mrf.mxu0  ;;  %v5176_v24 = vpop.f32.mrf.mxu1 }
 0x30f   : > { %v6178_v4 = vadd.f32 %v3099_v30, %v2983_v3 }
 0x310   : > { %v3101_v31 = vpop.f32.mrf.mxu0  ;;  %v6180_v32 = vpop.f32.mrf.mxu1 }
 0x311   : > { %v3205_v33 = vadd.f32 %v3101_v31, %v2984_v12 }
 0x312   : > { %v3105_v35 = vpop.f32.mrf.mxu0 }
 0x313   : > { %v3207_v38 = vadd.f32 %v3105_v35, %v2986_v15  ;;  %v5179_v39 = vpop.f32.mrf.mxu1 }
 0x314   : > { %v6182_v41 = vadd.f32 %v5179_v39, %v2991_v17  ;;  %v3107_v44 = vpop.f32.mrf.mxu0 }
 0x315   : > { %v3208_v48 = vadd.f32 %v3107_v44, %v2987_v21  ;;  %v3192_v37 = vpop.f32.mrf.mxu1 }
 0x316   : > { %v3209_v42 = vadd.f32 %v3192_v37, %v2988_v25  ;;  %v3111_v43 = vpop.f32.mrf.mxu0 }
 0x317   : > { %v3210_v46 = vadd.f32 %v3111_v43, %v2989_v23  ;;  %v3314_v52 = vpop.f32.mrf.mxu1  ;;  %v2561_v23 = vadd.f32 %v6162_v18, %v6158_v47  ;;  %v3883_v47 = vpop.permute.xlu1 %3882 }
 0x318   : > { %v3113_v53 = vpop.f32.mrf.mxu0 }
 0x319   : > { %v3211_v54 = vadd.f32 %v3113_v53, %v2990_v19  ;;  %v6184_v2 = vpop.f32.mrf.mxu1  ;;  %v2782_v31 = vadd.f32 %v6166_v40, %v2561_v23 }
 0x31a   : > { %v5186_v45 = vpop.f32.mrf.mxu0 }
 0x31b   : > { %v6186_v56 = vpop.f32.mrf.mxu1  ;;  %v2985_v36 = vadd.f32 %v6172_v0, %v2782_v31 }
 0x31c   : > { %v6188_v57 = vpop.f32.mrf.mxu0 }
 0x31d   : > { %v3322_v58 = vpop.f32.mrf.mxu1  ;;  %v3206_v18 = vadd.f32 %v5176_v24, %v2985_v36 }
 0x31e   : > { %v3426_v60 = vadd.f32 %v3322_v58, %v3205_v33  ;;  %v3201_v33 = vadd.f32 %v3093_v5, %v2980_v29 }
 0x31f   : > { %v3326_v62 = vpop.f32.mrf.mxu1  ;;  %v6190_v63 = vpop.f32.mrf.mxu0  ;;  %v3427_v43 = vadd.f32 %v5186_v45, %v3206_v18 }
 0x320   : > { %v3428_v49 = vadd.f32 %v3326_v62, %v3207_v38  ;;  %v3422_v38 = vadd.f32 %v3314_v52, %v3201_v33  ;;  %v6216_v62 = vpop.permute.xlu1 %3892 }
 0x321   : > { %v3328_v1 = vpop.f32.mrf.mxu1  ;;  %v3413_v3 = vpop.f32.mrf.mxu0 }
 0x322   : > { %v3429_v6 = vadd.f32 %v3328_v1, %v3208_v48  ;;  %v3430_v7 = vadd.f32 %v3413_v3, %v3209_v42  ;;  %v6218_v1 = vpop.permute.xlu0 %3887 }
 0x323   : > { %v3332_v12 = vpop.f32.mrf.mxu1  ;;  %v3535_v13 = vpop.f32.mrf.mxu0 }
 0x324   : > { %v3431_v15 = vadd.f32 %v3332_v12, %v3210_v46  ;;  %v3643_v61 = vadd.f32 %v3535_v13, %v3422_v38 }
 0x325   : > { %v3334_v17 = vpop.f32.mrf.mxu1  ;;  %v3537_v22 = vpop.f32.mrf.mxu0 }
 0x326   : > { %v3432_v21 = vadd.f32 %v3334_v17, %v3211_v54  ;;  %v6241_v14 = vpop.permute.xlu0 %3897 }
 0x327   : > { %v6195_v25 = vpop.f32.mrf.mxu0  ;;  %v5196_v28 = vpop.f32.mrf.mxu1 }
 0x328   : > { %v3648_v0 = vadd.f32 %v5196_v28, %v3427_v43  ;;  %v3203_v28 = vadd.f32 %v6180_v32, %v6174_v11 }
 0x329   : > { %v3543_v19 = vpop.f32.mrf.mxu0  ;;  %v3624_v30 = vpop.f32.mrf.mxu1 }
 0x32a   : > { %v6201_v51 = vadd.f32 %v3543_v19, %v3426_v60 }
 0x32b   : > { %v3547_v8 = vpop.f32.mrf.mxu0  ;;  %v6203_v35 = vpop.f32.mrf.mxu1 }
 0x32c   : > { %v6206_v39 = vadd.f32 %v3547_v8, %v3428_v49 }
 0x32d   : > { %v3549_v44 = vpop.f32.mrf.mxu0  ;;  %v3634_v48 = vpop.f32.mrf.mxu1 }
 0x32e   : > { %v6208_v37 = vadd.f32 %v3549_v44, %v3429_v6  ;;  %v6210_v42 = vadd.f32 %v3634_v48, %v3430_v7  ;;  %v6226_v7 = vpop.permute.xlu1 %3978  ;;  %v3433_v48 = vadd.f32 %v6190_v63, %v6182_v41 }
 0x32f   : > { %v3553_v40 = vpop.f32.mrf.mxu0  ;;  %v3756_v5 = vpop.f32.mrf.mxu1 }
 0x330   : > { %v6212_v46 = vadd.f32 %v3553_v40, %v3431_v15  ;;  %v3864_v53 = vadd.f32 %v3756_v5, %v3643_v61  ;;  %v3202_v15 = vadd.f32 %v6176_v26, %v6170_v59  ;;  %v6258_v59 = vpop.permute.xlu0 %3983  ;;  %v3424_v26 = vadd.f32 %v6188_v57, %v3203_v28 }
 0x331   : > { %v3555_v54 = vpop.f32.mrf.mxu0 }
 0x332   : > { %v3900_v52 = vadd.f32 %v3883_v47, %v3864_v53  ;;  %v6214_v58 = vadd.f32 %v3555_v54, %v3432_v21  ;;  %v6235_v13 = vpop.permute.xlu1 %3988  ;;  %v3423_v27 = vadd.f32 %v6184_v2, %v3202_v15  ;;  %v3758_v21 = vpop.f32.mrf.mxu1  ;;  %v3645_v2 = vadd.f32 %v3624_v30, %v3424_v26 }
 0x333   : > { %v5206_v60 = vpop.f32.mrf.mxu0  ;;  %7133 = vst [vmem:[#allocation4_spill] sm:$0xff] %v6235_v13  ;;  %v3425_v30 = vadd.f32 %v6186_v56, %v6178_v4 }
 0x334   : > { %v3912_v24 = vmax.f32 %v3900_v52, 0.0  ;;  %v3869_v49 = vadd.f32 %v5206_v60, %v3648_v0  ;;  %v3644_v23 = vadd.f32 %v3537_v22, %v3423_v27  ;;  %v6267_v22 = vpop.permute.xlu0 %3993  ;;  %v3762_v36 = vpop.f32.mrf.mxu1 }
 0x335   : > { %v3845_v19 = vpop.f32.mrf.mxu0  ;;  %7135 = vst [vmem:[#allocation6_spill] sm:$0xff] %v6267_v22  ;;  %v3646_v38 = vadd.f32 %v6195_v25, %v3425_v30  ;;  %v3654_v25 = vadd.f32 %v6203_v35, %v3433_v48 }
 0x336   : > { %v6221_v3 = vmul.f32 %v3912_v24, %v5572_v55  ;;  %v3905_v45 = vadd.f32 %v6218_v1, %v3869_v49  ;;  %v6249_v17 = vpop.permute.xlu1 %4051  ;;  %v3865_v29 = vadd.f32 %v3758_v21, %v3644_v23  ;;  %v3866_v32 = vadd.f32 %v3845_v19, %v3645_v2  ;;  %v3764_v2 = vpop.f32.mrf.mxu1 }
 0x337   : > { %v3867_v4 = vadd.f32 %v3762_v36, %v3646_v38  ;;  %v3868_v30 = vadd.f32 %v3764_v2, %v6201_v51 }
 0x338   : > { %v3917_v6 = vmax.f32 %v3905_v45, 0.0  ;;  %3940 = vrot.lane.b32.xlu1 %v6221_v3, %s5255_s15  ;;  %v3901_v11 = vadd.f32 %v3883_v47, %v3865_v29  ;;  %v3902_v8 = vadd.f32 %v3883_v47, %v3866_v32  ;;  %v6282_v44 = vpop.permute.xlu0 %4056  ;;  %v5209_v47 = vpop.f32.mrf.mxu0 }
 0x339   : > { %v3903_v40 = vadd.f32 %v6218_v1, %v3867_v4  ;;  %v3875_v63 = vadd.f32 %v5209_v47, %v3654_v25  ;;  %v3904_v38 = vadd.f32 %v6218_v1, %v3868_v30 }
 0x33a   : > { %v6229_v12 = vmul.f32 %v3917_v6, %v5574_v50  ;;  %v6261_v31 = vpop.permute.xlu1 %4061  ;;  %v3913_v33 = vmax.f32 %v3901_v11, 0.0  ;;  %v3914_v56 = vmax.f32 %v3902_v8, 0.0  ;;  %v3855_v11 = vpop.f32.mrf.mxu0 }
 0x33b   : > { %7134 = vst [vmem:[#allocation5_spill] sm:$0xff] %v6261_v31  ;;  %v3915_v43 = vmax.f32 %v3903_v40, 0.0  ;;  %v3911_v53 = vadd.f32 %v6241_v14, %v3875_v63 }
 0x33c   : > { %4013 = vrot.lane.b32.xlu1 %v6221_v3, %s5254_s14  ;;  %3958 = vrot.lane.b32.xlu0 %v6229_v12, %s5255_s15  ;;  %v6287_v18 = vmul.f32 %v3913_v33, %v5594_v20  ;;  %v6298_v41 = vmul.f32 %v3914_v56, %v5574_v50  ;;  %v6300_v5 = vpop.permute.xlu0 %4066  ;;  %v3872_v33 = vadd.f32 %v3855_v11, %v6210_v42  ;;  %v3916_v42 = vmax.f32 %v3904_v38, 0.0 }
 0x33d   : > { %7137 = vst [vmem:[#allocation8_spill] sm:$0xff] %v6300_v5  ;;  %v6316_v0 = vmul.f32 %v3915_v43, %v5572_v55  ;;  %v3923_v52 = vmax.f32 %v3911_v53, 0.0  ;;  %v3768_v43 = vpop.f32.mrf.mxu1 }
 0x33e   : > { %v6273_v57 = vpop.permute.xlu1 %4136  ;;  %v3908_v48 = vadd.f32 %v6216_v62, %v3872_v33  ;;  %v6412_v1 = vmul.f32 %v3916_v42, %v5594_v20  ;;  %v3870_v2 = vadd.f32 %v3768_v43, %v6206_v39 }
 0x33f   : > { %v6325_v24 = vmul.f32 %v3923_v52, %v5574_v50 }
 0x340   : > { %4098 = vrot.lane.b32.xlu1 %v6221_v3, %s5256_s16  ;;  %4031 = vrot.lane.b32.xlu0 %v6229_v12, %s5254_s14  ;;  %v6313_v54 = vpop.permute.xlu0 %4141  ;;  %v3920_v4 = vmax.f32 %v3908_v48, 0.0  ;;  %v3906_v30 = vadd.f32 %v6216_v62, %v3870_v2  ;;  %v3770_v2 = vpop.f32.mrf.mxu1 }
 0x342   : > { %v6289_v61 = vpop.permute.xlu1 %4146  ;;  %v6415_v47 = vmul.f32 %v3920_v4, %v5574_v50  ;;  %v3918_v38 = vmax.f32 %v3906_v30, 0.0  ;;  %v3871_v30 = vadd.f32 %v3770_v2, %v6208_v37  ;;  %v3774_v16 = vpop.f32.mrf.mxu1 }
 0x343   : > { %7136 = vst [vmem:[#allocation7_spill] sm:$0xff] %v6289_v61 }
 0x344   : > { %4183 = vrot.lane.b32.xlu1 %v6221_v3, %s5257_s17  ;;  %4116 = vrot.lane.b32.xlu0 %v6229_v12, %s5256_s16  ;;  %v6327_v49 = vpop.permute.xlu0 %4151  ;;  %7147 = vst [vmem:[#allocation18_spill] sm:$0xff] %v6415_v47  ;;  %v6466_v42 = vmul.f32 %v3918_v38, %v5572_v55  ;;  %v3907_v38 = vadd.f32 %v6216_v62, %v3871_v30 }
 0x345   : > { %7139 = vst [vmem:[#allocation10_spill] sm:$0xff] %v6327_v49 }
 0x346   : > { %v6306_v35 = vpop.permute.xlu1 %4221  ;;  %7152 = vst [vmem:[#allocation23_spill] sm:$0xff] %v6466_v42  ;;  %v3919_v37 = vmax.f32 %v3907_v38, 0.0 }
 0x348   : > { %4317 = vrot.lane.b32.xlu1 %v6221_v3, %s5258_s18  ;;  %4201 = vrot.lane.b32.xlu0 %v6229_v12, %s5257_s17  ;;  %v6339_v6 = vpop.permute.xlu0 %4226 }
 0x34a   : > { %v6318_v60 = vpop.permute.xlu1 %4231 }
 0x34b   : > { %7138 = vst [vmem:[#allocation9_spill] sm:$0xff] %v6318_v60 }
 0x34c   : > { %4420 = vrot.lane.b32.xlu1 %v6229_v12, %s5259_s19  ;;  %4335 = vrot.lane.b32.xlu0 %v6229_v12, %s5258_s18  ;;  %v6347_v27 = vpop.permute.xlu0 %4236 }
 0x34d   : > { %7141 = vst [vmem:[#allocation12_spill] sm:$0xff] %v6347_v27 }
 0x34e   : > { %v6333_v45 = vpop.permute.xlu1 %4270 }
 0x350   : > { %4487 = vrot.lane.b32.xlu1 %v6221_v3, %s5260_s20  ;;  %4402 = vrot.lane.b32.xlu0 %v6221_v3, %s5259_s19  ;;  %v6359_v28 = vpop.permute.xlu0 %4275 }
 0x352   : > { %v6341_v15 = vpop.permute.xlu1 %4280 }
 0x353   : > { %7140 = vst [vmem:[#allocation11_spill] sm:$0xff] %v6341_v15 }
 0x354   : > { %4572 = vrot.lane.b32.xlu1 %v6221_v3, %s5261_s21  ;;  %4505 = vrot.lane.b32.xlu0 %v6229_v12, %s5260_s20  ;;  %v6367_v26 = vpop.permute.xlu0 %4285 }
 0x355   : > { %7143 = vst [vmem:[#allocation14_spill] sm:$0xff] %v6367_v26 }
 0x356   : > { %v6353_v21 = vpop.permute.xlu1 %4355 }
 0x358   : > { %3948 = vrot.lane.b32.xlu1 %v6287_v18, %s5255_s15  ;;  %4590 = vrot.lane.b32.xlu0 %v6229_v12, %s5261_s21  ;;  %v6379_v19 = vpop.permute.xlu0 %4360 }
 0x35a   : > { %v6361_v23 = vpop.permute.xlu1 %4365 }
 0x35b   : > { %7142 = vst [vmem:[#allocation13_spill] sm:$0xff] %v6361_v23 }
 0x35c   : > { %3956 = vrot.lane.b32.xlu1 %v6298_v41, %s5255_s15  ;;  %4410 = vrot.lane.b32.xlu0 %v6287_v18, %s5259_s19  ;;  %v6389_v8 = vpop.permute.xlu0 %4440 }
 0x35e   : > { %v6373_v29 = vpop.permute.xlu1 %4445 }
 0x360   : > { %4021 = vrot.lane.b32.xlu1 %v6287_v18, %s5254_s14  ;;  %4418 = vrot.lane.b32.xlu0 %v6298_v41, %s5259_s19  ;;  %v6403_v51 = vpop.permute.xlu0 %4370 }
 0x361   : > { %7145 = vst [vmem:[#allocation16_spill] sm:$0xff] %v6403_v51 }
 0x362   : > { %v6381_v32 = vpop.permute.xlu1 %4450 }
 0x363   : > { %7144 = vst [vmem:[#allocation15_spill] sm:$0xff] %v6381_v32 }
 0x364   : > { %4029 = vrot.lane.b32.xlu1 %v6298_v41, %s5254_s14  ;;  %3942 = vrot.lane.b32.xlu0 %v6316_v0, %s5255_s15  ;;  %v6417_v25 = vpop.permute.xlu0 %4525 }
 0x366   : > { %v6395_v36 = vpop.permute.xlu1 %4530 }
 0x368   : > { %4106 = vrot.lane.b32.xlu1 %v6287_v18, %s5256_s16  ;;  %3962 = vrot.lane.b32.xlu0 %v6325_v24, %s5255_s15  ;;  %v6429_v63 = vpop.permute.xlu0 %4455 }
 0x369   : > { %7148 = vst [vmem:[#allocation19_spill] sm:$0xff] %v6429_v63 }
 0x36a   : > { %v6405_v56 = vpop.permute.xlu1 %4535 }
 0x36b   : > { %7146 = vst [vmem:[#allocation17_spill] sm:$0xff] %v6405_v56 }
 0x36c   : > { %4114 = vrot.lane.b32.xlu1 %v6298_v41, %s5256_s16  ;;  %4015 = vrot.lane.b32.xlu0 %v6316_v0, %s5254_s14  ;;  %v6437_v53 = vpop.permute.xlu0 %4610 }
 0x36e   : > { %v6423_v40 = vpop.permute.xlu1 %4615 }
 0x370   : > { %4191 = vrot.lane.b32.xlu1 %v6287_v18, %s5257_s17  ;;  %4035 = vrot.lane.b32.xlu0 %v6325_v24, %s5254_s14  ;;  %v6450_v11 = vpop.permute.xlu0 %4620 }
 0x371   : > { %7151 = vst [vmem:[#allocation22_spill] sm:$0xff] %v6450_v11 }
 0x372   : > { %v6431_v50 = vpop.permute.xlu1 %4540 }
 0x373   : > { %7149 = vst [vmem:[#allocation20_spill] sm:$0xff] %v6431_v50 }
 0x374   : > { %4199 = vrot.lane.b32.xlu1 %v6298_v41, %s5257_s17  ;;  %4100 = vrot.lane.b32.xlu0 %v6316_v0, %s5256_s16 }
 0x376   : > { %v6443_v52 = vpop.permute.xlu1 %4625 }
 0x377   : > { %7150 = vst [vmem:[#allocation21_spill] sm:$0xff] %v6443_v52  ;;  %v3873_v52 = vadd.f32 %v3774_v16, %v6212_v46  ;;  %v6505_v16 = vmul.f32 %v3919_v37, %v5594_v20 }
 0x378   : > { %4325 = vrot.lane.b32.xlu1 %v6287_v18, %s5258_s18  ;;  %4120 = vrot.lane.b32.xlu0 %v6325_v24, %s5256_s16 }
 0x379   : > { %v3909_v2 = vadd.f32 %v6241_v14, %v3873_v52 }
 0x37b   : > { %v3921_v46 = vmax.f32 %v3909_v2, 0.0 }
 0x37c   : > { %4333 = vrot.lane.b32.xlu1 %v6298_v41, %s5258_s18  ;;  %4185 = vrot.lane.b32.xlu0 %v6316_v0, %s5257_s17 }
 0x37d   : > { %v6514_v52 = vmul.f32 %v3921_v46, %v5572_v55 }
 0x380   : > { %4495 = vrot.lane.b32.xlu1 %v6287_v18, %s5260_s20  ;;  %4205 = vrot.lane.b32.xlu0 %v6325_v24, %s5257_s17 }
 0x384   : > { %4503 = vrot.lane.b32.xlu1 %v6298_v41, %s5260_s20  ;;  %4319 = vrot.lane.b32.xlu0 %v6316_v0, %s5258_s18 }
 0x388   : > { %4580 = vrot.lane.b32.xlu1 %v6287_v18, %s5261_s21  ;;  %4339 = vrot.lane.b32.xlu0 %v6325_v24, %s5258_s18 }
 0x38c   : > { %4588 = vrot.lane.b32.xlu1 %v6298_v41, %s5261_s21  ;;  %4489 = vrot.lane.b32.xlu0 %v6316_v0, %s5260_s20 }
 0x390   : > { %4404 = vrot.lane.b32.xlu1 %v6316_v0, %s5259_s19  ;;  %4574 = vrot.lane.b32.xlu0 %v6316_v0, %s5261_s21 }
 0x394   : > { %4424 = vrot.lane.b32.xlu1 %v6325_v24, %s5259_s19  ;;  %4509 = vrot.lane.b32.xlu0 %v6325_v24, %s5260_s20 }
 0x398   : > { %3960 = vrot.lane.b32.xlu1 %v6415_v47, %s5255_s15  ;;  %3950 = vrot.lane.b32.xlu0 %v6412_v1, %s5255_s15 }
 0x39c   : > { %4033 = vrot.lane.b32.xlu1 %v6415_v47, %s5254_s14  ;;  %4023 = vrot.lane.b32.xlu0 %v6412_v1, %s5254_s14 }
 0x3a0   : > { %4118 = vrot.lane.b32.xlu1 %v6415_v47, %s5256_s16  ;;  %4108 = vrot.lane.b32.xlu0 %v6412_v1, %s5256_s16 }
 0x3a4   : > { %4203 = vrot.lane.b32.xlu1 %v6415_v47, %s5257_s17  ;;  %4193 = vrot.lane.b32.xlu0 %v6412_v1, %s5257_s17 }
 0x3a8   : > { %4337 = vrot.lane.b32.xlu1 %v6415_v47, %s5258_s18  ;;  %4327 = vrot.lane.b32.xlu0 %v6412_v1, %s5258_s18 }
 0x3aa   : > { %v3941_v33 = vpop.permute.xlu1 %3940 }
 0x3ac   : > { %4412 = vrot.lane.b32.xlu1 %v6412_v1, %s5259_s19  ;;  %4422 = vrot.lane.b32.xlu0 %v6415_v47, %s5259_s19 }
 0x3ae   : > { %v6457_v48 = vpop.permute.xlu1 %4013  ;;  %v6459_v39 = vpop.permute.xlu0 %3958 }
 0x3b0   : > { %4592 = vrot.lane.b32.xlu1 %v6415_v47, %s5261_s21  ;;  %4497 = vrot.lane.b32.xlu0 %v6412_v1, %s5260_s20 }
 0x3b2   : > { %v6468_v4 = vpop.permute.xlu1 %4098  ;;  %v6470_v43 = vpop.permute.xlu0 %4031 }
 0x3b4   : > { %3944 = vrot.lane.b32.xlu1 %v6466_v42, %s5255_s15  ;;  %4507 = vrot.lane.b32.xlu0 %v6415_v47, %s5260_s20 }
 0x3b6   : > { %v6477_v9 = vpop.permute.xlu1 %4183  ;;  %v6479_v34 = vpop.permute.xlu0 %4116 }
 0x3b8   : > { %4017 = vrot.lane.b32.xlu1 %v6466_v42, %s5254_s14  ;;  %4582 = vrot.lane.b32.xlu0 %v6412_v1, %s5261_s21 }
 0x3ba   : > { %v6487_v50 = vpop.permute.xlu1 %4317  ;;  %v6489_v63 = vpop.permute.xlu0 %4201 }
 0x3bc   : > { %4102 = vrot.lane.b32.xlu1 %v6466_v42, %s5256_s16  ;;  %4406 = vrot.lane.b32.xlu0 %v6466_v42, %s5259_s19 }
 0x3be   : > { %v6496_v51 = vpop.permute.xlu1 %4420  ;;  %v6498_v26 = vpop.permute.xlu0 %4335 }
 0x3c0   : > { %4187 = vrot.lane.b32.xlu1 %v6466_v42, %s5257_s17  ;;  %4491 = vrot.lane.b32.xlu0 %v6466_v42, %s5260_s20 }
 0x3c2   : > { %v6507_v62 = vpop.permute.xlu1 %4487  ;;  %v4403_v30 = vpop.permute.xlu0 %4402 }
 0x3c4   : > { %4321 = vrot.lane.b32.xlu1 %v6466_v42, %s5258_s18  ;;  %4584 = vrot.lane.b32.xlu0 %v6505_v16, %s5261_s21 }
 0x3c6   : > { %v6516_v38 = vpop.permute.xlu1 %4572  ;;  %v6518_v27 = vpop.permute.xlu0 %4505 }
 0x3c8   : > { %4576 = vrot.lane.b32.xlu1 %v6466_v42, %s5261_s21  ;;  %3946 = vrot.lane.b32.xlu0 %v6514_v52, %s5255_s15  ;;  %v3776_v42 = vpop.f32.mrf.mxu1 }
 0x3c9   : > { %v3874_v47 = vadd.f32 %v3776_v42, %v6214_v58 }
 0x3ca   : > { %v3949_v37 = vpop.permute.xlu1 %3948  ;;  %v6524_v2 = vpop.permute.xlu0 %4590 }
 0x3cb   : > { %v3968_v49 = vsel %vm320_vm2, %v3941_v33, %v3949_v37  ;;  %v3910_v58 = vadd.f32 %v6241_v14, %v3874_v47 }
 0x3cc   : > { %3952 = vrot.lane.b32.xlu1 %v6505_v16, %s5255_s15  ;;  %4019 = vrot.lane.b32.xlu0 %v6514_v52, %s5254_s14  ;;  %v3997_v23 = vmul.f32 %v6226_v7, %v3968_v49 }
 0x3ce   : > { %v3957_v55 = vpop.permute.xlu1 %3956  ;;  %v4411_v46 = vpop.permute.xlu0 %4410 }
 0x3cf   : > { %v3964_v22 = vsel %vm320_vm2, %v3949_v37, %v3957_v55  ;;  %v3972_v5 = vsel %vm320_vm2, %v3957_v55, %v3941_v33  ;;  %v6538_v11 = vsel %vm1361_vm6, %v4403_v30, %v4411_v46 }
 0x3d0   : > { %4025 = vrot.lane.b32.xlu1 %v6505_v16, %s5254_s14  ;;  %4104 = vrot.lane.b32.xlu0 %v6514_v52, %s5256_s16  ;;  %v3996_v31 = vmul.f32 %v6226_v7, %v3972_v5 }
 0x3d2   : > { %v4022_v56 = vpop.permute.xlu1 %4021  ;;  %v4419_v32 = vpop.permute.xlu0 %4418 }
 0x3d3   : > { %v4041_v37 = vsel %vm333_vm1, %v6457_v48, %v4022_v56  ;;  %v6549_v33 = vsel %vm1361_vm6, %v4411_v46, %v4419_v32  ;;  %v6553_v55 = vsel %vm1361_vm6, %v4419_v32, %v4403_v30  ;;  %v3998_v30 = vmul.f32 %v6226_v7, %v3964_v22 }
 0x3d4   : > { %v4070_v15 = vmul.f32 %v6249_v17, %v4041_v37  ;;  %4110 = vrot.lane.b32.xlu1 %v6505_v16, %s5256_s16  ;;  %4189 = vrot.lane.b32.xlu0 %v6514_v52, %s5257_s17 }
 0x3d6   : > { %v4082_v60 = vadd.f32 %v4070_v15, %v3997_v23  ;;  %v4030_v61 = vpop.permute.xlu1 %4029  ;;  %v6562_v46 = vpop.permute.xlu0 %3942 }
 0x3d7   : > { %v4037_v32 = vsel %vm333_vm1, %v4022_v56, %v4030_v61  ;;  %v4045_v49 = vsel %vm333_vm1, %v4030_v61, %v6457_v48 }
 0x3d8   : > { %v4069_v37 = vmul.f32 %v6249_v17, %v4045_v49  ;;  %v4071_v13 = vmul.f32 %v6249_v17, %v4037_v32  ;;  %4195 = vrot.lane.b32.xlu1 %v6505_v16, %s5257_s17  ;;  %4323 = vrot.lane.b32.xlu0 %v6514_v52, %s5258_s18  ;;  %v3973_v17 = vsel %vm320_vm2, %v6459_v39, %v6562_v46 }
 0x3d9   : > { %v3999_v47 = vmul.f32 %v6258_v59, %v3973_v17 }
 0x3da   : > { %v4081_v5 = vadd.f32 %v4069_v37, %v3996_v31  ;;  %v4083_v15 = vadd.f32 %v4071_v13, %v3998_v30  ;;  %v4107_v23 = vpop.permute.xlu1 %4106  ;;  %v6578_v56 = vpop.permute.xlu0 %3962  ;;  %v3922_v13 = vmax.f32 %v3910_v58, 0.0 }
 0x3db   : > { %v4126_v7 = vsel %vm663_vm3, %v6468_v4, %v4107_v23 }
 0x3dc   : > { %v4155_v22 = vmul.f32 %v6273_v57, %v4126_v7  ;;  %4329 = vrot.lane.b32.xlu1 %v6505_v16, %s5258_s18  ;;  %4493 = vrot.lane.b32.xlu0 %v6514_v52, %s5260_s20  ;;  %v6612_v37 = vmul.f32 %v3922_v13, %v5594_v20 }
 0x3de   : > { %v4167_v14 = vadd.f32 %v4155_v22, %v4082_v60  ;;  %v4115_v31 = vpop.permute.xlu1 %4114  ;;  %v6592_v61 = vpop.permute.xlu0 %4015 }
 0x3df   : > { %v4122_v48 = vsel %vm663_vm3, %v4107_v23, %v4115_v31  ;;  %v4130_v42 = vsel %vm663_vm3, %v4115_v31, %v6468_v4  ;;  %v4046_v32 = vsel %vm333_vm1, %v6470_v43, %v6592_v61 }
 0x3e0   : > { %v4154_v49 = vmul.f32 %v6273_v57, %v4130_v42  ;;  %v4156_v60 = vmul.f32 %v6273_v57, %v4122_v48  ;;  %v4072_v30 = vmul.f32 %v6282_v44, %v4046_v32  ;;  %4414 = vrot.lane.b32.xlu1 %v6505_v16, %s5259_s19  ;;  %4578 = vrot.lane.b32.xlu0 %v6514_v52, %s5261_s21 }
 0x3e2   : > { %v4166_v4 = vadd.f32 %v4154_v49, %v4081_v5  ;;  %v4168_v58 = vadd.f32 %v4156_v60, %v4083_v15  ;;  %v4084_v23 = vadd.f32 %v4072_v30, %v3999_v47  ;;  %v4192_v7 = vpop.permute.xlu1 %4191  ;;  %v6614_v17 = vpop.permute.xlu0 %4035  ;;  %v4288_v60 = vmul.f32 %v6333_v45, %v6221_v3 }
 0x3e3   : > { %v4211_v57 = vsel %vm840_vm4, %v6477_v9, %v4192_v7  ;;  %v4290_v3 = vmul.f32 %v6333_v45, %v6298_v41 }
 0x3e4   : > { %v4240_v22 = vmul.f32 %v6306_v35, %v4211_v57  ;;  %4499 = vrot.lane.b32.xlu1 %v6505_v16, %s5260_s20  ;;  %3954 = vrot.lane.b32.xlu0 %v6612_v37, %s5255_s15 }
 0x3e6   : > { %v4252_v20 = vadd.f32 %v4240_v22, %v4167_v14  ;;  %v4200_v13 = vpop.permute.xlu1 %4199  ;;  %v6624_v5 = vpop.permute.xlu0 %4100 }
 0x3e7   : > { %v4207_v15 = vsel %vm840_vm4, %v4192_v7, %v4200_v13  ;;  %v4215_v31 = vsel %vm840_vm4, %v4200_v13, %v6477_v9  ;;  %v4131_v47 = vsel %vm663_vm3, %v6479_v34, %v6624_v5 }
 0x3e8   : > { %v4239_v48 = vmul.f32 %v6306_v35, %v4215_v31  ;;  %v4241_v42 = vmul.f32 %v6306_v35, %v4207_v15  ;;  %v4157_v14 = vmul.f32 %v6313_v54, %v4131_v47  ;;  %4408 = vrot.lane.b32.xlu1 %v6514_v52, %s5259_s19  ;;  %4027 = vrot.lane.b32.xlu0 %v6612_v37, %s5254_s14  ;;  %s5211_s14 = smul.u32 3, %s7177_s30 }
 0x3ea   : > { %v4251_v32 = vadd.f32 %v4239_v48, %v4166_v4  ;;  %v4253_v49 = vadd.f32 %v4241_v42, %v4168_v58  ;;  %v4169_v9 = vadd.f32 %v4157_v14, %v4084_v23  ;;  %v4326_v30 = vpop.permute.xlu1 %4325  ;;  %v6644_v7 = vpop.permute.xlu0 %4120  ;;  %v4289_v4 = vmul.f32 %v6333_v45, %v6287_v18  ;;  %v4679_v14 = vld [vmem:[#allocation2] sm:$0x1] }
 0x3eb   : > { %v4345_v35 = vsel %vm1184_vm5, %v6487_v50, %v4326_v30  ;;  %v4458_v58 = vmul.f32 %v6389_v8, %v6538_v11 }
 0x3ec   : > { %v4300_v57 = vadd.f32 %v4288_v60, %v4251_v32  ;;  %v4373_v22 = vmul.f32 %v6353_v21, %v4345_v35  ;;  %4501 = vrot.lane.b32.xlu1 %v6612_v37, %s5260_s20  ;;  %4112 = vrot.lane.b32.xlu0 %v6612_v37, %s5256_s16  ;;  %v4301_v13 = vadd.f32 %v4289_v4, %v4252_v20 }
 0x3ed   : > { %v4302_v47 = vadd.f32 %v4290_v3, %v4253_v49  ;;  %v4460_v32 = vmul.f32 %v6389_v8, %v6553_v55 }
 0x3ee   : > { %v4385_v23 = vadd.f32 %v4373_v22, %v4300_v57  ;;  %v4334_v15 = vpop.permute.xlu1 %4333  ;;  %v6660_v31 = vpop.permute.xlu0 %4185 }
 0x3ef   : > { %v4341_v48 = vsel %vm1184_vm5, %v4326_v30, %v4334_v15  ;;  %v4349_v42 = vsel %vm1184_vm5, %v4334_v15, %v6487_v50  ;;  %v4216_v18 = vsel %vm840_vm4, %v6489_v63, %v6660_v31  ;;  %v4459_v50 = vmul.f32 %v6389_v8, %v6549_v33 }
 0x3f0   : > { %v4374_v41 = vmul.f32 %v6353_v21, %v4341_v48  ;;  %v4375_v45 = vmul.f32 %v6353_v21, %v4349_v42  ;;  %v4242_v11 = vmul.f32 %v6339_v6, %v4216_v18  ;;  %4586 = vrot.lane.b32.xlu1 %v6612_v37, %s5261_s21  ;;  %4197 = vrot.lane.b32.xlu0 %v6612_v37, %s5257_s17  ;;  %s305_s17 = scalar_lea.vmem %s7107_s8, %s5211_s14 }
 0x3f1   : > { %v4470_v20 = vadd.f32 %v4458_v58, %v4385_v23 }
 0x3f2   : > { %v4386_v49 = vadd.f32 %v4374_v41, %v4301_v13  ;;  %v4387_v60 = vadd.f32 %v4375_v45, %v4302_v47  ;;  %v6682_v30 = vadd.f32 %v4242_v11, %v4169_v9  ;;  %v4496_v21 = vpop.permute.xlu1 %4495  ;;  %v6684_v35 = vpop.permute.xlu0 %4205 }
 0x3f3   : > { %v4515_v57 = vsel %vm1538_vm7, %v6507_v62, %v4496_v21 }
 0x3f4   : > { %v4543_v22 = vmul.f32 %v6417_v25, %v4515_v57  ;;  %4682 = vperm.xlu1 %5232, %v4679_v14   ;;  %4331 = vrot.lane.b32.xlu0 %v6612_v37, %s5258_s18  ;;  %v4471_v33 = vadd.f32 %v4459_v50, %v4386_v49  ;;  %v4472_v4 = vadd.f32 %v4460_v32, %v4387_v60 }
 0x3f6   : > { %v4555_v8 = vadd.f32 %v4543_v22, %v4470_v20  ;;  %v4504_v55 = vpop.permute.xlu1 %4503  ;;  %v6692_v3 = vpop.permute.xlu0 %4319 }
 0x3f7   : > { %v4511_v9 = vsel %vm1538_vm7, %v4496_v21, %v4504_v55  ;;  %v4519_v58 = vsel %vm1538_vm7, %v4504_v55, %v6507_v62 }
 0x3f8   : > { %v4544_v23 = vmul.f32 %v6417_v25, %v4511_v9  ;;  %v4545_v13 = vmul.f32 %v6417_v25, %v4519_v58  ;;  %4416 = vrot.lane.b32.xlu0 %v6612_v37, %s5259_s19 }
 0x3fa   : > { %v4556_v15 = vadd.f32 %v4544_v23, %v4471_v33  ;;  %v4557_v47 = vadd.f32 %v4545_v13, %v4472_v4  ;;  %v4581_v48 = vpop.permute.xlu1 %4580  ;;  %v6703_v42 = vpop.permute.xlu0 %4339 }
 0x3fb   : > { %v4600_v18 = vsel %vm1715_vm8, %v6516_v38, %v4581_v48 }
 0x3fc   : > { %v4628_v41 = vmul.f32 %v6437_v53, %v4600_v18  ;;  %4594 = vrot.lane.b32.xlu0 %v6325_v24, %s5261_s21 }
 0x3fe   : > { %v6711_v62 = vadd.f32 %v4628_v41, %v4555_v8  ;;  %v4589_v25 = vpop.permute.xlu1 %4588  ;;  %v6713_v45 = vpop.permute.xlu0 %4489 }
 0x3ff   : > { %v4596_v11 = vsel %vm1715_vm8, %v4581_v48, %v4589_v25  ;;  %v4604_v50 = vsel %vm1715_vm8, %v4589_v25, %v6516_v38 }
 0x400   : > { %v4629_v20 = vmul.f32 %v6437_v53, %v4596_v11  ;;  %v4630_v14 = vmul.f32 %v6437_v53, %v4604_v50 }
 0x402   : > { %v6722_v32 = vadd.f32 %v4629_v20, %v4556_v15  ;;  %v6724_v49 = vadd.f32 %v4630_v14, %v4557_v47  ;;  %v4405_v60 = vpop.permute.xlu1 %4404  ;;  %v6726_v21 = vpop.permute.xlu0 %4574 }
 0x406   : > { %v6728_v57 = vpop.permute.xlu1 %4424  ;;  %v6730_v22 = vpop.permute.xlu0 %4509 }
 0x40a   : > { %v6732_v33 = vpop.permute.xlu1 %3960  ;;  %v3951_v4 = vpop.permute.xlu0 %3950 }
 0x40b   : > { %v3969_v38 = vsel %vm320_vm2, %v6562_v46, %v3951_v4  ;;  %v3965_v53 = vsel %vm320_vm2, %v3951_v4, %v6459_v39  ;;  %v4291_v4 = vmul.f32 %v6359_v28, %v6316_v0 }
 0x40c   : > { %v4000_v23 = vmul.f32 %v6258_v59, %v3969_v38  ;;  %v4001_v13 = vmul.f32 %v6258_v59, %v3965_v53  ;;  %v4293_v38 = vmul.f32 %v6359_v28, %v6229_v12 }
 0x40e   : > { %v6740_v8 = vpop.permute.xlu1 %4033  ;;  %v4024_v55 = vpop.permute.xlu0 %4023 }
 0x40f   : > { %v4038_v9 = vsel %vm333_vm1, %v4024_v55, %v6470_v43  ;;  %v4042_v58 = vsel %vm333_vm1, %v6592_v61, %v4024_v55 }
 0x410   : > { %v4073_v46 = vmul.f32 %v6282_v44, %v4042_v58  ;;  %v4074_v15 = vmul.f32 %v6282_v44, %v4038_v9  ;;  %v4303_v9 = vadd.f32 %v4291_v4, %v6682_v30  ;;  %v4520_v30 = vsel %vm1538_vm7, %v6518_v27, %v6713_v45 }
 0x412   : > { %v4085_v39 = vadd.f32 %v4073_v46, %v4000_v23  ;;  %v4086_v47 = vadd.f32 %v4074_v15, %v4001_v13  ;;  %v6752_v48 = vpop.permute.xlu1 %4118  ;;  %v4109_v18 = vpop.permute.xlu0 %4108 }
 0x413   : > { %v4123_v43 = vsel %vm663_vm3, %v4109_v18, %v6479_v34  ;;  %v4127_v61 = vsel %vm663_vm3, %v6624_v5, %v4109_v18  ;;  %v4350_v5 = vsel %vm1184_vm5, %v6498_v26, %v6692_v3 }
 0x414   : > { %v4158_v41 = vmul.f32 %v6313_v54, %v4127_v61  ;;  %v4159_v59 = vmul.f32 %v6313_v54, %v4123_v43  ;;  %v4378_v23 = vmul.f32 %v6379_v19, %v4350_v5 }
 0x416   : > { %v4170_v25 = vadd.f32 %v4158_v41, %v4085_v39  ;;  %v4171_v11 = vadd.f32 %v4159_v59, %v4086_v47  ;;  %v6762_v44 = vpop.permute.xlu1 %4203  ;;  %v4194_v50 = vpop.permute.xlu0 %4193  ;;  %v4548_v41 = vmul.f32 %v6395_v36, %v4520_v30 }
 0x417   : > { %v4208_v20 = vsel %vm840_vm4, %v4194_v50, %v6489_v63  ;;  %v4212_v34 = vsel %vm840_vm4, %v6660_v31, %v4194_v50  ;;  %v4292_v31 = vmul.f32 %v6359_v28, %v6412_v1 }
 0x418   : > { %v4243_v54 = vmul.f32 %v6339_v6, %v4212_v34  ;;  %v4244_v14 = vmul.f32 %v6339_v6, %v4208_v20  ;;  %v4435_v6 = vsel %vm1361_vm6, %v6496_v51, %v4405_v60 }
 0x419   : > { %v4463_v15 = vmul.f32 %v6373_v29, %v4435_v6 }
 0x41a   : > { %v4255_v63 = vadd.f32 %v4243_v54, %v4170_v25  ;;  %v4256_v53 = vadd.f32 %v4244_v14, %v4171_v11  ;;  %v6780_v55 = vpop.permute.xlu1 %4337  ;;  %v4328_v58 = vpop.permute.xlu0 %4327 }
 0x41b   : > { %v4342_v12 = vsel %vm1184_vm5, %v4328_v58, %v6498_v26  ;;  %v4346_v0 = vsel %vm1184_vm5, %v6692_v3, %v4328_v58  ;;  %v4605_v3 = vsel %vm1715_vm8, %v6524_v2, %v6726_v21 }
 0x41c   : > { %v4305_v13 = vadd.f32 %v4293_v38, %v4256_v53  ;;  %v4304_v46 = vadd.f32 %v4292_v31, %v4255_v63  ;;  %v4376_v28 = vmul.f32 %v6379_v19, %v4346_v0  ;;  %v4377_v1 = vmul.f32 %v6379_v19, %v4342_v12 }
 0x41d   : > { %v4633_v50 = vmul.f32 %v6423_v40, %v4605_v3  ;;  %v7155_v3 = vld [vmem:[#allocation7_spill] sm:$0xff] }
 0x41e   : > { %v4390_v39 = vadd.f32 %v4378_v23, %v4305_v13  ;;  %v4388_v47 = vadd.f32 %v4376_v28, %v4303_v9  ;;  %v4389_v26 = vadd.f32 %v4377_v1, %v4304_v46  ;;  %v4413_v18 = vpop.permute.xlu1 %4412  ;;  %v6802_v43 = vpop.permute.xlu0 %4422  ;;  %v7154_v13 = vld [vmem:[#allocation5_spill] sm:$0xff] }
 0x41f   : > { %v4427_v19 = vsel %vm1361_vm6, %v4413_v18, %v6496_v51  ;;  %v4431_v61 = vsel %vm1361_vm6, %v4405_v60, %v4413_v18 }
 0x420   : > { %v4475_v59 = vadd.f32 %v4463_v15, %v4390_v39  ;;  %v4461_v25 = vmul.f32 %v6373_v29, %v4431_v61  ;;  %v4462_v11 = vmul.f32 %v6373_v29, %v4427_v19 }
 0x422   : > { %v4560_v20 = vadd.f32 %v4548_v41, %v4475_v59  ;;  %v4473_v34 = vadd.f32 %v4461_v25, %v4388_v47  ;;  %v6817_v5 = vpop.permute.xlu1 %4592  ;;  %v4498_v54 = vpop.permute.xlu0 %4497  ;;  %v4474_v14 = vadd.f32 %v4462_v11, %v4389_v26  ;;  %v7156_v25 = vld [vmem:[#allocation9_spill] sm:$0xff] }
 0x423   : > { %v4512_v51 = vsel %vm1538_vm7, %v4498_v54, %v6518_v27  ;;  %v4516_v60 = vsel %vm1538_vm7, %v6713_v45, %v4498_v54 }
 0x424   : > { %v4546_v4 = vmul.f32 %v6395_v36, %v4516_v60  ;;  %v4547_v29 = vmul.f32 %v6395_v36, %v4512_v51  ;;  %v4645_v38 = vadd.f32 %v4633_v50, %v4560_v20 }
 0x426   : > { %v4558_v63 = vadd.f32 %v4546_v4, %v4473_v34  ;;  %v4559_v53 = vadd.f32 %v4547_v29, %v4474_v14  ;;  %v3945_v31 = vpop.permute.xlu1 %3944  ;;  %v6827_v9 = vpop.permute.xlu0 %4507  ;;  %v6830_v58 = vadd.f32 %v4645_v38, %v6724_v49  ;;  %v7153_v49 = vld [vmem:[#allocation4_spill] sm:$0xff] }
 0x427   : > { %v3974_v27 = vsel %vm320_vm2, %v6732_v33, %v3945_v31 }
 0x428   : > { %v4002_v0 = vmul.f32 %v7153_v49, %v3974_v27 }
 0x42a   : > { %v4018_v23 = vpop.permute.xlu1 %4017  ;;  %v4583_v45 = vpop.permute.xlu0 %4582 }
 0x42b   : > { %v4047_v6 = vsel %vm333_vm1, %v6740_v8, %v4018_v23  ;;  %v4597_v36 = vsel %vm1715_vm8, %v4583_v45, %v6524_v2  ;;  %v4601_v12 = vsel %vm1715_vm8, %v6726_v21, %v4583_v45 }
 0x42c   : > { %v4075_v46 = vmul.f32 %v7154_v13, %v4047_v6  ;;  %v4631_v28 = vmul.f32 %v6423_v40, %v4601_v12  ;;  %v4632_v1 = vmul.f32 %v6423_v40, %v4597_v36 }
 0x42e   : > { %v4087_v30 = vadd.f32 %v4075_v46, %v4002_v0  ;;  %v4643_v15 = vadd.f32 %v4631_v28, %v4558_v63  ;;  %v4644_v39 = vadd.f32 %v4632_v1, %v4559_v53  ;;  %v4103_v47 = vpop.permute.xlu1 %4102  ;;  %v6848_v26 = vpop.permute.xlu0 %4406 }
 0x42f   : > { %v4132_v2 = vsel %vm663_vm3, %v6752_v48, %v4103_v47 }
 0x430   : > { %v6854_v21 = vadd.f32 %v4643_v15, %v6711_v62  ;;  %v6857_v18 = vadd.f32 %v4644_v39, %v6722_v32  ;;  %v4160_v19 = vmul.f32 %v7155_v3, %v4132_v2  ;;  %v7157_v2 = vld [vmem:[#allocation18_spill] sm:$0xff] }
 0x432   : > { %v4172_v61 = vadd.f32 %v4160_v19, %v4087_v30  ;;  %v4188_v40 = vpop.permute.xlu1 %4187  ;;  %v6860_v41 = vpop.permute.xlu0 %4491 }
 0x433   : > { %v4217_v59 = vsel %vm840_vm4, %v6762_v44, %v4188_v40 }
 0x434   : > { %v4245_v11 = vmul.f32 %v7156_v25, %v4217_v59 }
 0x436   : > { %v4257_v50 = vadd.f32 %v4245_v11, %v4172_v61  ;;  %v4322_v20 = vpop.permute.xlu1 %4321  ;;  %v6866_v34 = vpop.permute.xlu0 %4584 }
 0x43a   : > { %v6868_v62 = vpop.permute.xlu1 %4576  ;;  %v6870_v32 = vpop.permute.xlu0 %3946 }
 0x43e   : > { %v3953_v54 = vpop.permute.xlu1 %3952  ;;  %v6872_v51 = vpop.permute.xlu0 %4019 }
 0x43f   : > { %v3966_v60 = vsel %vm320_vm2, %v3953_v54, %v6732_v33  ;;  %v3970_v27 = vsel %vm320_vm2, %v3945_v31, %v3953_v54 }
 0x440   : > { %v4004_v63 = vmul.f32 %v7153_v49, %v3966_v60  ;;  %v4003_v12 = vmul.f32 %v7153_v49, %v3970_v27  ;;  %v7160_v27 = vld [vmem:[#allocation23_spill] sm:$0xff] }
 0x442   : > { %v4026_v14 = vpop.permute.xlu1 %4025  ;;  %v6877_v4 = vpop.permute.xlu0 %4104 }
 0x443   : > { %v4039_v29 = vsel %vm333_vm1, %v4026_v14, %v6740_v8  ;;  %v4043_v38 = vsel %vm333_vm1, %v4018_v23, %v4026_v14  ;;  %v7159_v14 = vld [vmem:[#allocation13_spill] sm:$0xff] }
 0x444   : > { %v4077_v53 = vmul.f32 %v7154_v13, %v4039_v29  ;;  %v4076_v45 = vmul.f32 %v7154_v13, %v4043_v38 }
 0x446   : > { %v4089_v33 = vadd.f32 %v4077_v53, %v4004_v63  ;;  %v4111_v6 = vpop.permute.xlu1 %4110  ;;  %v6889_v36 = vpop.permute.xlu0 %4189  ;;  %v4088_v31 = vadd.f32 %v4076_v45, %v4003_v12 }
 0x447   : > { %v4124_v8 = vsel %vm663_vm3, %v4111_v6, %v6752_v48  ;;  %v4128_v23 = vsel %vm663_vm3, %v4103_v47, %v4111_v6  ;;  %v4351_v47 = vsel %vm1184_vm5, %v6780_v55, %v4322_v20 }
 0x448   : > { %v4161_v0 = vmul.f32 %v7155_v3, %v4128_v23  ;;  %v4162_v46 = vmul.f32 %v7155_v3, %v4124_v8  ;;  %v7158_v3 = vld [vmem:[#allocation11_spill] sm:$0xff]  ;;  %v4381_v29 = vmul.f32 %v7159_v14, %v4351_v47  ;;  %v7162_v8 = vld [vmem:[#allocation17_spill] sm:$0xff] }
 0x449   : > { %v4296_v19 = vmul.f32 %v7158_v3, %v7157_v2  ;;  %v4294_v45 = vmul.f32 %v7158_v3, %v7160_v27 }
 0x44a   : > { %v4174_v28 = vadd.f32 %v4162_v46, %v4089_v33  ;;  %v4196_v13 = vpop.permute.xlu1 %4195  ;;  %v6899_v1 = vpop.permute.xlu0 %4323  ;;  %v4173_v15 = vadd.f32 %v4161_v0, %v4088_v31  ;;  %v7161_v33 = vld [vmem:[#allocation15_spill] sm:$0xff] }
 0x44b   : > { %v4209_v30 = vsel %vm840_vm4, %v4196_v13, %v6762_v44  ;;  %v4213_v48 = vsel %vm840_vm4, %v4188_v40, %v4196_v13  ;;  %v4295_v44 = vmul.f32 %v7158_v3, %v6505_v16  ;;  %v4436_v40 = vsel %vm1361_vm6, %v6802_v43, %v6848_v26 }
 0x44c   : > { %v4246_v39 = vmul.f32 %v7156_v25, %v4213_v48  ;;  %v4247_v49 = vmul.f32 %v7156_v25, %v4209_v30  ;;  %v4521_v25 = vsel %vm1538_vm7, %v6827_v9, %v6860_v41  ;;  %v4466_v6 = vmul.f32 %v7161_v33, %v4436_v40 }
 0x44d   : > { %v4551_v23 = vmul.f32 %v7162_v8, %v4521_v25  ;;  %v4306_v31 = vadd.f32 %v4294_v45, %v4257_v50 }
 0x44e   : > { %v4258_v61 = vadd.f32 %v4246_v39, %v4173_v15  ;;  %v4259_v59 = vadd.f32 %v4247_v49, %v4174_v28  ;;  %v4330_v11 = vpop.permute.xlu1 %4329  ;;  %v6915_v54 = vpop.permute.xlu0 %4493  ;;  %v4598_v49 = vsel %vm1715_vm8, %v6866_v34, %v6817_v5 }
 0x44f   : > { %v4343_v60 = vsel %vm1184_vm5, %v4330_v11, %v6780_v55  ;;  %v4347_v16 = vsel %vm1184_vm5, %v4322_v20, %v4330_v11  ;;  %v4606_v20 = vsel %vm1715_vm8, %v6817_v5, %v6868_v62 }
 0x450   : > { %v4308_v38 = vadd.f32 %v4296_v19, %v4259_v59  ;;  %v4307_v63 = vadd.f32 %v4295_v44, %v4258_v61  ;;  %v4380_v53 = vmul.f32 %v7159_v14, %v4343_v60  ;;  %v4379_v0 = vmul.f32 %v7159_v14, %v4347_v16  ;;  %v7163_v19 = vld [vmem:[#allocation22_spill] sm:$0xff] }
 0x451   : > { %v4636_v61 = vmul.f32 %v7163_v19, %v4606_v20  ;;  %v4635_v25 = vmul.f32 %v7163_v19, %v4598_v49 }
 0x452   : > { %v4393_v12 = vadd.f32 %v4381_v29, %v4308_v38  ;;  %v4415_v55 = vpop.permute.xlu1 %4414  ;;  %v6937_v46 = vpop.permute.xlu0 %4578  ;;  %v4392_v48 = vadd.f32 %v4380_v53, %v4307_v63  ;;  %v4391_v50 = vadd.f32 %v4379_v0, %v4306_v31  ;;  %v3975_v63 = vsel %vm320_vm2, %v6578_v56, %v6870_v32  ;;  %v7165_v31 = vld [vmem:[#allocation6_spill] sm:$0xff] }
 0x453   : > { %v4428_v28 = vsel %vm1361_vm6, %v4415_v55, %v6802_v43  ;;  %v4432_v13 = vsel %vm1361_vm6, %v6848_v26, %v4415_v55  ;;  %v4602_v26 = vsel %vm1715_vm8, %v6868_v62, %v6866_v34  ;;  %v4048_v62 = vsel %vm333_vm1, %v6614_v17, %v6872_v51 }
 0x454   : > { %v4478_v30 = vadd.f32 %v4466_v6, %v4393_v12  ;;  %v4464_v15 = vmul.f32 %v7161_v33, %v4432_v13  ;;  %v4465_v39 = vmul.f32 %v7161_v33, %v4428_v28  ;;  %v4634_v34 = vmul.f32 %v7163_v19, %v4602_v26  ;;  %v7164_v33 = vld [vmem:[#allocation8_spill] sm:$0xff]  ;;  %v7166_v13 = vld [vmem:[#allocation10_spill] sm:$0xff] }
 0x455   : > { %v4133_v53 = vsel %vm663_vm3, %v6644_v7, %v6877_v4  ;;  %v4078_v6 = vmul.f32 %v7164_v33, %v4048_v62  ;;  %v4005_v28 = vmul.f32 %v7165_v31, %v3975_v63  ;;  %v4352_v26 = vsel %vm1184_vm5, %v6703_v42, %v6899_v1 }
 0x456   : > { %v4477_v47 = vadd.f32 %v4465_v39, %v4392_v48  ;;  %v4500_v2 = vpop.permute.xlu1 %4499  ;;  %v3955_v3 = vpop.permute.xlu0 %3954  ;;  %v4563_v43 = vadd.f32 %v4551_v23, %v4478_v30  ;;  %v4476_v44 = vadd.f32 %v4464_v15, %v4391_v50  ;;  %v4163_v30 = vmul.f32 %v7166_v13, %v4133_v53  ;;  %v7167_v39 = vld [vmem:[#allocation12_spill] sm:$0xff] }
 0x457   : > { %v4513_v59 = vsel %vm1538_vm7, %v4500_v2, %v6827_v9  ;;  %v4517_v5 = vsel %vm1538_vm7, %v6860_v41, %v4500_v2 }
 0x458   : > { %v4549_v11 = vmul.f32 %v7162_v8, %v4517_v5  ;;  %v4550_v40 = vmul.f32 %v7162_v8, %v4513_v59  ;;  %v4648_v60 = vadd.f32 %v4636_v61, %v4563_v43  ;;  %v3971_v8 = vsel %vm320_vm2, %v6870_v32, %v3955_v3 }
 0x459   : > { %v4006_v32 = vmul.f32 %v7165_v31, %v3971_v8 }
 0x45a   : > { %v4561_v9 = vadd.f32 %v4549_v11, %v4476_v44  ;;  %v4562_v16 = vadd.f32 %v4550_v40, %v4477_v47  ;;  %v4028_v14 = vpop.permute.xlu0 %4027  ;;  %v6981_v38 = vadd.f32 %v6830_v58, %v4648_v60  ;;  %v4218_v58 = vsel %vm840_vm4, %v6684_v35, %v6889_v36  ;;  %v7168_v40 = vld [vmem:[#allocation14_spill] sm:$0xff] }
 0x45b   : > { %v4040_v41 = vsel %vm333_vm1, %v4028_v14, %v6614_v17  ;;  %v4044_v29 = vsel %vm333_vm1, %v6872_v51, %v4028_v14  ;;  %v4409_v17 = vpop.permute.xlu1 %4408  ;;  %v3967_v51 = vsel %vm320_vm2, %v3955_v3, %v6578_v56  ;;  %v4248_v49 = vmul.f32 %v7167_v39, %v4218_v58 }
 0x45c   : > { %v4646_v27 = vadd.f32 %v4634_v34, %v4561_v9  ;;  %v4647_v45 = vadd.f32 %v4635_v25, %v4562_v16  ;;  %v4079_v12 = vmul.f32 %v7164_v33, %v4044_v29  ;;  %v4080_v0 = vmul.f32 %v7164_v33, %v4040_v41  ;;  %v7170_v33 = vld [vmem:[#allocation19_spill] sm:$0xff] }
 0x45d   : > { %v4299_v25 = vmul.f32 %v7168_v40, %v6325_v24  ;;  %v4297_v62 = vmul.f32 %v7168_v40, %v6514_v52  ;;  %v4437_v14 = vsel %vm1361_vm6, %v6728_v57, %v4409_v17 }
 0x45e   : > { %v7003_v23 = vadd.f32 %v6854_v21, %v4646_v27  ;;  %v4113_v55 = vpop.permute.xlu0 %4112  ;;  %v7008_v20 = vadd.f32 %v6857_v18, %v4647_v45  ;;  %v4007_v21 = vmul.f32 %v7165_v31, %v3967_v51  ;;  %v4090_v18 = vadd.f32 %v4078_v6, %v4005_v28 }
 0x45f   : > { %v4125_v56 = vsel %vm663_vm3, %v4113_v55, %v6644_v7  ;;  %v4129_v48 = vsel %vm663_vm3, %v6877_v4, %v4113_v55  ;;  %v4091_v47 = vadd.f32 %v4079_v12, %v4006_v32  ;;  %v4502_v3 = vpop.permute.xlu1 %4501  ;;  %v4522_v27 = vsel %vm1538_vm7, %v6730_v22, %v6915_v54 }
 0x460   : > { %v4165_v15 = vmul.f32 %v7166_v13, %v4125_v56  ;;  %v4164_v50 = vmul.f32 %v7166_v13, %v4129_v48  ;;  %v4092_v2 = vadd.f32 %v4080_v0, %v4007_v21  ;;  %v4175_v7 = vadd.f32 %v4163_v30, %v4090_v18  ;;  %v7171_v13 = vld [vmem:[#allocation20_spill] sm:$0xff]  ;;  %v7172_v18 = vld [vmem:[#allocation21_spill] sm:$0xff] }
 0x461   : > { %v4469_v6 = vmul.f32 %v7170_v33, %v4437_v14  ;;  %v4554_v30 = vmul.f32 %v7171_v13, %v4522_v27 }
 0x462   : > { %v4198_v43 = vpop.permute.xlu0 %4197  ;;  %v4176_v61 = vadd.f32 %v4164_v50, %v4091_v47  ;;  %v4177_v59 = vadd.f32 %v4165_v15, %v4092_v2  ;;  %v4260_v11 = vadd.f32 %v4248_v49, %v4175_v7 }
 0x463   : > { %v4210_v4 = vsel %vm840_vm4, %v4198_v43, %v6684_v35  ;;  %v4214_v19 = vsel %vm840_vm4, %v6889_v36, %v4198_v43  ;;  %v4298_v35 = vmul.f32 %v7168_v40, %v6612_v37  ;;  %v7169_v36 = vld [vmem:[#allocation16_spill] sm:$0xff]  ;;  %v4587_v29 = vpop.permute.xlu1 %4586 }
 0x464   : > { %v4249_v5 = vmul.f32 %v7167_v39, %v4214_v19  ;;  %v4250_v44 = vmul.f32 %v7167_v39, %v4210_v4  ;;  %v4384_v16 = vmul.f32 %v7169_v36, %v4352_v26  ;;  %v4309_v45 = vadd.f32 %v4297_v62, %v4260_v11 }
 0x465   : > { %v4603_v8 = vsel %vm1715_vm8, %v6937_v46, %v4587_v29 }
 0x466   : > { %v4261_v60 = vadd.f32 %v4249_v5, %v4176_v61  ;;  %v4262_v34 = vadd.f32 %v4250_v44, %v4177_v59  ;;  %v4332_v9 = vpop.permute.xlu0 %4331 }
 0x467   : > { %v4344_v41 = vsel %vm1184_vm5, %v4332_v9, %v6703_v42  ;;  %v4348_v24 = vsel %vm1184_vm5, %v6899_v1, %v4332_v9  ;;  %v4514_v42 = vsel %vm1538_vm7, %v4502_v3, %v6730_v22  ;;  %v4518_v1 = vsel %vm1538_vm7, %v6915_v54, %v4502_v3 }
 0x468   : > { %v4311_v52 = vadd.f32 %v4299_v25, %v4262_v34  ;;  %v4310_v63 = vadd.f32 %v4298_v35, %v4261_v60  ;;  %v4382_v37 = vmul.f32 %v7169_v36, %v4348_v24  ;;  %v4383_v53 = vmul.f32 %v7169_v36, %v4344_v41 }
 0x469   : > { %v4552_v56 = vmul.f32 %v7171_v13, %v4518_v1  ;;  %v4553_v32 = vmul.f32 %v7171_v13, %v4514_v42 }
 0x46a   : > { %v4396_v58 = vadd.f32 %v4384_v16, %v4311_v52  ;;  %v4417_v51 = vpop.permute.xlu0 %4416  ;;  %v4394_v12 = vadd.f32 %v4382_v37, %v4309_v45  ;;  %v4395_v31 = vadd.f32 %v4383_v53, %v4310_v63 }
 0x46b   : > { %v4429_v0 = vsel %vm1361_vm6, %v4417_v51, %v6728_v57  ;;  %v4433_v55 = vsel %vm1361_vm6, %v4409_v17, %v4417_v51  ;;  %v4637_v57 = vmul.f32 %v7172_v18, %v4603_v8  ;;  %v5263_v8 = vmov 1966171168  }
 0x46c   : > { %v4467_v22 = vmul.f32 %v7170_v33, %v4433_v55  ;;  %v4468_v28 = vmul.f32 %v7170_v33, %v4429_v0  ;;  %v4481_v54 = vadd.f32 %v4469_v6, %v4396_v58 }
 0x46e   : > { %v4479_v21 = vadd.f32 %v4467_v22, %v4394_v12  ;;  %v4480_v48 = vadd.f32 %v4468_v28, %v4395_v31  ;;  %v4595_v15 = vpop.permute.xlu0 %4594  ;;  %v4566_v39 = vadd.f32 %v4554_v30, %v4481_v54  ;;  %v4715_v12 = vunpack.c.l.s4 %v5263_v8 }
 0x46f   : > { %v4599_v17 = vsel %vm1715_vm8, %v4587_v29, %v4595_v15  ;;  %v4607_v49 = vsel %vm1715_vm8, %v4595_v15, %v6937_v46  ;;  %v4683_v9 = vpop.permute.xlu1 %4682 }
 0x470   : > { %v4564_v50 = vadd.f32 %v4552_v56, %v4479_v21  ;;  %v4565_v47 = vadd.f32 %v4553_v32, %v4480_v48  ;;  %v4638_v2 = vmul.f32 %v7172_v18, %v4599_v17  ;;  %v4639_v3 = vmul.f32 %v7172_v18, %v4607_v49 }
 0x471   : > { %v4716_v0 = vunpack.c.0.s8 %v4715_v12  ;;  %v7175_v32 = vlaneseq }
 0x472   : > { %v4649_v43 = vadd.f32 %v4637_v57, %v4564_v50  ;;  %v4650_v7 = vadd.f32 %v4638_v2, %v4565_v47  ;;  %v4651_v26 = vadd.f32 %v4639_v3, %v4566_v39 }
 0x473   : > { %vm4739_vm10 = vcmp.lt.s32.totalorder %v7175_v32, 384 }
 0x474   : > { %v4654_v4 = vadd.f32 %v7003_v23, %v4649_v43  ;;  %v4663_v19 = vadd.f32 %v7008_v20, %v4650_v7  ;;  %v4672_v61 = vadd.f32 %v6981_v38, %v4651_v26  ;;  %v7173_v38 = vld [vmem:[#allocation3_spill] sm:$0xff] }
 0x475   : > { %v7174_v24 = vsub.s32 0, %v7173_v38  ;;  %v4719_v31 = vsub.s32 %v4716_v0, %v7173_v38 }
 0x476   : > { %v4655_v59 = vrot.slane %v4654_v4, 4  ;;  %v4664_v5 = vrot.slane %v4663_v19, 4  ;;  %v4673_v44 = vrot.slane %v4672_v61, 4 }
 0x477   : > { %v4688_v29 = vrot.slane %v4683_v9, %v7174_v24 }
 0x478   : > { %v4665_v10 = vadd.f32 %v4664_v5, %v4663_v19  ;;  %v4674_v46 = vadd.f32 %v4673_v44, %v4672_v61  ;;  %v4656_v11 = vadd.f32 %v4655_v59, %v4654_v4 }
 0x47a   : > { %v4666_v40 = vrot.slane %v4665_v10, 2  ;;  %v4675_v25 = vrot.slane %v4674_v46, 2  ;;  %v4657_v60 = vrot.slane %v4656_v11, 2 }
 0x47c   : > { %v4658_v34 = vadd.f32 %v4657_v60, %v4656_v11  ;;  %v4667_v62 = vadd.f32 %v4666_v40, %v4665_v10  ;;  %v4676_v35 = vadd.f32 %v4675_v25, %v4674_v46 }
 0x47e   : > { %v4659_v36 = vrot.slane %v4658_v34, 1  ;;  %v4668_v16 = vrot.slane %v4667_v62, 1  ;;  %v4677_v23 = vrot.slane %v4676_v35, 1 }
 0x480   : > { %v4660_v14 = vadd.f32 %v4659_v36, %v4658_v34  ;;  %v4669_v20 = vadd.f32 %v4668_v16, %v4667_v62  ;;  %v4678_v41 = vadd.f32 %v4677_v23, %v4676_v35 }
 0x482   : > { %v4689_v52 = vadd.f32 %v4688_v29, %v4660_v14  ;;  %v4690_v63 = vadd.f32 %v4688_v29, %v4669_v20  ;;  %v4691_v37 = vadd.f32 %v4688_v29, %v4678_v41 }
 0x484   : > { %v4989_v53 = vmul.f32 -1.442695, %v4689_v52  ;;  %v4990_v27 = vmul.f32 -1.442695, %v4690_v63  ;;  %v4991_v45 = vmul.f32 -1.442695, %v4691_v37 }
 0x486   : > { %5233 = vpow2.f32 %v4989_v53 }
 0x487   : > { %5235 = vpow2.f32 %v4990_v27 }
 0x488   : > { %5237 = vpow2.f32 %v4991_v45 }
 0x493   : > { %v5234_v33 = vpop.eup %5233 }
 0x494   : > { %v5236_v6 = vpop.eup %5235  ;;  %v4701_v42 = vadd.f32 1.0, %v5234_v33 }
 0x495   : > { %v5238_v1 = vpop.eup %5237  ;;  %v4702_v58 = vadd.f32 1.0, %v5236_v6 }
 0x496   : > { %v4703_v51 = vadd.f32 1.0, %v5238_v1  ;;  %5239 = vrcp.f32 %v4701_v42 }
 0x497   : > { %5241 = vrcp.f32 %v4702_v58 }
 0x498   : > { %5243 = vrcp.f32 %v4703_v51 }
 0x4a3   : > { %v5240_v55 = vpop.eup %5239 }
 0x4a4   : > { %v5242_v22 = vpop.eup %5241 }
 0x4a5   : > { %v5244_v28 = vpop.eup %5243  ;;  %v4713_v54 = vcombine.low %v5240_v55, %v5242_v22 }
 0x4a6   : > { %v4727_v30 = vrot.slane %v5244_v28, %v4719_v31 }
 0x4a7   : > { %v4720_v13 = vrot.slane %v4713_v54, %v4719_v31 }
 0x4a9   : > { %v4728_v56 = vcombine.low %v4720_v13, %v4727_v30 }
 0x4ab   : > { %v4735_v21 = vrot.slane %v4728_v56, %v4719_v31 }
 0x4ad   : > { %4741 = vst.msk [vmem:[%s305_s17] sm:$0x7] %vm4739_vm10, %v4735_v21 }
 0x4ae PF: > { %s20_s29 = sadd.s32 1, %s5251_s29  }
 0x4af   : > { %p17_p4 = scmp.ge.s32.totalorder %s20_s29, 4  }
 0x4b1   :  { %19 = sbr.rel (!%p17_p4) target bundleno = 3 (0x3), region = 106 }

</bundles_post_ra>
